<compile_context>
chip_gen: v5e
topology: v5e:2x2
jax: 0.10.0
libtpu: 0.0.40
codegen_flags: <defaults>
</compile_context>

<pallas_src>
import math
import functools

import jax
import jax.numpy as jnp
from jax.experimental import pallas as pl
from jax.experimental.pallas import tpu as pltpu


def _round_up(x, m):
    return (x + m - 1) // m * m


def _aam_kernel(lbl_ref, x_ref, w_ref, *refs,
                cos_m, sin_m, th, mm, scale, tn, num_classes, padded_classes,
                emit_logits):
    # refs = (logits_ref?, loss_ref, m_sc, l_sc, t_sc)
    if emit_logits:
        logits_ref, loss_ref, m_sc, l_sc, t_sc = refs
    else:
        logits_ref = None
        loss_ref, m_sc, l_sc, t_sc = refs

    j = pl.program_id(1)  # class-tile index (innermost, "arbitrary")

    # Init online-softmax accumulators at the first class tile.
    @pl.when(j == 0)
    def _():
        m_sc[...] = jnp.full_like(m_sc, -jnp.inf)
        l_sc[...] = jnp.zeros_like(l_sc)
        t_sc[...] = jnp.zeros_like(t_sc)

    # Operands arrive pre-normalized in bf16: single MXU matmul, f32 accumulation.
    cosine = jnp.dot(x_ref[...], w_ref[...],
                     preferred_element_type=jnp.float32)        # (tm, tn)

    # Target-column mask from labels (no B x C one-hot input).
    lbl = lbl_ref[...]                                          # (tm, 1) int32
    col = jax.lax.broadcasted_iota(jnp.int32, cosine.shape, 1) + j * tn
    mask = (col == lbl).astype(jnp.float32)                     # (tm, tn), <=1 per row
    in_tile = jnp.logical_and(lbl >= j * tn,
                              lbl < (j + 1) * tn).astype(jnp.float32)   # (tm, 1)

    # Margin trig only on the per-row target cosine (tm values, not tm*tn).
    # TODO(synk): for tighter accuracy, recompute the target-row dot in f32.
    tcos = jnp.sum(mask * cosine, axis=-1, keepdims=True)       # (tm, 1)
    sine = jnp.sqrt(jnp.clip(1.0 - tcos * tcos, 0.0, 1.0))
    phi = tcos * cos_m - sine * sin_m
    phi = jnp.where(tcos - th > 0.0, phi, tcos - mm)            # hard-margin fallback

    # logits = s * (cosine + one_hot*(phi - cosine)), patched only at target column.
    logits = scale * (cosine + mask * (phi - tcos))             # (tm, tn), f32
    if emit_logits:
        logits_ref[...] = logits.astype(logits_ref.dtype)

    # Mask padded class columns out of the softmax (static: only emitted if padded).
    if padded_classes > num_classes:
        sm_logits = jnp.where(col < num_classes, logits, -jnp.inf)
    else:
        sm_logits = logits

    # Online softmax cross-entropy accumulation over class tiles.
    m_prev = m_sc[...]
    m_new = jnp.maximum(m_prev, jnp.max(sm_logits, axis=-1, keepdims=True))
    l_sc[...] = l_sc[...] * jnp.exp(m_prev - m_new) + \
        jnp.sum(jnp.exp(sm_logits - m_new), axis=-1, keepdims=True)
    m_sc[...] = m_new
    # Target logit is scale*phi whenever the label falls in this class tile.
    t_sc[...] = t_sc[...] + in_tile * (scale * phi)

    # Finalize per-sample loss once, at the last class tile.
    @pl.when(j == pl.num_programs(1) - 1)
    def _():
        loss_ref[...] = m_sc[...] + jnp.log(l_sc[...]) - t_sc[...]


def aamsoftmax_forward(embeddings, weight, labels, *, margin=0.2, scale=30.0,
                       tm=128, tn=512, return_logits=True,
                       logits_dtype=jnp.bfloat16):
    """AAMSoftmax forward.  weight is (C, D) as in the PyTorch head.

    Returns (mean_loss, scaled_logits) if return_logits else mean_loss.
    """
    B, D = embeddings.shape
    C, D2 = weight.shape
    assert D == D2

    # --- tile selection -----------------------------------------------------
    # tm multiple of 8 (sublane), tn multiple of 128 (lane).  Larger tm cuts how
    # often the (D, C) weight is re-streamed from HBM; larger tn amortizes
    # per-grid-step overhead.  On v7x, prefer a tm that yields >= 2 batch tiles
    # so the "parallel" axis shards across both TensorCores.
    if B < tm:
        tm = _round_up(B, 8)
    if C < tn:
        tn = _round_up(C, 128)
    B_pad = _round_up(B, tm)
    C_pad = _round_up(C, tn)

    # --- one-time operand prep (outside the hot loop) -----------------------
    # Normalize once in f32, cast to bf16, pad with zeros.  Halves the dominant
    # weight HBM stream and removes per-tile normalize work from the kernel.
    x32 = embeddings.astype(jnp.float32)
    x_n = x32 * jax.lax.rsqrt(jnp.sum(x32 * x32, axis=-1, keepdims=True) + 1e-12)
    w32 = weight.astype(jnp.float32)
    w_n = w32 * jax.lax.rsqrt(jnp.sum(w32 * w32, axis=-1, keepdims=True) + 1e-12)
    w_t = jnp.transpose(w_n)                                   # (D, C): classes on lanes

    x_bf = jnp.pad(x_n.astype(jnp.bfloat16), ((0, B_pad - B), (0, 0)))
    w_bf = jnp.pad(w_t.astype(jnp.bfloat16), ((0, 0), (0, C_pad - C)))
    # Padded rows get label -1 so the margin / target mask never fires for them.
    lbl = jnp.pad(labels.astype(jnp.int32).reshape(B, 1),
                  ((0, B_pad - B), (0, 0)), constant_values=-1)

    kernel = functools.partial(
        _aam_kernel,
        cos_m=math.cos(margin),
        sin_m=math.sin(margin),
        th=math.cos(math.pi - margin),
        mm=math.sin(math.pi - margin) * margin,
        scale=scale,
        tn=tn,
        num_classes=C,
        padded_classes=C_pad,
        emit_logits=return_logits,
    )

    grid = (B_pad // tm, C_pad // tn)

    out_shape = [jax.ShapeDtypeStruct((B_pad, 1), jnp.float32)]
    out_specs = [pl.BlockSpec((tm, 1), lambda i, j: (i, 0))]   # loss: j-invariant resident
    if return_logits:
        out_shape = [jax.ShapeDtypeStruct((B_pad, C_pad), logits_dtype)] + out_shape
        out_specs = [pl.BlockSpec((tm, tn), lambda i, j: (i, j))] + out_specs

    outs = pl.pallas_call(
        kernel,
        out_shape=tuple(out_shape),
        grid_spec=pltpu.PrefetchScalarGridSpec(
            num_scalar_prefetch=0,
            grid=grid,
            in_specs=[
                pl.BlockSpec((tm, 1), lambda i, j: (i, 0)),   # labels (tiny stream)
                pl.BlockSpec((tm, D), lambda i, j: (i, 0)),   # normalized bf16 emb (resident over j)
                # Weight streamed over class tiles; add pipeline_mode=pl.Buffered(3)
                # only if profiling still shows exposed DMA at small tn.
                pl.BlockSpec((D, tn), lambda i, j: (0, j)),
            ],
            out_specs=tuple(out_specs),
            scratch_shapes=[
                pltpu.VMEM((tm, 1), jnp.float32),  # running max
                pltpu.VMEM((tm, 1), jnp.float32),  # running sum-exp
                pltpu.VMEM((tm, 1), jnp.float32),  # target logit
            ],
        ),
        compiler_params=pltpu.CompilerParams(
            dimension_semantics=("parallel", "arbitrary"),
            vmem_limit_bytes=48 * 1024 * 1024,     # safe on v7x's 64 MiB VMEM
        ),
    )(lbl, x_bf, w_bf)

    if return_logits:
        logits_pad, per_sample_loss = outs
        logits = logits_pad[:B, :C]
    else:
        (per_sample_loss,) = outs
        logits = None

    loss = jnp.mean(per_sample_loss[:B, 0])
    return (loss, logits) if return_logits else loss


if __name__ == "__main__":
    # Small deterministic problem that exercises both grid axes AND the padding
    # path: batch=250 -> padded 256 (2 batch tiles of 128), dim=192,
    # classes=1000 -> padded 1024 (2 class tiles of 512).
    B, D, C = 250, 192, 1000
    key = jax.random.PRNGKey(0)
    k_emb, k_w, k_lbl = jax.random.split(key, 3)

    embeddings = jax.random.normal(k_emb, (B, D), dtype=jnp.float32)
    weight = jax.random.normal(k_w, (C, D), dtype=jnp.float32) * 0.1
    labels = jax.random.randint(k_lbl, (B,), 0, C, dtype=jnp.int32)

    fwd = jax.jit(functools.partial(aamsoftmax_forward, margin=0.2, scale=30.0))
    loss, logits = fwd(embeddings, weight, labels)
    jax.block_until_ready((loss, logits))

    # Loss-only path (no (B, C) logits writeback at all).
    fwd_loss_only = jax.jit(functools.partial(
        aamsoftmax_forward, margin=0.2, scale=30.0, return_logits=False))
    loss_only = fwd_loss_only(embeddings, weight, labels)
    jax.block_until_ready(loss_only)

    # Pure-JAX f32 reference (same math, no Pallas).  Tolerances account for the
    # bf16 MXU matmul (f32 accumulation) and the bf16 logits output dtype.
    def ref(emb, w, lbl, m=0.2, s=30.0):
        xn = emb / jnp.linalg.norm(emb, axis=-1, keepdims=True)
        wn = w / jnp.linalg.norm(w, axis=-1, keepdims=True)
        cos = xn @ wn.T
        sin = jnp.sqrt(jnp.clip(1 - cos * cos, 0.0, 1.0))
        phi = cos * math.cos(m) - sin * math.sin(m)
        phi = jnp.where(cos - math.cos(math.pi - m) > 0, phi,
                        cos - math.sin(math.pi - m) * m)
        oh = jax.nn.one_hot(lbl, w.shape[0])
        lg = s * (oh * phi + (1 - oh) * cos)
        lse = jax.scipy.special.logsumexp(lg, axis=-1)
        return jnp.mean(lse - jnp.sum(oh * lg, axis=-1)), lg

    ref_loss, ref_logits = ref(embeddings, weight, labels)
    assert jnp.allclose(loss, ref_loss, atol=1e-1, rtol=2e-2), (loss, ref_loss)
    assert jnp.allclose(loss_only, loss, atol=1e-5, rtol=1e-5), (loss_only, loss)
    assert jnp.allclose(logits.astype(jnp.float32), ref_logits,
                        atol=3.5e-1, rtol=3e-2), \
        float(jnp.max(jnp.abs(logits.astype(jnp.float32) - ref_logits)))

    print("KERNEL_OK")
</pallas_src>

<mosaic_0001>
module attributes {stable_mosaic.version = 11 : i64} {
  func.func @_aam_kernel(%arg0: i32, %arg1: i32, %arg2: memref<128x1xi32, #tpu.memory_space<vmem>>, %arg3: memref<128x192xbf16, #tpu.memory_space<vmem>>, %arg4: memref<192x512xbf16, #tpu.memory_space<vmem>>, %arg5: memref<128x512xbf16, #tpu.memory_space<vmem>>, %arg6: memref<128x1xf32, #tpu.memory_space<vmem>>, %arg7: memref<128x1xf32, #tpu.memory_space<vmem>>, %arg8: memref<128x1xf32, #tpu.memory_space<vmem>>, %arg9: memref<128x1xf32, #tpu.memory_space<vmem>>) attributes {dimension_semantics = [#tpu.dimension_semantics<parallel>, #tpu.dimension_semantics<arbitrary>], iteration_bounds = array<i64: 2, 2>, scalar_prefetch = 0 : i64, scratch_operands = 3 : i64, tpu.core_type = #tpu.core_type<tc>, window_params = [{transform_indices = @transform_0, window_bounds = array<i64: 128, 1>}, {transform_indices = @transform_1, window_bounds = array<i64: 128, 192>}, {transform_indices = @transform_2, window_bounds = array<i64: 192, 512>}, {transform_indices = @transform_3, window_bounds = array<i64: 128, 512>}, {transform_indices = @transform_4, window_bounds = array<i64: 128, 1>}]} {
    %c0_i32 = arith.constant 0 : i32
    %0 = arith.cmpi eq, %arg1, %c0_i32 : i32
    %1 = arith.extui %0 : i1 to i32
    %c0_i32_0 = arith.constant 0 : i32
    %2 = arith.cmpi ne, %1, %c0_i32_0 : i32
    scf.if %2 {
      %cst_38 = arith.constant 0xFF800000 : f32
      %85 = vector.broadcast %cst_38 : f32 to vector<128x1xf32>
      %c0_39 = arith.constant 0 : index
      %c0_40 = arith.constant 0 : index
      %86 = vector.load %arg7[%c0_39, %c0_40] : memref<128x1xf32, #tpu.memory_space<vmem>>, vector<128x1xf32>
      tpu.vector_store %arg7[%c0_39, %c0_40], %85 {strides = array<i32>} : memref<128x1xf32, #tpu.memory_space<vmem>>, vector<128x1xf32>,
      %cst_41 = arith.constant 0.000000e+00 : f32
      %87 = vector.broadcast %cst_41 : f32 to vector<128x1xf32>
      %c0_42 = arith.constant 0 : index
      %c0_43 = arith.constant 0 : index
      %88 = vector.load %arg8[%c0_42, %c0_43] : memref<128x1xf32, #tpu.memory_space<vmem>>, vector<128x1xf32>
      tpu.vector_store %arg8[%c0_42, %c0_43], %87 {strides = array<i32>} : memref<128x1xf32, #tpu.memory_space<vmem>>, vector<128x1xf32>,
      %cst_44 = arith.constant 0.000000e+00 : f32
      %89 = vector.broadcast %cst_44 : f32 to vector<128x1xf32>
      %c0_45 = arith.constant 0 : index
      %c0_46 = arith.constant 0 : index
      %90 = vector.load %arg9[%c0_45, %c0_46] : memref<128x1xf32, #tpu.memory_space<vmem>>, vector<128x1xf32>
      tpu.vector_store %arg9[%c0_45, %c0_46], %89 {strides = array<i32>} : memref<128x1xf32, #tpu.memory_space<vmem>>, vector<128x1xf32>,
    } else {
    }
    %c0 = arith.constant 0 : index
    %c0_1 = arith.constant 0 : index
    %3 = vector.load %arg3[%c0, %c0_1] : memref<128x192xbf16, #tpu.memory_space<vmem>>, vector<128x192xbf16>
    %c0_2 = arith.constant 0 : index
    %c0_3 = arith.constant 0 : index
    %4 = vector.load %arg4[%c0_2, %c0_3] : memref<192x512xbf16, #tpu.memory_space<vmem>>, vector<192x512xbf16>
    %cst = arith.constant dense<0.000000e+00> : vector<128x512xf32>
    %5 = tpu.matmul %3, %4, %cst {dimension_numbers = #tpu.dot_dimension_numbers<[1], [0], [0], [1], [0, 0, 1, 1], [], []>} : vector<128x192xbf16>, vector<192x512xbf16>, vector<128x512xf32> -> vector<128x512xf32>
    %c0_4 = arith.constant 0 : index
    %c0_5 = arith.constant 0 : index
    %6 = vector.load %arg2[%c0_4, %c0_5] : memref<128x1xi32, #tpu.memory_space<vmem>>, vector<128x1xi32>
    %7 = tpu.iota {dimensions = array<i32: 1>} : vector<128x512xi32>
    %c512_i32 = arith.constant 512 : i32
    %8 = arith.muli %arg1, %c512_i32 : i32
    %9 = vector.broadcast %8 : i32 to vector<128x512xi32>
    %10 = arith.addi %7, %9 : vector<128x512xi32>
    %11 = vector.broadcast %6 : vector<128x1xi32> to vector<128x512xi32>
    %12 = arith.cmpi eq, %10, %11 : vector<128x512xi32>
    %13 = arith.extui %12 : vector<128x512xi1> to vector<128x512xi32>
    %14 = arith.sitofp %13 : vector<128x512xi32> to vector<128x512xf32>
    %c512_i32_6 = arith.constant 512 : i32
    %15 = arith.muli %arg1, %c512_i32_6 : i32
    %16 = vector.broadcast %15 : i32 to vector<128x1xi32>
    %17 = arith.cmpi sge, %6, %16 : vector<128x1xi32>
    %c1_i32 = arith.constant 1 : i32
    %18 = arith.addi %arg1, %c1_i32 : i32
    %c512_i32_7 = arith.constant 512 : i32
    %19 = arith.muli %18, %c512_i32_7 : i32
    %20 = vector.broadcast %19 : i32 to vector<128x1xi32>
    %21 = arith.cmpi slt, %6, %20 : vector<128x1xi32>
    %22 = arith.andi %17, %21 : vector<128x1xi1>
    %23 = arith.extui %22 : vector<128x1xi1> to vector<128x1xi32>
    %24 = arith.sitofp %23 : vector<128x1xi32> to vector<128x1xf32>
    %25 = arith.mulf %14, %5 : vector<128x512xf32>
    %cst_8 = arith.constant dense<0.000000e+00> : vector<128xf32>
    %26 = vector.multi_reduction <add>, %25, %cst_8 [1] : vector<128x512xf32> to vector<128xf32>
    %27 = vector.shape_cast %26 : vector<128xf32> to vector<128x1xf32>
    %28 = arith.mulf %27, %27 : vector<128x1xf32>
    %cst_9 = arith.constant 1.000000e+00 : f32
    %29 = vector.broadcast %cst_9 : f32 to vector<128x1xf32>
    %30 = arith.subf %29, %28 : vector<128x1xf32>
    %cst_10 = arith.constant 0.000000e+00 : f32
    %cst_11 = arith.constant 1.000000e+00 : f32
    %31 = vector.broadcast %cst_10 : f32 to vector<128x1xf32>
    %32 = arith.maximumf %31, %30 : vector<128x1xf32>
    %33 = vector.broadcast %cst_11 : f32 to vector<128x1xf32>
    %34 = arith.minimumf %33, %32 : vector<128x1xf32>
    %35 = math.sqrt %34 : vector<128x1xf32>
    %cst_12 = arith.constant 0.980066597 : f32
    %36 = vector.broadcast %cst_12 : f32 to vector<128x1xf32>
    %37 = arith.mulf %27, %36 : vector<128x1xf32>
    %cst_13 = arith.constant 0.198669329 : f32
    %38 = vector.broadcast %cst_13 : f32 to vector<128x1xf32>
    %39 = arith.mulf %35, %38 : vector<128x1xf32>
    %40 = arith.subf %37, %39 : vector<128x1xf32>
    %cst_14 = arith.constant -0.980066597 : f32
    %41 = vector.broadcast %cst_14 : f32 to vector<128x1xf32>
    %42 = arith.subf %27, %41 : vector<128x1xf32>
    %cst_15 = arith.constant 0.000000e+00 : f32
    %43 = vector.broadcast %cst_15 : f32 to vector<128x1xf32>
    %44 = arith.cmpf ogt, %42, %43 : vector<128x1xf32>
    %cst_16 = arith.constant 0.0397338644 : f32
    %45 = vector.broadcast %cst_16 : f32 to vector<128x1xf32>
    %46 = arith.subf %27, %45 : vector<128x1xf32>
    %47 = arith.select %44, %40, %46 : vector<128x1xi1>, vector<128x1xf32>
    %48 = arith.subf %47, %27 : vector<128x1xf32>
    %49 = vector.broadcast %48 : vector<128x1xf32> to vector<128x512xf32>
    %50 = arith.mulf %14, %49 : vector<128x512xf32>
    %51 = arith.addf %5, %50 : vector<128x512xf32>
    %cst_17 = arith.constant 3.000000e+01 : f32
    %52 = vector.broadcast %cst_17 : f32 to vector<128x512xf32>
    %53 = arith.mulf %52, %51 : vector<128x512xf32>
    %54 = arith.truncf %53 : vector<128x512xf32> to vector<128x512xbf16>
    %c0_18 = arith.constant 0 : index
    %c0_19 = arith.constant 0 : index
    %55 = vector.load %arg5[%c0_18, %c0_19] : memref<128x512xbf16, #tpu.memory_space<vmem>>, vector<128x512xbf16>
    tpu.vector_store %arg5[%c0_18, %c0_19], %54 {strides = array<i32>} : memref<128x512xbf16, #tpu.memory_space<vmem>>, vector<128x512xbf16>,
    %c1000_i32 = arith.constant 1000 : i32
    %56 = vector.broadcast %c1000_i32 : i32 to vector<128x512xi32>
    %57 = arith.cmpi slt, %10, %56 : vector<128x512xi32>
    %cst_20 = arith.constant 0xFF800000 : f32
    %58 = vector.broadcast %cst_20 : f32 to vector<128x512xf32>
    %59 = arith.select %57, %53, %58 : vector<128x512xi1>, vector<128x512xf32>
    %c0_21 = arith.constant 0 : index
    %c0_22 = arith.constant 0 : index
    %60 = vector.load %arg7[%c0_21, %c0_22] : memref<128x1xf32, #tpu.memory_space<vmem>>, vector<128x1xf32>
    %cst_23 = arith.constant dense<0xFF800000> : vector<128xf32>
    %61 = vector.multi_reduction <maximumf>, %59, %cst_23 [1] : vector<128x512xf32> to vector<128xf32>
    %62 = vector.shape_cast %61 : vector<128xf32> to vector<128x1xf32>
    %63 = arith.maximumf %60, %62 : vector<128x1xf32>
    %c0_24 = arith.constant 0 : index
    %c0_25 = arith.constant 0 : index
    %64 = vector.load %arg8[%c0_24, %c0_25] : memref<128x1xf32, #tpu.memory_space<vmem>>, vector<128x1xf32>
    %65 = arith.subf %60, %63 : vector<128x1xf32>
    %66 = math.exp %65 : vector<128x1xf32>
    %67 = arith.mulf %64, %66 : vector<128x1xf32>
    %68 = vector.broadcast %63 : vector<128x1xf32> to vector<128x512xf32>
    %69 = arith.subf %59, %68 : vector<128x512xf32>
    %70 = math.exp %69 : vector<128x512xf32>
    %cst_26 = arith.constant dense<0.000000e+00> : vector<128xf32>
    %71 = vector.multi_reduction <add>, %70, %cst_26 [1] : vector<128x512xf32> to vector<128xf32>
    %72 = vector.shape_cast %71 : vector<128xf32> to vector<128x1xf32>
    %73 = arith.addf %67, %72 : vector<128x1xf32>
    %c0_27 = arith.constant 0 : index
    %c0_28 = arith.constant 0 : index
    %74 = vector.load %arg8[%c0_27, %c0_28] : memref<128x1xf32, #tpu.memory_space<vmem>>, vector<128x1xf32>
    tpu.vector_store %arg8[%c0_27, %c0_28], %73 {strides = array<i32>} : memref<128x1xf32, #tpu.memory_space<vmem>>, vector<128x1xf32>,
    %c0_29 = arith.constant 0 : index
    %c0_30 = arith.constant 0 : index
    %75 = vector.load %arg7[%c0_29, %c0_30] : memref<128x1xf32, #tpu.memory_space<vmem>>, vector<128x1xf32>
    tpu.vector_store %arg7[%c0_29, %c0_30], %63 {strides = array<i32>} : memref<128x1xf32, #tpu.memory_space<vmem>>, vector<128x1xf32>,
    %c0_31 = arith.constant 0 : index
    %c0_32 = arith.constant 0 : index
    %76 = vector.load %arg9[%c0_31, %c0_32] : memref<128x1xf32, #tpu.memory_space<vmem>>, vector<128x1xf32>
    %cst_33 = arith.constant 3.000000e+01 : f32
    %77 = vector.broadcast %cst_33 : f32 to vector<128x1xf32>
    %78 = arith.mulf %77, %47 : vector<128x1xf32>
    %79 = arith.mulf %24, %78 : vector<128x1xf32>
    %80 = arith.addf %76, %79 : vector<128x1xf32>
    %c0_34 = arith.constant 0 : index
    %c0_35 = arith.constant 0 : index
    %81 = vector.load %arg9[%c0_34, %c0_35] : memref<128x1xf32, #tpu.memory_space<vmem>>, vector<128x1xf32>
    tpu.vector_store %arg9[%c0_34, %c0_35], %80 {strides = array<i32>} : memref<128x1xf32, #tpu.memory_space<vmem>>, vector<128x1xf32>,
    %c1_i32_36 = arith.constant 1 : i32
    %82 = arith.cmpi eq, %arg1, %c1_i32_36 : i32
    %83 = arith.extui %82 : i1 to i32
    %c0_i32_37 = arith.constant 0 : i32
    %84 = arith.cmpi ne, %83, %c0_i32_37 : i32
    scf.if %84 {
      %c0_38 = arith.constant 0 : index
      %c0_39 = arith.constant 0 : index
      %85 = vector.load %arg7[%c0_38, %c0_39] : memref<128x1xf32, #tpu.memory_space<vmem>>, vector<128x1xf32>
      %c0_40 = arith.constant 0 : index
      %c0_41 = arith.constant 0 : index
      %86 = vector.load %arg8[%c0_40, %c0_41] : memref<128x1xf32, #tpu.memory_space<vmem>>, vector<128x1xf32>
      %87 = math.log %86 : vector<128x1xf32>
      %88 = arith.addf %85, %87 : vector<128x1xf32>
      %c0_42 = arith.constant 0 : index
      %c0_43 = arith.constant 0 : index
      %89 = vector.load %arg9[%c0_42, %c0_43] : memref<128x1xf32, #tpu.memory_space<vmem>>, vector<128x1xf32>
      %90 = arith.subf %88, %89 : vector<128x1xf32>
      %c0_44 = arith.constant 0 : index
      %c0_45 = arith.constant 0 : index
      %91 = vector.load %arg6[%c0_44, %c0_45] : memref<128x1xf32, #tpu.memory_space<vmem>>, vector<128x1xf32>
      tpu.vector_store %arg6[%c0_44, %c0_45], %90 {strides = array<i32>} : memref<128x1xf32, #tpu.memory_space<vmem>>, vector<128x1xf32>,
    } else {
    }
    return
  }
  func.func @transform_0(%arg0: i32, %arg1: i32) -> (i32, i32) {
    %c0_i32 = arith.constant 0 : i32
    %c0_i32_0 = arith.constant 0 : i32
    return %arg0, %c0_i32 : i32, i32
  }
  func.func @transform_1(%arg0: i32, %arg1: i32) -> (i32, i32) {
    %c0_i32 = arith.constant 0 : i32
    %c0_i32_0 = arith.constant 0 : i32
    return %arg0, %c0_i32 : i32, i32
  }
  func.func @transform_2(%arg0: i32, %arg1: i32) -> (i32, i32) {
    %c0_i32 = arith.constant 0 : i32
    %c0_i32_0 = arith.constant 0 : i32
    return %c0_i32, %arg1 : i32, i32
  }
  func.func @transform_3(%arg0: i32, %arg1: i32) -> (i32, i32) {
    %c0_i32 = arith.constant 0 : i32
    return %arg0, %arg1 : i32, i32
  }
  func.func @transform_4(%arg0: i32, %arg1: i32) -> (i32, i32) {
    %c0_i32 = arith.constant 0 : i32
    %c0_i32_0 = arith.constant 0 : i32
    return %arg0, %c0_i32 : i32, i32
  }
}

</mosaic_0001>

<bundles_post_ra>
// kernel: aamsoftmax_forward.1
= control target key start
LH: loop header
LB: loop body
LE: loop exit
PB: predicated region body
PF: predicated region fallthrough
CT: control target
= control target key end

     0   :  { %s7094_s0 = inlined_call_operand.vmem [shape: s32[256,1], index: 0, kind: input, shape index: {}]   ;;  %s7095_s1 = inlined_call_operand.vmem [shape: bf16[256,192], index: 1, kind: input, shape index: {}]   ;;  %s7096_s2 = inlined_call_operand.vmem [shape: bf16[192,1024], index: 2, kind: input, shape index: {}]   ;;  %s7097_s3 = inlined_call_operand.vmem [shape: bf16[256,1024], index: 3, kind: output, shape index: {0}]   ;;  %s7098_s4 = inlined_call_operand.vmem [shape: f32[256,1], index: 4, kind: output, shape index: {1}]  }
   0x1   :  { %7256 = sst [smem:[#allocation123_spill]] %s7096_s2 }
   0x2   :  { %s4376_s15 = smov 0   ;;  %s4378_s16 = smov 0  }
   0x3   :  { %s4380_s17 = smov 0   ;;  %s4382_s18 = smov 0  }
   0x4   :  { %s4384_s19 = smov 0   ;;  %s4386_s20 = smov 0  }
   0x5   :  { %s4388_s21 = smov 0   ;;  %s4390_s22 = smov 0  }
   0x6   :  { %s4392_s23 = smov 0  }
   0x7 LB: > { %s3459_s24 = sadd.s32 4294967295, %s4345_s23   ;;  %s24_s25 = sadd.s32 1, %s4337_s21  ;;  %s4345_s23 = sphi %s4392_s23, %s15_s23   ;;  %s4341_s22 = sphi %s4390_s22, %s7628_s22   ;;  %s4337_s21 = sphi %s4388_s21, %s7627_s21   ;;  %s4333_s20 = sphi %s4386_s20, %s7626_s20   ;;  %s4329_s19 = sphi %s4384_s19, %s7625_s19   ;;  %s4325_s18 = sphi %s4382_s18, %s7624_s18   ;;  %s4321_s17 = sphi %s4380_s17, %s7623_s17   ;;  %s4317_s16 = sphi %s4378_s16, %s7622_s16   ;;  %s4313_s15 = sphi %s4376_s15, %s7621_s15  }
   0x8   : > { %p25_p0 = scmp.ge.s32.totalorder %s24_s25, 2  ;;  %s27_s26 = sadd.s32 1, %s4341_s22 }
   0x9   : > { %s86_s27 = sadd.s32 1, %s4325_s18  ;;  %p93_p1 = scmp.ne.s32.totalorder %s4325_s18, %s4321_s17 }
   0xa   : > { %s7630_s25 = smov (%p25_p0, %s24_s25), 0  ;;  %s7632_s26 = smov (!%p25_p0, %s27_s26), %s4341_s22 }
   0xb   : > { %s83_s28 = ssub.s32 %s4337_s21, %s7630_s25  ;;  %p94_p2 = scmp.eq.s32.totalorder %s4345_s23, 0 }
   0xc   : > { %p29_p3 = scmp.ge.s32.totalorder %s7632_s26, 2  ;;  %p84_p4 = scmp.eq.s32.totalorder %s83_s28, 0 }
   0xd   : > { %p95_p5 = por %p94_p2, %p93_p1  ;;  %s114_s29 = sadd.s32 1, %s4317_s16 }
   0xe   : > { %s7634_s26 = smov (%p29_p3, %s7632_s26), 0  ;;  %p124_p6 = scmp.ne.s32.totalorder %s4317_s16, %s4313_s15 }
   0xf   : > { %7257 = sst [smem:[#allocation7_spill]] %s7634_s26  ;;  %s109_s5 = ssub.s32 %s4341_s22, %s7634_s26 }
  0x10   : > { %s4437_s30 = scalar_select %p84_p4, %s4325_s18, %s86_s27  }
  0x11   : > { %s111_s6 = sor.u32 %s109_s5, %s83_s28  ;;  %p125_p7 = scmp.eq.s32.totalorder %s3459_s24, 3 }
  0x12   : > { %p112_p8 = scmp.eq.s32.totalorder %s111_s6, 0  ;;  %p3462_p10 = scmp.ge.s32.totalorder %s4345_s23, 4 }
  0x13   : > { %p4443_p9 = por %p125_p7, %p124_p6 }
  0x14   : > { %s4448_s8 = scalar_select %p112_p8, %s4317_s16, %s114_s29  }
  0x15   : > { %173 = sbr.rel (%p3462_p10) target bundleno = 84 (0x54), region = 16 }
  0x1a   : > { %195 = sbr.rel (!%p95_p5) target bundleno = 84 (0x54), region = 28  ;;  %s197_s9 = sand.u32 (%p95_p5), 1, %s4325_s18  }
  0x1b   : > { %s3885_s10 = sshll.u32 (%p95_p5), %s4337_s21, 4  ;;  %s3954_s11 = smul.u32 (%p95_p5), 384, %s197_s9 }
  0x1c   : > { %s7259_s2 = sld [smem:[#allocation123_spill]] (%p95_p5) }
  0x1d   : > { %s4461_s24 = scalar_lea.vmem (%p95_p5), [#allocation5], %s3954_s11 }
  0x22   : > { %s4456_s14 = scalar_lea.vmem %s7259_s2, %s3885_s10 }
  0x23   : > { %v215_v0 = vld [vmem:[%s4456_s14] sm:$0xff]  ;;  %v217_v1 = vld [vmem:[%s4456_s14 + $0x8] sm:$0xff] }
  0x24   : > { %v219_v2 = vld [vmem:[%s4456_s14 + $0x20] sm:$0xff]  ;;  %216 = vst [vmem:[%s4461_s24] sm:$0xff] %v215_v0  ;;  %v221_v3 = vld [vmem:[%s4456_s14 + $0x28] sm:$0xff] }
  0x25   : > { %218 = vst [vmem:[%s4461_s24 + $0x8] sm:$0xff] %v217_v1  ;;  %v223_v4 = vld [vmem:[%s4456_s14 + $0x40] sm:$0xff]  ;;  %v225_v5 = vld [vmem:[%s4456_s14 + $0x48] sm:$0xff] }
  0x26   : > { %220 = vst [vmem:[%s4461_s24 + $0x10] sm:$0xff] %v219_v2  ;;  %v227_v6 = vld [vmem:[%s4456_s14 + $0x60] sm:$0xff]  ;;  %v229_v7 = vld [vmem:[%s4456_s14 + $0x68] sm:$0xff] }
  0x27   : > { %222 = vst [vmem:[%s4461_s24 + $0x18] sm:$0xff] %v221_v3  ;;  %v231_v8 = vld [vmem:[%s4456_s14 + $0x80] sm:$0xff]  ;;  %v233_v9 = vld [vmem:[%s4456_s14 + $0x88] sm:$0xff] }
  0x28   : > { %224 = vst [vmem:[%s4461_s24 + $0x20] sm:$0xff] %v223_v4  ;;  %v235_v10 = vld [vmem:[%s4456_s14 + $0xa0] sm:$0xff]  ;;  %v237_v11 = vld [vmem:[%s4456_s14 + $0xa8] sm:$0xff] }
  0x29   : > { %226 = vst [vmem:[%s4461_s24 + $0x28] sm:$0xff] %v225_v5  ;;  %v239_v12 = vld [vmem:[%s4456_s14 + $0xc0] sm:$0xff]  ;;  %v241_v13 = vld [vmem:[%s4456_s14 + $0xc8] sm:$0xff] }
  0x2a   : > { %228 = vst [vmem:[%s4461_s24 + $0x30] sm:$0xff] %v227_v6  ;;  %v243_v14 = vld [vmem:[%s4456_s14 + $0xe0] sm:$0xff]  ;;  %v245_v15 = vld [vmem:[%s4456_s14 + $0xe8] sm:$0xff] }
  0x2b   : > { %230 = vst [vmem:[%s4461_s24 + $0x38] sm:$0xff] %v229_v7  ;;  %v247_v16 = vld [vmem:[%s4456_s14 + $0x100] sm:$0xff]  ;;  %v249_v17 = vld [vmem:[%s4456_s14 + $0x108] sm:$0xff] }
  0x2c   : > { %232 = vst [vmem:[%s4461_s24 + $0x40] sm:$0xff] %v231_v8  ;;  %v251_v18 = vld [vmem:[%s4456_s14 + $0x120] sm:$0xff]  ;;  %v253_v19 = vld [vmem:[%s4456_s14 + $0x128] sm:$0xff] }
  0x2d   : > { %234 = vst [vmem:[%s4461_s24 + $0x48] sm:$0xff] %v233_v9  ;;  %v255_v20 = vld [vmem:[%s4456_s14 + $0x140] sm:$0xff]  ;;  %v257_v21 = vld [vmem:[%s4456_s14 + $0x148] sm:$0xff] }
  0x2e   : > { %236 = vst [vmem:[%s4461_s24 + $0x50] sm:$0xff] %v235_v10  ;;  %v259_v22 = vld [vmem:[%s4456_s14 + $0x160] sm:$0xff]  ;;  %v261_v23 = vld [vmem:[%s4456_s14 + $0x168] sm:$0xff] }
  0x2f   : > { %238 = vst [vmem:[%s4461_s24 + $0x58] sm:$0xff] %v237_v11  ;;  %v263_v24 = vld [vmem:[%s4456_s14 + $0x180] sm:$0xff]  ;;  %v265_v25 = vld [vmem:[%s4456_s14 + $0x188] sm:$0xff] }
  0x30   : > { %240 = vst [vmem:[%s4461_s24 + $0x60] sm:$0xff] %v239_v12  ;;  %v267_v26 = vld [vmem:[%s4456_s14 + $0x1a0] sm:$0xff]  ;;  %v269_v27 = vld [vmem:[%s4456_s14 + $0x1a8] sm:$0xff] }
  0x31   : > { %242 = vst [vmem:[%s4461_s24 + $0x68] sm:$0xff] %v241_v13  ;;  %v271_v28 = vld [vmem:[%s4456_s14 + $0x1c0] sm:$0xff]  ;;  %v273_v29 = vld [vmem:[%s4456_s14 + $0x1c8] sm:$0xff] }
  0x32   : > { %244 = vst [vmem:[%s4461_s24 + $0x70] sm:$0xff] %v243_v14  ;;  %v275_v30 = vld [vmem:[%s4456_s14 + $0x1e0] sm:$0xff]  ;;  %v277_v31 = vld [vmem:[%s4456_s14 + $0x1e8] sm:$0xff] }
  0x33   : > { %246 = vst [vmem:[%s4461_s24 + $0x78] sm:$0xff] %v245_v15  ;;  %v279_v32 = vld [vmem:[%s4456_s14 + $0x200] sm:$0xff]  ;;  %v281_v33 = vld [vmem:[%s4456_s14 + $0x208] sm:$0xff] }
  0x34   : > { %248 = vst [vmem:[%s4461_s24 + $0x80] sm:$0xff] %v247_v16  ;;  %v283_v34 = vld [vmem:[%s4456_s14 + $0x220] sm:$0xff]  ;;  %v285_v35 = vld [vmem:[%s4456_s14 + $0x228] sm:$0xff] }
  0x35   : > { %250 = vst [vmem:[%s4461_s24 + $0x88] sm:$0xff] %v249_v17  ;;  %v287_v36 = vld [vmem:[%s4456_s14 + $0x240] sm:$0xff]  ;;  %v289_v37 = vld [vmem:[%s4456_s14 + $0x248] sm:$0xff] }
  0x36   : > { %252 = vst [vmem:[%s4461_s24 + $0x90] sm:$0xff] %v251_v18  ;;  %v291_v38 = vld [vmem:[%s4456_s14 + $0x260] sm:$0xff]  ;;  %v293_v39 = vld [vmem:[%s4456_s14 + $0x268] sm:$0xff] }
  0x37   : > { %254 = vst [vmem:[%s4461_s24 + $0x98] sm:$0xff] %v253_v19  ;;  %v295_v40 = vld [vmem:[%s4456_s14 + $0x280] sm:$0xff]  ;;  %v297_v41 = vld [vmem:[%s4456_s14 + $0x288] sm:$0xff] }
  0x38   : > { %256 = vst [vmem:[%s4461_s24 + $0xa0] sm:$0xff] %v255_v20  ;;  %v299_v42 = vld [vmem:[%s4456_s14 + $0x2a0] sm:$0xff]  ;;  %v301_v43 = vld [vmem:[%s4456_s14 + $0x2a8] sm:$0xff] }
  0x39   : > { %258 = vst [vmem:[%s4461_s24 + $0xa8] sm:$0xff] %v257_v21  ;;  %v303_v44 = vld [vmem:[%s4456_s14 + $0x2c0] sm:$0xff]  ;;  %v305_v45 = vld [vmem:[%s4456_s14 + $0x2c8] sm:$0xff] }
  0x3a   : > { %260 = vst [vmem:[%s4461_s24 + $0xb0] sm:$0xff] %v259_v22  ;;  %v307_v46 = vld [vmem:[%s4456_s14 + $0x2e0] sm:$0xff]  ;;  %v309_v47 = vld [vmem:[%s4456_s14 + $0x2e8] sm:$0xff] }
  0x3b   : > { %262 = vst [vmem:[%s4461_s24 + $0xb8] sm:$0xff] %v261_v23 }
  0x3c   : > { %264 = vst [vmem:[%s4461_s24 + $0xc0] sm:$0xff] %v263_v24 }
  0x3d   : > { %266 = vst [vmem:[%s4461_s24 + $0xc8] sm:$0xff] %v265_v25 }
  0x3e   : > { %268 = vst [vmem:[%s4461_s24 + $0xd0] sm:$0xff] %v267_v26 }
  0x3f   : > { %270 = vst [vmem:[%s4461_s24 + $0xd8] sm:$0xff] %v269_v27 }
  0x40   : > { %272 = vst [vmem:[%s4461_s24 + $0xe0] sm:$0xff] %v271_v28 }
  0x41   : > { %274 = vst [vmem:[%s4461_s24 + $0xe8] sm:$0xff] %v273_v29 }
  0x42   : > { %276 = vst [vmem:[%s4461_s24 + $0xf0] sm:$0xff] %v275_v30 }
  0x43   : > { %278 = vst [vmem:[%s4461_s24 + $0xf8] sm:$0xff] %v277_v31 }
  0x44   : > { %280 = vst [vmem:[%s4461_s24 + $0x100] sm:$0xff] %v279_v32 }
  0x45   : > { %282 = vst [vmem:[%s4461_s24 + $0x108] sm:$0xff] %v281_v33 }
  0x46   : > { %284 = vst [vmem:[%s4461_s24 + $0x110] sm:$0xff] %v283_v34 }
  0x47   : > { %286 = vst [vmem:[%s4461_s24 + $0x118] sm:$0xff] %v285_v35 }
  0x48   : > { %288 = vst [vmem:[%s4461_s24 + $0x120] sm:$0xff] %v287_v36 }
  0x49   : > { %290 = vst [vmem:[%s4461_s24 + $0x128] sm:$0xff] %v289_v37 }
  0x4a   : > { %292 = vst [vmem:[%s4461_s24 + $0x130] sm:$0xff] %v291_v38 }
  0x4b   : > { %294 = vst [vmem:[%s4461_s24 + $0x138] sm:$0xff] %v293_v39 }
  0x4c   : > { %296 = vst [vmem:[%s4461_s24 + $0x140] sm:$0xff] %v295_v40 }
  0x4d   : > { %298 = vst [vmem:[%s4461_s24 + $0x148] sm:$0xff] %v297_v41 }
  0x4e   : > { %300 = vst [vmem:[%s4461_s24 + $0x150] sm:$0xff] %v299_v42 }
  0x4f   : > { %302 = vst [vmem:[%s4461_s24 + $0x158] sm:$0xff] %v301_v43 }
  0x50   : > { %304 = vst [vmem:[%s4461_s24 + $0x160] sm:$0xff] %v303_v44 }
  0x51   : > { %306 = vst [vmem:[%s4461_s24 + $0x168] sm:$0xff] %v305_v45 }
  0x52   : > { %308 = vst [vmem:[%s4461_s24 + $0x170] sm:$0xff] %v307_v46 }
  0x53   : > { %310 = vst [vmem:[%s4461_s24 + $0x178] sm:$0xff] %v309_v47 }
  0x54 PF: > { %p3465_p11 = scmp.ge.s32.totalorder %s4345_s23, 1  ;;  %p315_p12 = scmp.lt.s32.totalorder %s4345_s23, 5 }
  0x56   : > { %p316_p13 = pnand %p3465_p11, %p315_p12 }
  0x58   : > { %319 = sbr.rel (%p316_p13) target bundleno = 1225 (0x4c9), region = 51 }
  0x5d   : > { %s322_s27 = sand.u32 1, %s4321_s17   ;;  %s352_s28 = sand.u32 1, %s4313_s15  }
  0x5e   : > { %s3955_s29 = smul.u32 384, %s322_s27  ;;  %s3466_s5 = sshll.u32 %s352_s28, 8 }
  0x5f   : > { %s3467_s6 = sshll.u32 %s4333_s20, 4  ;;  %s4578_s27 = scalar_lea.vmem [#allocation6], %s3466_s5 }
  0x60   : > { %p363_p0 = scmp.lt.s32.totalorder %s3467_s6, 31  ;;  %s4576_s17 = scalar_lea.vmem [#allocation5], %s3955_s29 }
  0x61   : > { %p3474_p1 = scmp.ne.s32.totalorder %s4329_s19, 0 }
  0x62   : > { %s7636_s6 = smov (!%p363_p0, %s3467_s6), 31 }
  0x63   : > { %s3468_s9 = sshll.u32 %s7636_s6, 3  ;;  %388 = sbr.rel (%p3474_p1) target bundleno = 153 (0x99), region = 59 }
  0x64   : > { %s4564_s12 = scalar_lea.vmem %s7094_s0, %s3468_s9  ;;  %s4569_s24 = scalar_lea.vmem %s7095_s1, %s3468_s9 }
  0x65   : > { %s4574_s15 = scalar_lea.vmem %s7098_s4, %s3468_s9 }
  0x68   : > { %vm389_vm0 = vcmask 7168   ;;  %v4347_v48 = vmov -inf   ;;  %v4348_v49 = vmov 0.0  }
  0x69   : > { %390 = vst.msk [vmem:[#allocation2] sm:$0xff] %vm389_vm0, %v4347_v48 }
  0x6a   : > { %391 = vst.msk [vmem:[#allocation2 + $0x8] sm:$0xff] %vm389_vm0, %v4347_v48 }
  0x6b   : > { %392 = vst.msk [vmem:[#allocation2 + $0x10] sm:$0xff] %vm389_vm0, %v4347_v48 }
  0x6c   : > { %393 = vst.msk [vmem:[#allocation2 + $0x18] sm:$0xff] %vm389_vm0, %v4347_v48 }
  0x6d   : > { %394 = vst.msk [vmem:[#allocation2 + $0x20] sm:$0xff] %vm389_vm0, %v4347_v48 }
  0x6e   : > { %395 = vst.msk [vmem:[#allocation2 + $0x28] sm:$0xff] %vm389_vm0, %v4347_v48 }
  0x6f   : > { %396 = vst.msk [vmem:[#allocation2 + $0x30] sm:$0xff] %vm389_vm0, %v4347_v48 }
  0x70   : > { %397 = vst.msk [vmem:[#allocation2 + $0x38] sm:$0xff] %vm389_vm0, %v4347_v48 }
  0x71   : > { %398 = vst.msk [vmem:[#allocation2 + $0x40] sm:$0xff] %vm389_vm0, %v4347_v48 }
  0x72   : > { %399 = vst.msk [vmem:[#allocation2 + $0x48] sm:$0xff] %vm389_vm0, %v4347_v48 }
  0x73   : > { %400 = vst.msk [vmem:[#allocation2 + $0x50] sm:$0xff] %vm389_vm0, %v4347_v48 }
  0x74   : > { %401 = vst.msk [vmem:[#allocation2 + $0x58] sm:$0xff] %vm389_vm0, %v4347_v48 }
  0x75   : > { %402 = vst.msk [vmem:[#allocation2 + $0x60] sm:$0xff] %vm389_vm0, %v4347_v48 }
  0x76   : > { %403 = vst.msk [vmem:[#allocation2 + $0x68] sm:$0xff] %vm389_vm0, %v4347_v48 }
  0x77   : > { %404 = vst.msk [vmem:[#allocation2 + $0x70] sm:$0xff] %vm389_vm0, %v4347_v48 }
  0x78   : > { %405 = vst.msk [vmem:[#allocation2 + $0x78] sm:$0xff] %vm389_vm0, %v4347_v48 }
  0x79   : > { %406 = vst.msk [vmem:[#allocation3] sm:$0xff] %vm389_vm0, %v4348_v49 }
  0x7a   : > { %407 = vst.msk [vmem:[#allocation3 + $0x8] sm:$0xff] %vm389_vm0, %v4348_v49 }
  0x7b   : > { %408 = vst.msk [vmem:[#allocation3 + $0x10] sm:$0xff] %vm389_vm0, %v4348_v49 }
  0x7c   : > { %409 = vst.msk [vmem:[#allocation3 + $0x18] sm:$0xff] %vm389_vm0, %v4348_v49 }
  0x7d   : > { %410 = vst.msk [vmem:[#allocation3 + $0x20] sm:$0xff] %vm389_vm0, %v4348_v49 }
  0x7e   : > { %411 = vst.msk [vmem:[#allocation3 + $0x28] sm:$0xff] %vm389_vm0, %v4348_v49 }
  0x7f   : > { %412 = vst.msk [vmem:[#allocation3 + $0x30] sm:$0xff] %vm389_vm0, %v4348_v49 }
  0x80   : > { %413 = vst.msk [vmem:[#allocation3 + $0x38] sm:$0xff] %vm389_vm0, %v4348_v49 }
  0x81   : > { %414 = vst.msk [vmem:[#allocation3 + $0x40] sm:$0xff] %vm389_vm0, %v4348_v49 }
  0x82   : > { %415 = vst.msk [vmem:[#allocation3 + $0x48] sm:$0xff] %vm389_vm0, %v4348_v49 }
  0x83   : > { %416 = vst.msk [vmem:[#allocation3 + $0x50] sm:$0xff] %vm389_vm0, %v4348_v49 }
  0x84   : > { %417 = vst.msk [vmem:[#allocation3 + $0x58] sm:$0xff] %vm389_vm0, %v4348_v49 }
  0x85   : > { %418 = vst.msk [vmem:[#allocation3 + $0x60] sm:$0xff] %vm389_vm0, %v4348_v49 }
  0x86   : > { %419 = vst.msk [vmem:[#allocation3 + $0x68] sm:$0xff] %vm389_vm0, %v4348_v49 }
  0x87   : > { %420 = vst.msk [vmem:[#allocation3 + $0x70] sm:$0xff] %vm389_vm0, %v4348_v49 }
  0x88   : > { %421 = vst.msk [vmem:[#allocation3 + $0x78] sm:$0xff] %vm389_vm0, %v4348_v49 }
  0x89   : > { %422 = vst.msk [vmem:[#allocation4] sm:$0xff] %vm389_vm0, %v4348_v49 }
  0x8a   : > { %423 = vst.msk [vmem:[#allocation4 + $0x8] sm:$0xff] %vm389_vm0, %v4348_v49 }
  0x8b   : > { %424 = vst.msk [vmem:[#allocation4 + $0x10] sm:$0xff] %vm389_vm0, %v4348_v49 }
  0x8c   : > { %425 = vst.msk [vmem:[#allocation4 + $0x18] sm:$0xff] %vm389_vm0, %v4348_v49 }
  0x8d   : > { %426 = vst.msk [vmem:[#allocation4 + $0x20] sm:$0xff] %vm389_vm0, %v4348_v49 }
  0x8e   : > { %427 = vst.msk [vmem:[#allocation4 + $0x28] sm:$0xff] %vm389_vm0, %v4348_v49 }
  0x8f   : > { %428 = vst.msk [vmem:[#allocation4 + $0x30] sm:$0xff] %vm389_vm0, %v4348_v49 }
  0x90   : > { %429 = vst.msk [vmem:[#allocation4 + $0x38] sm:$0xff] %vm389_vm0, %v4348_v49 }
  0x91   : > { %430 = vst.msk [vmem:[#allocation4 + $0x40] sm:$0xff] %vm389_vm0, %v4348_v49 }
  0x92   : > { %431 = vst.msk [vmem:[#allocation4 + $0x48] sm:$0xff] %vm389_vm0, %v4348_v49 }
  0x93   : > { %432 = vst.msk [vmem:[#allocation4 + $0x50] sm:$0xff] %vm389_vm0, %v4348_v49 }
  0x94   : > { %433 = vst.msk [vmem:[#allocation4 + $0x58] sm:$0xff] %vm389_vm0, %v4348_v49 }
  0x95   : > { %434 = vst.msk [vmem:[#allocation4 + $0x60] sm:$0xff] %vm389_vm0, %v4348_v49 }
  0x96   : > { %435 = vst.msk [vmem:[#allocation4 + $0x68] sm:$0xff] %vm389_vm0, %v4348_v49 }
  0x97   : > { %436 = vst.msk [vmem:[#allocation4 + $0x70] sm:$0xff] %vm389_vm0, %v4348_v49 }
  0x98   : > { %437 = vst.msk [vmem:[#allocation4 + $0x78] sm:$0xff] %vm389_vm0, %v4348_v49 }
  0x99 PF: > { %v3653_v50 = vld [vmem:[%s4576_s17 + $0xe0] sm:$0xf]  ;;  %v3933_v51 = vld [vmem:[%s4576_s17 + $0xec] sm:$0xf0]  ;;  %v3931_v52 = vld [vmem:[%s4576_s17 + $0xe4] sm:$0xf] }
  0x9a   : > { %v3654_v53 = vor.u32 %v3933_v51, %v3653_v50  ;;  %v3655_v54 = vld [vmem:[%s4576_s17 + $0xf0] sm:$0xf0]  ;;  %v3947_v55 = vld [vmem:[%s4576_s17 + $0x164] sm:$0xf]  ;;  %v3637_v59 = vld [vmem:[%s4576_s17 + $0xc0] sm:$0xf] }
  0x9b   : > { %v3719_v56 = vld [vmem:[%s4576_s17 + $0x170] sm:$0xf0]  ;;  %v3658_v57 = vor.u32 %v3931_v52, %v3655_v54  ;;  %v3929_v60 = vld [vmem:[%s4576_s17 + $0xcc] sm:$0xf0]  ;;  %v3927_v61 = vld [vmem:[%s4576_s17 + $0xc4] sm:$0xf] }
  0x9c   : > { %v3722_v58 = vor.u32 %v3947_v55, %v3719_v56  ;;  %839 = vmatpush.bf16.msra.mxu0 %v3654_v53  ;;  %v3638_v62 = vor.u32 %v3929_v60, %v3637_v59  ;;  %v3639_v63 = vld [vmem:[%s4576_s17 + $0xd0] sm:$0xf0]  ;;  %v3943_v0 = vld [vmem:[%s4576_s17 + $0x144] sm:$0xf]  ;;  %v3717_v4 = vld [vmem:[%s4576_s17 + $0x160] sm:$0xf] }
  0x9d   : > { %v3703_v1 = vld [vmem:[%s4576_s17 + $0x150] sm:$0xf0]  ;;  %937 = vmatpush.bf16.msra.mxu2 %v3658_v57  ;;  %v3642_v2 = vor.u32 %v3927_v61, %v3639_v63  ;;  %v3949_v5 = vld [vmem:[%s4576_s17 + $0x16c] sm:$0xf0]  ;;  %v3621_v6 = vld [vmem:[%s4576_s17 + $0xa0] sm:$0xf] }
  0x9e   : > { %990 = vmatpush.bf16.msra.mxu3 %v3722_v58  ;;  %v3706_v3 = vor.u32 %v3943_v0, %v3703_v1  ;;  %v3718_v7 = vor.u32 %v3949_v5, %v3717_v4  ;;  %v3925_v8 = vld [vmem:[%s4576_s17 + $0xac] sm:$0xf0]  ;;  %v3923_v9 = vld [vmem:[%s4576_s17 + $0xa4] sm:$0xf]  ;;  %v3623_v10 = vld [vmem:[%s4576_s17 + $0xb0] sm:$0xf0] }
  0x9f   : > { %v3939_v11 = vld [vmem:[%s4576_s17 + $0x124] sm:$0xf]  ;;  %v3687_v12 = vld [vmem:[%s4576_s17 + $0x130] sm:$0xf0]  ;;  %v3701_v13 = vld [vmem:[%s4576_s17 + $0x140] sm:$0xf]  ;;  %v3622_v14 = vor.u32 %v3925_v8, %v3621_v6  ;;  %v3626_v18 = vor.u32 %v3923_v9, %v3623_v10 }
  0xa0   : > { %840 = vmatpush.bf16.msra.mxu0 %v3638_v62  ;;  %892 = vmatpush.bf16.msra.mxu1 %v3718_v7  ;;  %v3945_v15 = vld [vmem:[%s4576_s17 + $0x14c] sm:$0xf0]  ;;  %v3605_v16 = vld [vmem:[%s4576_s17 + $0x80] sm:$0xf]  ;;  %v3690_v19 = vor.u32 %v3939_v11, %v3687_v12  ;;  %v3919_v21 = vld [vmem:[%s4576_s17 + $0x84] sm:$0xf] }
  0xa1   : > { %v3921_v17 = vld [vmem:[%s4576_s17 + $0x8c] sm:$0xf0]  ;;  %938 = vmatpush.bf16.msra.mxu2 %v3642_v2  ;;  %v3702_v20 = vor.u32 %v3945_v15, %v3701_v13  ;;  %v3607_v22 = vld [vmem:[%s4576_s17 + $0x90] sm:$0xf0]  ;;  %v3935_v23 = vld [vmem:[%s4576_s17 + $0x104] sm:$0xf] }
  0xa2   : > { %991 = vmatpush.bf16.msra.mxu3 %v3706_v3  ;;  %v3671_v24 = vld [vmem:[%s4576_s17 + $0x110] sm:$0xf0]  ;;  %v3685_v25 = vld [vmem:[%s4576_s17 + $0x120] sm:$0xf]  ;;  %v3941_v26 = vld [vmem:[%s4576_s17 + $0x12c] sm:$0xf0]  ;;  %v3606_v27 = vor.u32 %v3921_v17, %v3605_v16  ;;  %v3610_v31 = vor.u32 %v3919_v21, %v3607_v22 }
  0xa3   : > { %v3686_v28 = vor.u32 %v3941_v26, %v3685_v25  ;;  %v3887_v29 = vld [vmem:[%s4569_s24 + $0x4] sm:$0xf]  ;;  %v3479_v30 = vld [vmem:[%s4569_s24 + $0x8] sm:$0xf0]  ;;  %v3674_v32 = vor.u32 %v3935_v23, %v3671_v24  ;;  %v3589_v33 = vld [vmem:[%s4576_s17 + $0x60] sm:$0xf] }
  0xa4   : > { %841 = vmatpush.bf16.msra.mxu0 %v3622_v14  ;;  %893 = vmatpush.bf16.msra.mxu1 %v3702_v20  ;;  %v3917_v34 = vld [vmem:[%s4576_s17 + $0x6c] sm:$0xf0]  ;;  %v3915_v35 = vld [vmem:[%s4576_s17 + $0x64] sm:$0xf]  ;;  %v3591_v36 = vld [vmem:[%s4576_s17 + $0x70] sm:$0xf0]  ;;  %v4667_v40 = vor.u32 %v3887_v29, %v3479_v30 }
  0xa5   : > { %939 = vmatpush.bf16.msra.mxu2 %v3626_v18  ;;  %v3669_v37 = vld [vmem:[%s4576_s17 + $0x100] sm:$0xf]  ;;  %v3937_v38 = vld [vmem:[%s4576_s17 + $0x10c] sm:$0xf0]  ;;  %v4349_v39 = vmov 0   ;;  %vm814_vm1 = vcmask 523264   ;;  %v3590_v41 = vor.u32 %v3917_v34, %v3589_v33  ;;  %v3594_v42 = vor.u32 %v3915_v35, %v3591_v36 }
  0xa6   : > { %992 = vmatpush.bf16.msra.mxu3 %v3690_v19  ;;  %4032 = vset.pattern.permute.xlu0 %v4349_v39  ;;  %v3670_v43 = vor.u32 %v3937_v38, %v3669_v37  ;;  %v3573_v44 = vld [vmem:[%s4576_s17 + $0x40] sm:$0xf]  ;;  %v3913_v45 = vld [vmem:[%s4576_s17 + $0x4c] sm:$0xf0]  ;;  %v3911_v46 = vld [vmem:[%s4576_s17 + $0x44] sm:$0xf] }
  0xa7   : > { %4033 = vset.pattern.permute.xlu1 %v4349_v39  ;;  %4034 = vset.pattern.permute.xlu2 %v4349_v39  ;;  %v3575_v47 = vld [vmem:[%s4576_s17 + $0x50] sm:$0xf0]  ;;  %v3725_v48 = vld [vmem:[%s4576_s17 + $0x168] sm:$0xf]  ;;  %v3950_v49 = vld [vmem:[%s4576_s17 + $0x174] sm:$0xf0]  ;;  %v3574_v51 = vor.u32 %v3913_v45, %v3573_v44 }
  0xa8   : > { %842 = vmatpush.bf16.msra.mxu0 %v3606_v27  ;;  %894 = vmatpush.bf16.msra.mxu1 %v3686_v28  ;;  %v3726_v50 = vor.u32 %v3950_v49, %v3725_v48  ;;  %v3661_v52 = vld [vmem:[%s4576_s17 + $0xe8] sm:$0xf]  ;;  %v3578_v53 = vor.u32 %v3911_v46, %v3575_v47  ;;  %v3557_v54 = vld [vmem:[%s4576_s17 + $0x20] sm:$0xf]  ;;  %v3909_v55 = vld [vmem:[%s4576_s17 + $0x2c] sm:$0xf0] }
  0xa9   : > { %940 = vmatpush.bf16.msra.mxu2 %v3610_v31  ;;  %v3934_v56 = vld [vmem:[%s4576_s17 + $0xf4] sm:$0xf0]  ;;  %v3907_v57 = vld [vmem:[%s4576_s17 + $0x24] sm:$0xf]  ;;  %v3559_v58 = vld [vmem:[%s4576_s17 + $0x30] sm:$0xf0]  ;;  %v3558_v63 = vor.u32 %v3909_v55, %v3557_v54 }
  0xaa   : > { %993 = vmatpush.bf16.msra.mxu3 %v3674_v32  ;;  %v3662_v59 = vor.u32 %v3934_v56, %v3661_v52  ;;  %v1231_v60 = vld [vmem:[%s4564_s12] sm:$0xff]  ;;  %v3905_v62 = vld [vmem:[%s4576_s17 + $0xc] sm:$0xf0]  ;;  %v3645_v1 = vld [vmem:[%s4576_s17 + $0xc8] sm:$0xf]  ;;  %v3562_v3 = vor.u32 %v3907_v57, %v3559_v58  ;;  %s3763_s2 = sshll.u32 %s4329_s19, 9 }
  0xab   : > { %v3541_v61 = vld [vmem:[%s4576_s17] sm:$0xf]  ;;  %1259 = vperm.xlu0 %4032, %v1231_v60   ;;  %v3903_v0 = vld [vmem:[%s4576_s17 + $0x4] sm:$0xf]  ;;  %v3930_v2 = vld [vmem:[%s4576_s17 + $0xd4] sm:$0xf0] }
  0xac   : > { %843 = vmatpush.bf16.msra.mxu0 %v3590_v41  ;;  %895 = vmatpush.bf16.msra.mxu1 %v3670_v43  ;;  %v3543_v4 = vld [vmem:[%s4576_s17 + $0x10] sm:$0xf0]  ;;  %v3932_v5 = vld [vmem:[%s4576_s17 + $0xec] sm:$0xf]  ;;  %v3663_v7 = vld [vmem:[%s4576_s17 + $0xf8] sm:$0xf0]  ;;  %v3646_v8 = vor.u32 %v3930_v2, %v3645_v1  ;;  %v3542_v14 = vor.u32 %v3905_v62, %v3541_v61 }
  0xad   : > { %3739 = vmatmul.msk.bf16.vlgmr.msra.gmra.mxu3 %vm814_vm1, %v4667_v40  ;;  %941 = vmatpush.bf16.msra.mxu2 %v3594_v42  ;;  %v1233_v6 = vld [vmem:[%s4564_s12 + $0x10] sm:$0xff]  ;;  %v3709_v9 = vld [vmem:[%s4576_s17 + $0x148] sm:$0xf]  ;;  %v3946_v10 = vld [vmem:[%s4576_s17 + $0x154] sm:$0xf0]  ;;  %v3546_v18 = vor.u32 %v3903_v0, %v3543_v4  ;;  %v3666_v21 = vor.u32 %v3932_v5, %v3663_v7  ;;  %s3952_s26 = sadd.s32 512, %s3763_s2 }
  0xae   : > { %1088 = vmatpush.bf16.msrb.mxu3 %v3726_v50  ;;  %1265 = vperm.xlu1 %4033, %v1233_v6   ;;  %v3948_v11 = vld [vmem:[%s4576_s17 + $0x16c] sm:$0xf]  ;;  %v3727_v12 = vld [vmem:[%s4576_s17 + $0x178] sm:$0xf0]  ;;  %v3710_v13 = vor.u32 %v3946_v10, %v3709_v9  ;;  %v3477_v15 = vld [vmem:[%s4569_s24] sm:$0xf] }
  0xaf   : > { %3731 = vmatmul.msk.bf16.vlgmr.msra.gmra.mxu1 %vm814_vm1, %v4667_v40  ;;  %v3888_v16 = vld [vmem:[%s4569_s24 + $0x4] sm:$0xf0]  ;;  %v3889_v19 = vld [vmem:[%s4569_s24 + $0x14] sm:$0xf]  ;;  %v3487_v20 = vld [vmem:[%s4569_s24 + $0x18] sm:$0xf0]  ;;  %v3730_v22 = vor.u32 %v3948_v11, %v3727_v12 }
  0xb0   : > { %844 = vmatpush.bf16.msra.mxu0 %v3574_v51  ;;  %1035 = vmatpush.bf16.msrb.mxu1 %v3662_v59  ;;  %v1232_v17 = vld [vmem:[%s4564_s12 + $0x8] sm:$0xff]  ;;  %v3647_v24 = vld [vmem:[%s4576_s17 + $0xd8] sm:$0xf0]  ;;  %v4706_v25 = vor.u32 %v3888_v16, %v3477_v15  ;;  %v4708_v26 = vor.u32 %v3889_v19, %v3487_v20  ;;  %v3926_v33 = vld [vmem:[%s4576_s17 + $0xb4] sm:$0xf0]  ;;  %p3877_p2 = scmp.ne.s32.totalorder %s4329_s19, 1 }
  0xb1   : > { %942 = vmatpush.bf16.msra.mxu2 %v3578_v53  ;;  %v3928_v23 = vld [vmem:[%s4576_s17 + $0xcc] sm:$0xf]  ;;  %v3711_v29 = vld [vmem:[%s4576_s17 + $0x158] sm:$0xf0]  ;;  %v3629_v32 = vld [vmem:[%s4576_s17 + $0xa8] sm:$0xf] }
  0xb2   : > { %1089 = vmatpush.bf16.msrb.mxu3 %v3710_v13  ;;  %v3650_v27 = vor.u32 %v3928_v23, %v3647_v24  ;;  %v3944_v28 = vld [vmem:[%s4576_s17 + $0x14c] sm:$0xf]  ;;  %v1234_v30 = vld [vmem:[%s4564_s12 + $0x18] sm:$0xff]  ;;  %v3630_v34 = vor.u32 %v3926_v33, %v3629_v32  ;;  %v3485_v38 = vld [vmem:[%s4569_s24 + $0x10] sm:$0xf] }
  0xb3   : > { %1262 = vperm.xlu0 %4032, %v1232_v17   ;;  %v3714_v31 = vor.u32 %v3944_v28, %v3711_v29  ;;  %v3924_v35 = vld [vmem:[%s4576_s17 + $0xac] sm:$0xf]  ;;  %v3631_v36 = vld [vmem:[%s4576_s17 + $0xb8] sm:$0xf0]  ;;  %v3890_v39 = vld [vmem:[%s4569_s24 + $0x14] sm:$0xf0] }
  0xb4   : > { %845 = vmatpush.bf16.msra.mxu0 %v3558_v63  ;;  %1036 = vmatpush.bf16.msrb.mxu1 %v3646_v8  ;;  %v3634_v37 = vor.u32 %v3924_v35, %v3631_v36  ;;  %v3891_v41 = vld [vmem:[%s4569_s24 + $0x24] sm:$0xf]  ;;  %v3495_v42 = vld [vmem:[%s4569_s24 + $0x28] sm:$0xf0]  ;;  %v4727_v43 = vor.u32 %v3890_v39, %v3485_v38  ;;  %v3613_v45 = vld [vmem:[%s4576_s17 + $0x88] sm:$0xf] }
  0xb5   : > { %943 = vmatpush.bf16.msra.mxu2 %v3562_v3  ;;  %v4729_v44 = vor.u32 %v3891_v41, %v3495_v42  ;;  %v3922_v46 = vld [vmem:[%s4576_s17 + $0x94] sm:$0xf0]  ;;  %v3920_v48 = vld [vmem:[%s4576_s17 + $0x8c] sm:$0xf]  ;;  %v3615_v49 = vld [vmem:[%s4576_s17 + $0x98] sm:$0xf0] }
  0xb6   : > { %1268 = vperm.xlu1 %4033, %v1234_v30   ;;  %v3614_v47 = vor.u32 %v3922_v46, %v3613_v45  ;;  %v3693_v50 = vld [vmem:[%s4576_s17 + $0x128] sm:$0xf]  ;;  %v3618_v51 = vor.u32 %v3920_v48, %v3615_v49  ;;  %v3942_v52 = vld [vmem:[%s4576_s17 + $0x134] sm:$0xf0]  ;;  %v1237_v53 = vld [vmem:[%s4564_s12 + $0x30] sm:$0xff] }
  0xb7   : > { %v3694_v54 = vor.u32 %v3942_v52, %v3693_v50  ;;  %v3493_v55 = vld [vmem:[%s4569_s24 + $0x20] sm:$0xf]  ;;  %v3892_v56 = vld [vmem:[%s4569_s24 + $0x24] sm:$0xf0]  ;;  %v3893_v57 = vld [vmem:[%s4569_s24 + $0x34] sm:$0xf] }
  0xb8   : > { %846 = vmatpush.bf16.msra.mxu0 %v3542_v14  ;;  %1037 = vmatpush.bf16.msrb.mxu1 %v3630_v34  ;;  %v3503_v58 = vld [vmem:[%s4569_s24 + $0x38] sm:$0xf0]  ;;  %v4748_v59 = vor.u32 %v3892_v56, %v3493_v55  ;;  %v3940_v61 = vld [vmem:[%s4576_s17 + $0x12c] sm:$0xf]  ;;  %v1235_v63 = vld [vmem:[%s4564_s12 + $0x20] sm:$0xff] }
  0xb9   : > { %944 = vmatpush.bf16.msra.mxu2 %v3546_v18  ;;  %1090 = vmatpush.bf16.msrb.mxu3 %v3694_v54  ;;  %v4750_v60 = vor.u32 %v3893_v57, %v3503_v58  ;;  %v3695_v62 = vld [vmem:[%s4576_s17 + $0x138] sm:$0xf0]  ;;  %v3597_v2 = vld [vmem:[%s4576_s17 + $0x68] sm:$0xf]  ;;  %v3918_v3 = vld [vmem:[%s4576_s17 + $0x74] sm:$0xf0] }
  0xba   : > { %v3698_v0 = vor.u32 %v3940_v61, %v3695_v62  ;;  %1271 = vperm.xlu2 %4034, %v1235_v63   ;;  %v1238_v1 = vld [vmem:[%s4564_s12 + $0x38] sm:$0xff]  ;;  %v3598_v4 = vor.u32 %v3918_v3, %v3597_v2  ;;  %v3916_v5 = vld [vmem:[%s4576_s17 + $0x6c] sm:$0xf]  ;;  %v3501_v9 = vld [vmem:[%s4569_s24 + $0x30] sm:$0xf] }
  0xbb   : > { %847 = vmatmul.bf16.vlgmr.msra.gmra.mxu0 %v4706_v25  ;;  %1277 = vperm.xlu0 %4032, %v1237_v53   ;;  %v3599_v6 = vld [vmem:[%s4576_s17 + $0x78] sm:$0xf0]  ;;  %v1236_v8 = vld [vmem:[%s4564_s12 + $0x28] sm:$0xff]  ;;  %v3894_v10 = vld [vmem:[%s4569_s24 + $0x34] sm:$0xf0] }
  0xbc   : > { %1133 = vmatpush.bf16.msrb.mxu0 %v3666_v21  ;;  %945 = vmatmul.bf16.vlgmr.msra.gmra.mxu2 %v4706_v25  ;;  %v3602_v7 = vor.u32 %v3916_v5, %v3599_v6  ;;  %v3895_v11 = vld [vmem:[%s4569_s24 + $0x44] sm:$0xf]  ;;  %v3511_v12 = vld [vmem:[%s4569_s24 + $0x48] sm:$0xf0]  ;;  %v4771_v13 = vor.u32 %v3894_v10, %v3501_v9  ;;  %v3581_v16 = vld [vmem:[%s4576_s17 + $0x48] sm:$0xf] }
  0xbd   : > { %1186 = vmatpush.bf16.msrb.mxu2 %v3730_v22  ;;  %3740 = vmatmul.msk.bf16.gmra.mxu3 %vm814_vm1, %v4708_v26  ;;  %v4773_v14 = vor.u32 %v3895_v11, %v3511_v12  ;;  %v1240_v15 = vld [vmem:[%s4564_s12 + $0x48] sm:$0xff]  ;;  %v3914_v17 = vld [vmem:[%s4576_s17 + $0x54] sm:$0xf0]  ;;  %v3583_v20 = vld [vmem:[%s4576_s17 + $0x58] sm:$0xf0] }
  0xbe   : > { %1038 = vmatpush.bf16.msrb.mxu1 %v3614_v47  ;;  %1280 = vperm.xlu1 %4033, %v1238_v1   ;;  %v3582_v18 = vor.u32 %v3914_v17, %v3581_v16  ;;  %v3912_v19 = vld [vmem:[%s4576_s17 + $0x4c] sm:$0xf]  ;;  %v3677_v21 = vld [vmem:[%s4576_s17 + $0x108] sm:$0xf]  ;;  %v3938_v23 = vld [vmem:[%s4576_s17 + $0x114] sm:$0xf0] }
  0xbf   : > { %3732 = vmatmul.msk.bf16.gmra.mxu1 %vm814_vm1, %v4708_v26  ;;  %v3586_v22 = vor.u32 %v3912_v19, %v3583_v20  ;;  %v1241_v24 = vld [vmem:[%s4564_s12 + $0x50] sm:$0xff]  ;;  %v3509_v28 = vld [vmem:[%s4569_s24 + $0x40] sm:$0xf]  ;;  %v3896_v29 = vld [vmem:[%s4569_s24 + $0x44] sm:$0xf0] }
  0xc0   : > { %1134 = vmatpush.bf16.msrb.mxu0 %v3650_v27  ;;  %v3678_v27 = vor.u32 %v3938_v23, %v3677_v21  ;;  %v3897_v30 = vld [vmem:[%s4569_s24 + $0x54] sm:$0xf]  ;;  %v4793_v32 = vor.u32 %v3896_v29, %v3509_v28  ;;  %v3936_v34 = vld [vmem:[%s4576_s17 + $0x10c] sm:$0xf]  ;;  %v3679_v35 = vld [vmem:[%s4576_s17 + $0x118] sm:$0xf0] }
  0xc1   : > { %1187 = vmatpush.bf16.msrb.mxu2 %v3714_v31  ;;  %v3519_v31 = vld [vmem:[%s4569_s24 + $0x58] sm:$0xf0]  ;;  %v3565_v36 = vld [vmem:[%s4576_s17 + $0x28] sm:$0xf]  ;;  %v3910_v38 = vld [vmem:[%s4576_s17 + $0x34] sm:$0xf0] }
  0xc2   : > { %1039 = vmatpush.bf16.msrb.mxu1 %v3598_v4  ;;  %1274 = vperm.xlu2 %4034, %v1236_v8   ;;  %v4795_v33 = vor.u32 %v3897_v30, %v3519_v31  ;;  %v3566_v39 = vor.u32 %v3910_v38, %v3565_v36  ;;  %v3908_v41 = vld [vmem:[%s4576_s17 + $0x2c] sm:$0xf]  ;;  %v3567_v42 = vld [vmem:[%s4576_s17 + $0x38] sm:$0xf0]  ;;  %v1239_v45 = vld [vmem:[%s4564_s12 + $0x40] sm:$0xff] }
  0xc3   : > { %1286 = vperm.xlu0 %4032, %v1240_v15   ;;  %1091 = vmatpush.bf16.msrb.mxu3 %v3678_v27  ;;  %v3570_v46 = vor.u32 %v3908_v41, %v3567_v42  ;;  %v1243_v47 = vld [vmem:[%s4564_s12 + $0x60] sm:$0xff]  ;;  %v3517_v48 = vld [vmem:[%s4569_s24 + $0x50] sm:$0xf]  ;;  %v3898_v49 = vld [vmem:[%s4569_s24 + $0x54] sm:$0xf0] }
  0xc4   : > { %1135 = vmatpush.bf16.msrb.mxu0 %v3634_v37  ;;  %v3682_v37 = vor.u32 %v3936_v34, %v3679_v35  ;;  %v3899_v50 = vld [vmem:[%s4569_s24 + $0x64] sm:$0xf]  ;;  %v4815_v52 = vor.u32 %v3898_v49, %v3517_v48  ;;  %v1244_v54 = vld [vmem:[%s4564_s12 + $0x68] sm:$0xff]  ;;  %v3906_v56 = vld [vmem:[%s4576_s17 + $0x14] sm:$0xf0] }
  0xc5   : > { %1188 = vmatpush.bf16.msrb.mxu2 %v3698_v0  ;;  %v3549_v55 = vld [vmem:[%s4576_s17 + $0x8] sm:$0xf]  ;;  %v3904_v58 = vld [vmem:[%s4576_s17 + $0xc] sm:$0xf]  ;;  %v3551_v61 = vld [vmem:[%s4576_s17 + $0x18] sm:$0xf0] }
  0xc6   : > { %1040 = vmatpush.bf16.msrb.mxu1 %v3582_v18  ;;  %1289 = vperm.xlu1 %4033, %v1241_v24   ;;  %v3550_v57 = vor.u32 %v3906_v56, %v3549_v55  ;;  %v1242_v62 = vld [vmem:[%s4564_s12 + $0x58] sm:$0xff]  ;;  %v3554_v63 = vor.u32 %v3904_v58, %v3551_v61  ;;  %v3525_v0 = vld [vmem:[%s4569_s24 + $0x60] sm:$0xf]  ;;  %v3900_v1 = vld [vmem:[%s4569_s24 + $0x64] sm:$0xf0] }
  0xc7   : > { %v3901_v2 = vld [vmem:[%s4569_s24 + $0x74] sm:$0xf]  ;;  %v3535_v3 = vld [vmem:[%s4569_s24 + $0x78] sm:$0xf0]  ;;  %v4835_v4 = vor.u32 %v3900_v1, %v3525_v0  ;;  %v3902_v8 = vld [vmem:[%s4569_s24 + $0x74] sm:$0xf0] }
  0xc8   : > { %1136 = vmatpush.bf16.msrb.mxu0 %v3618_v51  ;;  %v3527_v51 = vld [vmem:[%s4569_s24 + $0x68] sm:$0xf0]  ;;  %v4837_v5 = vor.u32 %v3901_v2, %v3535_v3  ;;  %v1246_v6 = vld [vmem:[%s4564_s12 + $0x78] sm:$0xff]  ;;  %v1245_v12 = vld [vmem:[%s4564_s12 + $0x70] sm:$0xff] }
  0xc9   : > { %1189 = vmatpush.bf16.msrb.mxu2 %v3682_v37  ;;  %v4817_v53 = vor.u32 %v3899_v50, %v3527_v51 }
  0xca   : > { %1041 = vmatpush.bf16.msrb.mxu1 %v3566_v39  ;;  %1283 = vperm.xlu2 %4034, %v1239_v45  }
  0xcb   : > { %852 = vmatmul.bf16.gmra.mxu0 %v4727_v43  ;;  %1295 = vperm.xlu0 %4032, %v1243_v47  }
  0xcc   : > { %950 = vmatmul.bf16.gmra.mxu2 %v4727_v43  ;;  %1137 = vmatpush.bf16.msrb.mxu0 %v3602_v7  ;;  %v3533_v7 = vld [vmem:[%s4569_s24 + $0x70] sm:$0xf] }
  0xcd   : > { %3741 = vmatmul.msk.bf16.gmra.mxu3 %vm814_vm1, %v4729_v44  ;;  %v4848_v9 = vor.u32 %v3902_v8, %v3533_v7 }
  0xce   : > { %1298 = vperm.xlu1 %4033, %v1244_v54   ;;  %1042 = vmatpush.bf16.msrb.mxu1 %v3550_v57 }
  0xcf   : > { %3733 = vmatmul.msk.bf16.gmra.mxu1 %vm814_vm1, %v4729_v44 }
  0xd0   : > { %1138 = vmatpush.bf16.msrb.mxu0 %v3586_v22 }
  0xd2   : > { %1292 = vperm.xlu2 %4034, %v1242_v62  }
  0xd3   : > { %1304 = vperm.xlu0 %4032, %v1246_v6  }
  0xd4   : > { %1139 = vmatpush.bf16.msrb.mxu0 %v3570_v46 }
  0xd8   : > { %1140 = vmatpush.bf16.msrb.mxu0 %v3554_v63 }
  0xda   : > { %1301 = vperm.xlu2 %4034, %v1245_v12  }
  0xdb   : > { %857 = vmatmul.bf16.gmra.mxu0 %v4748_v59 }
  0xdc   : > { %955 = vmatmul.bf16.gmra.mxu2 %v4748_v59 }
  0xdd   : > { %3742 = vmatmul.msk.bf16.gmra.mxu3 %vm814_vm1, %v4750_v60 }
  0xdf   : > { %3734 = vmatmul.msk.bf16.gmra.mxu1 %vm814_vm1, %v4750_v60 }
  0xeb   : > { %862 = vmatmul.bf16.gmra.mxu0 %v4771_v13 }
  0xec   : > { %960 = vmatmul.bf16.gmra.mxu2 %v4771_v13 }
  0xed   : > { %3743 = vmatmul.msk.bf16.gmra.mxu3 %vm814_vm1, %v4773_v14 }
  0xef   : > { %3735 = vmatmul.msk.bf16.gmra.mxu1 %vm814_vm1, %v4773_v14 }
  0xfb   : > { %867 = vmatmul.bf16.gmra.mxu0 %v4793_v32 }
  0xfc   : > { %965 = vmatmul.bf16.gmra.mxu2 %v4793_v32 }
  0xfd   : > { %3744 = vmatmul.msk.bf16.gmra.mxu3 %vm814_vm1, %v4795_v33 }
  0xff   : > { %3736 = vmatmul.msk.bf16.gmra.mxu1 %vm814_vm1, %v4795_v33 }
 0x10b   : > { %872 = vmatmul.bf16.gmra.mxu0 %v4815_v52 }
 0x10c   : > { %970 = vmatmul.bf16.gmra.mxu2 %v4815_v52 }
 0x10d   : > { %3745 = vmatmul.msk.bf16.gmra.mxu3 %vm814_vm1, %v4817_v53 }
 0x10f   : > { %3737 = vmatmul.msk.bf16.gmra.mxu1 %vm814_vm1, %v4817_v53 }
 0x11b   : > { %877 = vmatmul.bf16.gmra.mxu0 %v4835_v4 }
 0x11c   : > { %975 = vmatmul.bf16.gmra.mxu2 %v4835_v4 }
 0x11d   : > { %3746 = vmatmul.msk.bf16.gmra.mxu3 %vm814_vm1, %v4837_v5 }
 0x11f   : > { %3738 = vmatmul.msk.bf16.gmra.mxu1 %vm814_vm1, %v4837_v5 }
 0x12b   : > { %882 = vmatmul.bf16.gmra.mxu0 %v4848_v9 }
 0x12c   : > { %980 = vmatmul.bf16.gmra.mxu2 %v4848_v9  ;;  %v897_v10 = vpop.f32.mrf.mxu1 }
 0x12d   : > { %3747 = vmatmul.msk.bf16.vlgmr.msrb.gmra.mxu3 %vm814_vm1, %v4667_v40 }
 0x12f   : > { %1043 = vmatmul.bf16.vlgmr.msrb.gmra.mxu1 %v4706_v25 }
 0x130   : > { %v995_v11 = vpop.f32.mrf.mxu3 }
 0x134   : > { %v899_v15 = vpop.f32.mrf.mxu1 }
 0x138   : > { %v997_v16 = vpop.f32.mrf.mxu3  ;;  %v848_v17 = vpop.f32.mrf.mxu0 }
 0x139   : > { %v4856_v18 = vadd.f32 %v897_v10, %v848_v17 }
 0x13b   : > { %1141 = vmatmul.bf16.vlgmr.msrb.gmra.mxu0 %v4706_v25 }
 0x13c   : > { %3755 = vmatmul.msk.bf16.vlgmr.msrb.gmra.mxu2 %vm814_vm1, %v4667_v40  ;;  %v902_v19 = vpop.f32.mrf.mxu1 }
 0x13d   : > { %3748 = vmatmul.msk.bf16.gmra.mxu3 %vm814_vm1, %v4708_v26 }
 0x13f   : > { %v946_v20 = vpop.f32.mrf.mxu2  ;;  %1048 = vmatmul.bf16.gmra.mxu1 %v4727_v43 }
 0x140   : > { %v1000_v21 = vpop.f32.mrf.mxu3  ;;  %v4863_v22 = vadd.f32 %v995_v11, %v946_v20  ;;  %v850_v23 = vpop.f32.mrf.mxu0 }
 0x141   : > { %v4866_v24 = vadd.f32 %v899_v15, %v850_v23 }
 0x143   : > { %7260 = vst [vmem:[#allocation8_spill] sm:$0xff] %v4866_v24 }
 0x144   : > { %v904_v27 = vpop.f32.mrf.mxu1 }
 0x147   : > { %v948_v28 = vpop.f32.mrf.mxu2 }
 0x148   : > { %v1002_v29 = vpop.f32.mrf.mxu3  ;;  %v4868_v25 = vadd.f32 %v997_v16, %v948_v28  ;;  %v853_v30 = vpop.f32.mrf.mxu0 }
 0x149   : > { %v4870_v31 = vadd.f32 %v902_v19, %v853_v30 }
 0x14a   : > { %7261 = vst [vmem:[#allocation9_spill] sm:$0xff] %v4868_v25 }
 0x14b   : > { %7262 = vst [vmem:[#allocation10_spill] sm:$0xff] %v4870_v31  ;;  %1146 = vmatmul.bf16.gmra.mxu0 %v4727_v43 }
 0x14c   : > { %3756 = vmatmul.msk.bf16.gmra.mxu2 %vm814_vm1, %v4708_v26  ;;  %v907_v40 = vpop.f32.mrf.mxu1 }
 0x14d   : > { %3749 = vmatmul.msk.bf16.gmra.mxu3 %vm814_vm1, %v4729_v44 }
 0x14f   : > { %v951_v34 = vpop.f32.mrf.mxu2  ;;  %1053 = vmatmul.bf16.gmra.mxu1 %v4748_v59 }
 0x150   : > { %v1005_v35 = vpop.f32.mrf.mxu3  ;;  %v4877_v36 = vadd.f32 %v1000_v21, %v951_v34  ;;  %v855_v37 = vpop.f32.mrf.mxu0 }
 0x151   : > { %v4880_v38 = vadd.f32 %v904_v27, %v855_v37 }
 0x152   : > { %7263 = vst [vmem:[#allocation11_spill] sm:$0xff] %v4877_v36 }
 0x153   : > { %7264 = vst [vmem:[#allocation12_spill] sm:$0xff] %v4880_v38 }
 0x154   : > { %v909_v39 = vpop.f32.mrf.mxu1 }
 0x157   : > { %v953_v41 = vpop.f32.mrf.mxu2 }
 0x158   : > { %v1007_v42 = vpop.f32.mrf.mxu3  ;;  %v4882_v43 = vadd.f32 %v1002_v29, %v953_v41  ;;  %v858_v45 = vpop.f32.mrf.mxu0 }
 0x159   : > { %v4884_v46 = vadd.f32 %v907_v40, %v858_v45 }
 0x15a   : > { %7265 = vst [vmem:[#allocation13_spill] sm:$0xff] %v4882_v43 }
 0x15b   : > { %7266 = vst [vmem:[#allocation14_spill] sm:$0xff] %v4884_v46  ;;  %1151 = vmatmul.bf16.gmra.mxu0 %v4748_v59 }
 0x15c   : > { %3757 = vmatmul.msk.bf16.gmra.mxu2 %vm814_vm1, %v4729_v44  ;;  %v912_v26 = vpop.f32.mrf.mxu1 }
 0x15d   : > { %3750 = vmatmul.msk.bf16.gmra.mxu3 %vm814_vm1, %v4750_v60 }
 0x15f   : > { %v956_v47 = vpop.f32.mrf.mxu2  ;;  %1058 = vmatmul.bf16.gmra.mxu1 %v4771_v13 }
 0x160   : > { %v1010_v48 = vpop.f32.mrf.mxu3  ;;  %v4891_v49 = vadd.f32 %v1005_v35, %v956_v47  ;;  %v860_v50 = vpop.f32.mrf.mxu0 }
 0x161   : > { %v4894_v51 = vadd.f32 %v909_v39, %v860_v50 }
 0x162   : > { %7267 = vst [vmem:[#allocation15_spill] sm:$0xff] %v4891_v49 }
 0x163   : > { %7268 = vst [vmem:[#allocation16_spill] sm:$0xff] %v4894_v51 }
 0x164   : > { %v914_v54 = vpop.f32.mrf.mxu1 }
 0x167   : > { %v958_v55 = vpop.f32.mrf.mxu2 }
 0x168   : > { %v1012_v56 = vpop.f32.mrf.mxu3  ;;  %v4896_v59 = vadd.f32 %v1007_v42, %v958_v55  ;;  %v863_v57 = vpop.f32.mrf.mxu0 }
 0x169   : > { %v4898_v58 = vadd.f32 %v912_v26, %v863_v57 }
 0x16a   : > { %7269 = vst [vmem:[#allocation17_spill] sm:$0xff] %v4896_v59 }
 0x16b   : > { %7270 = vst [vmem:[#allocation18_spill] sm:$0xff] %v4898_v58  ;;  %1156 = vmatmul.bf16.gmra.mxu0 %v4771_v13 }
 0x16c   : > { %3758 = vmatmul.msk.bf16.gmra.mxu2 %vm814_vm1, %v4750_v60  ;;  %v917_v44 = vpop.f32.mrf.mxu1 }
 0x16d   : > { %3751 = vmatmul.msk.bf16.gmra.mxu3 %vm814_vm1, %v4773_v14 }
 0x16f   : > { %v961_v61 = vpop.f32.mrf.mxu2  ;;  %1063 = vmatmul.bf16.gmra.mxu1 %v4793_v32 }
 0x170   : > { %v1015_v62 = vpop.f32.mrf.mxu3  ;;  %v4905_v63 = vadd.f32 %v1010_v48, %v961_v61  ;;  %v865_v0 = vpop.f32.mrf.mxu0 }
 0x171   : > { %v4908_v1 = vadd.f32 %v914_v54, %v865_v0  ;;  %v1247_v54 = vlaneseq }
 0x172   : > { %7271 = vst [vmem:[#allocation19_spill] sm:$0xff] %v4905_v63 }
 0x173   : > { %7272 = vst [vmem:[#allocation20_spill] sm:$0xff] %v4908_v1 }
 0x174   : > { %v919_v2 = vpop.f32.mrf.mxu1 }
 0x177   : > { %v963_v3 = vpop.f32.mrf.mxu2 }
 0x178   : > { %v1017_v6 = vpop.f32.mrf.mxu3  ;;  %v4910_v13 = vadd.f32 %v1012_v56, %v963_v3  ;;  %v868_v7 = vpop.f32.mrf.mxu0 }
 0x179   : > { %v4912_v8 = vadd.f32 %v917_v44, %v868_v7  ;;  %v1248_v44 = vand.u32 127, %v1247_v54 }
 0x17a   : > { %7273 = vst [vmem:[#allocation21_spill] sm:$0xff] %v4910_v13 }
 0x17b   : > { %7274 = vst [vmem:[#allocation22_spill] sm:$0xff] %v4912_v8  ;;  %1161 = vmatmul.bf16.gmra.mxu0 %v4793_v32 }
 0x17c   : > { %3759 = vmatmul.msk.bf16.gmra.mxu2 %vm814_vm1, %v4773_v14  ;;  %v922_v60 = vpop.f32.mrf.mxu1 }
 0x17d   : > { %3752 = vmatmul.msk.bf16.gmra.mxu3 %vm814_vm1, %v4795_v33 }
 0x17f   : > { %v966_v10 = vpop.f32.mrf.mxu2  ;;  %1068 = vmatmul.bf16.gmra.mxu1 %v4815_v52 }
 0x180   : > { %v1020_v11 = vpop.f32.mrf.mxu3  ;;  %v4919_v12 = vadd.f32 %v1015_v62, %v966_v10  ;;  %v870_v15 = vpop.f32.mrf.mxu0  ;;  %v1249_v62 = vadd.s32 128, %v1248_v44 }
 0x181   : > { %v4922_v16 = vadd.f32 %v919_v2, %v870_v15 }
 0x182   : > { %7275 = vst [vmem:[#allocation23_spill] sm:$0xff] %v4919_v12 }
 0x183   : > { %7276 = vst [vmem:[#allocation24_spill] sm:$0xff] %v4922_v16 }
 0x184   : > { %v924_v17 = vpop.f32.mrf.mxu1 }
 0x187   : > { %v968_v19 = vpop.f32.mrf.mxu2 }
 0x188   : > { %v1022_v20 = vpop.f32.mrf.mxu3  ;;  %v4924_v32 = vadd.f32 %v1017_v6, %v968_v19  ;;  %v873_v21 = vpop.f32.mrf.mxu0  ;;  %v1250_v6 = vadd.s32 256, %v1248_v44 }
 0x189   : > { %v4926_v23 = vadd.f32 %v922_v60, %v873_v21  ;;  %v4964_v60 = vstv %s3763_s2 }
 0x18a   : > { %7277 = vst [vmem:[#allocation25_spill] sm:$0xff] %v4924_v32  ;;  %v4975_v15 = vadd.s32 %v4964_v60, %v1250_v6 }
 0x18b   : > { %7278 = vst [vmem:[#allocation26_spill] sm:$0xff] %v4926_v23  ;;  %1166 = vmatmul.bf16.gmra.mxu0 %v4815_v52 }
 0x18c   : > { %3760 = vmatmul.msk.bf16.gmra.mxu2 %vm814_vm1, %v4795_v33  ;;  %v927_v14 = vpop.f32.mrf.mxu1 }
 0x18d   : > { %3753 = vmatmul.msk.bf16.gmra.mxu3 %vm814_vm1, %v4817_v53 }
 0x18f   : > { %v971_v27 = vpop.f32.mrf.mxu2  ;;  %1073 = vmatmul.bf16.gmra.mxu1 %v4835_v4 }
 0x190   : > { %v1025_v28 = vpop.f32.mrf.mxu3  ;;  %v4933_v29 = vadd.f32 %v1020_v11, %v971_v27  ;;  %v875_v30 = vpop.f32.mrf.mxu0  ;;  %v4969_v11 = vadd.s32 %v4964_v60, %v1249_v62 }
 0x191   : > { %v4936_v40 = vadd.f32 %v924_v17, %v875_v30  ;;  %v1251_v17 = vadd.s32 384, %v1248_v44  ;;  %v7146_v30 = vmov 0.0  }
 0x192   : > { %7279 = vst [vmem:[#allocation27_spill] sm:$0xff] %v4933_v29 }
 0x193   : > { %7280 = vst [vmem:[#allocation28_spill] sm:$0xff] %v4936_v40 }
 0x194   : > { %v929_v34 = vpop.f32.mrf.mxu1 }
 0x197   : > { %v973_v35 = vpop.f32.mrf.mxu2 }
 0x198   : > { %v1027_v37 = vpop.f32.mrf.mxu3  ;;  %v4938_v52 = vadd.f32 %v1022_v20, %v973_v35  ;;  %v878_v39 = vpop.f32.mrf.mxu0 }
 0x199   : > { %v4940_v41 = vadd.f32 %v927_v14, %v878_v39 }
 0x19a   : > { %7281 = vst [vmem:[#allocation29_spill] sm:$0xff] %v4938_v52 }
 0x19b   : > { %7282 = vst [vmem:[#allocation30_spill] sm:$0xff] %v4940_v41  ;;  %1171 = vmatmul.bf16.gmra.mxu0 %v4835_v4 }
 0x19c   : > { %3761 = vmatmul.msk.bf16.gmra.mxu2 %vm814_vm1, %v4817_v53  ;;  %v932_v33 = vpop.f32.mrf.mxu1 }
 0x19d   : > { %3754 = vmatmul.msk.bf16.gmra.mxu3 %vm814_vm1, %v4837_v5 }
 0x19f   : > { %v976_v42 = vpop.f32.mrf.mxu2  ;;  %1078 = vmatmul.bf16.gmra.mxu1 %v4848_v9 }
 0x1a0   : > { %v1030_v45 = vpop.f32.mrf.mxu3  ;;  %v4947_v26 = vadd.f32 %v1025_v28, %v976_v42  ;;  %v880_v47 = vpop.f32.mrf.mxu0  ;;  %v4983_v28 = vadd.s32 %v4964_v60, %v1251_v17 }
 0x1a1   : > { %v4950_v48 = vadd.f32 %v929_v34, %v880_v47 }
 0x1a2   : > { %7283 = vst [vmem:[#allocation31_spill] sm:$0xff] %v4947_v26 }
 0x1a3   : > { %7284 = vst [vmem:[#allocation32_spill] sm:$0xff] %v4950_v48 }
 0x1a4   : > { %v934_v50 = vpop.f32.mrf.mxu1 }
 0x1a7   : > { %v978_v4 = vpop.f32.mrf.mxu2 }
 0x1a8   : > { %v1032_v55 = vpop.f32.mrf.mxu3  ;;  %v4952_v56 = vadd.f32 %v1027_v37, %v978_v4  ;;  %v883_v57 = vpop.f32.mrf.mxu0 }
 0x1a9   : > { %v4954_v53 = vadd.f32 %v932_v33, %v883_v57 }
 0x1aa   : > { %7285 = vst [vmem:[#allocation33_spill] sm:$0xff] %v4952_v56 }
 0x1ab   : > { %7286 = vst [vmem:[#allocation34_spill] sm:$0xff] %v4954_v53  ;;  %1176 = vmatmul.bf16.gmra.mxu0 %v4848_v9  ;;  %v1260_v9 = vpop.permute.xlu0 %1259 }
 0x1ac   : > { %3762 = vmatmul.msk.bf16.gmra.mxu2 %vm814_vm1, %v4837_v5  ;;  %v1044_v61 = vpop.f32.mrf.mxu1  ;;  %v4972_v5 = vadd.s32 %v4964_v60, %v1248_v44  ;;  %vm1307_vm2 = vcmp.eq.s32.totalorder %v4969_v11, %v1260_v9  ;;  %vm1308_vm4 = vcmp.eq.s32.totalorder %v4975_v15, %v1260_v9  ;;  %vm1309_vm5 = vcmp.eq.s32.totalorder %v4983_v28, %v1260_v9 }
 0x1ad   : > { %v4986_v34 = vsel %vm1307_vm2, 1.0, %v7146_v30  ;;  %v4994_v39 = vsel %vm1308_vm4, 1.0, %v7146_v30 }
 0x1ae   : > { %vm1306_vm3 = vcmp.eq.s32.totalorder %v4972_v5, %v1260_v9  ;;  %v1582_v33 = vmul.f32 %v4986_v34, %v4863_v22  ;;  %v1266_v9 = vpop.permute.xlu1 %1265 }
 0x1af   : > { %v981_v0 = vpop.f32.mrf.mxu2  ;;  %v4991_v37 = vsel %vm1306_vm3, 1.0, %v7146_v30  ;;  %vm1315_vm10 = vcmp.eq.s32.totalorder %v4969_v11, %v1266_v9  ;;  %vm1314_vm11 = vcmp.eq.s32.totalorder %v4972_v5, %v1266_v9  ;;  %vm1316_vm12 = vcmp.eq.s32.totalorder %v4975_v15, %v1266_v9 }
 0x1b0   : > { %v1093_v2 = vpop.f32.mrf.mxu3  ;;  %v4960_v3 = vadd.f32 %v1030_v45, %v981_v0  ;;  %v885_v7 = vpop.f32.mrf.mxu0  ;;  %v1581_v47 = vmul.f32 %v4991_v37, %v4856_v18  ;;  %vm1317_vm13 = vcmp.eq.s32.totalorder %v4983_v28, %v1266_v9 }
 0x1b1   : > { %v4966_v10 = vadd.f32 %v934_v50, %v885_v7  ;;  %v4988_v35 = vadd.f32 %v1093_v2, %v1044_v61 }
 0x1b2   : > { %7287 = vst [vmem:[#allocation35_spill] sm:$0xff] %v4960_v3  ;;  %v1645_v57 = vadd.f32 %v1582_v33, %v1581_v47 }
 0x1b3   : > { %7288 = vst [vmem:[#allocation36_spill] sm:$0xff] %v4966_v10  ;;  %v1263_v42 = vpop.permute.xlu0 %1262  ;;  %v1583_v50 = vmul.f32 %v4994_v39, %v4988_v35 }
 0x1b4   : > { %v1046_v19 = vpop.f32.mrf.mxu1  ;;  %vm1311_vm6 = vcmp.eq.s32.totalorder %v4969_v11, %v1263_v42  ;;  %vm1310_vm7 = vcmp.eq.s32.totalorder %v4972_v5, %v1263_v42  ;;  %vm1312_vm8 = vcmp.eq.s32.totalorder %v4975_v15, %v1263_v42  ;;  %vm1313_vm9 = vcmp.eq.s32.totalorder %v4983_v28, %v1263_v42 }
 0x1b5   : > { %v5012_v62 = vsel %vm1311_vm6, 1.0, %v7146_v30  ;;  %v1646_v6 = vadd.f32 %v1645_v57, %v1583_v50  ;;  %v5019_v7 = vsel %vm1310_vm7, 1.0, %v7146_v30  ;;  %v5022_v17 = vsel %vm1312_vm8, 1.0, %v7146_v30 }
 0x1b6   : > { %7291 = vst [vmem:[#allocation39_spill] sm:$0xff] %v5022_v17 }
 0x1b7   : > { %v983_v20 = vpop.f32.mrf.mxu2 }
 0x1b8   : > { %v1095_v21 = vpop.f32.mrf.mxu3  ;;  %v4980_v14 = vadd.f32 %v1032_v55, %v983_v20  ;;  %v1142_v27 = vpop.f32.mrf.mxu0  ;;  %v5005_v55 = vsel %vm1309_vm5, 1.0, %v7146_v30  ;;  %v1586_v20 = vmul.f32 %v5012_v62, %v4868_v25 }
 0x1b9   : > { %v5014_v0 = vadd.f32 %v1095_v21, %v1046_v19  ;;  %v1585_v19 = vmul.f32 %v5019_v7, %v4866_v24  ;;  %v5047_v24 = vsel %vm1314_vm11, 1.0, %v7146_v30 }
 0x1ba   : > { %7289 = vst [vmem:[#allocation37_spill] sm:$0xff] %v4980_v14 }
 0x1bb   : > { %7290 = vst [vmem:[#allocation38_spill] sm:$0xff] %v5014_v0  ;;  %v1587_v21 = vmul.f32 %v5022_v17, %v5014_v0  ;;  %v5050_v17 = vsel %vm1316_vm12, 1.0, %v7146_v30 }
 0x1bc   : > { %v1049_v45 = vpop.f32.mrf.mxu1  ;;  %7295 = vst [vmem:[#allocation43_spill] sm:$0xff] %v5050_v17 }
 0x1bf   : > { %v1191_v4 = vpop.f32.mrf.mxu2 }
 0x1c0   : > { %v1098_v54 = vpop.f32.mrf.mxu3  ;;  %v5009_v44 = vadd.f32 %v1191_v4, %v1142_v27  ;;  %v1144_v61 = vpop.f32.mrf.mxu0  ;;  %v5033_v4 = vsel %vm1313_vm9, 1.0, %v7146_v30 }
 0x1c1   : > { %v5042_v25 = vadd.f32 %v1098_v54, %v1049_v45  ;;  %v1589_v45 = vmul.f32 %v5047_v24, %v4870_v31 }
 0x1c2   : > { %v1584_v2 = vmul.f32 %v5005_v55, %v5009_v44 }
 0x1c3   : > { %7294 = vst [vmem:[#allocation42_spill] sm:$0xff] %v5042_v25  ;;  %v1591_v54 = vmul.f32 %v5050_v17, %v5042_v25 }
 0x1c4   : > { %v1647_v27 = vadd.f32 %v1646_v6, %v1584_v2  ;;  %v1051_v33 = vpop.f32.mrf.mxu1  ;;  %v1650_v2 = vadd.f32 %v1586_v20, %v1585_v19  ;;  %v5040_v6 = vsel %vm1315_vm10, 1.0, %v7146_v30  ;;  %v1269_v20 = vpop.permute.xlu1 %1268 }
 0x1c5   : > { %7293 = vst [vmem:[#allocation41_spill] sm:$0xff] %v5040_v6  ;;  %vm1319_vm14 = vcmp.eq.s32.totalorder %v4969_v11, %v1269_v20  ;;  %vm1318_vm15 = vcmp.eq.s32.totalorder %v4972_v5, %v1269_v20  ;;  %vm1320_vm0 = vcmp.eq.s32.totalorder %v4975_v15, %v1269_v20  ;;  %vm1321_vm1 = vcmp.eq.s32.totalorder %v4983_v28, %v1269_v20 }
 0x1c6   : > { %1648 = vadd.xlane.f32.xlu1 %v1647_v27  ;;  %v1651_v0 = vadd.f32 %v1650_v2, %v1587_v21  ;;  %v5075_v17 = vsel %vm1318_vm15, 1.0, %v7146_v30 }
 0x1c7   : > { %v1193_v50 = vpop.f32.mrf.mxu2 }
 0x1c8   : > { %v1100_v47 = vpop.f32.mrf.mxu3  ;;  %v5037_v42 = vadd.f32 %v1193_v50, %v1144_v61  ;;  %v1147_v57 = vpop.f32.mrf.mxu0  ;;  %v1590_v61 = vmul.f32 %v5040_v6, %v4877_v36 }
 0x1c9   : > { %v5070_v31 = vadd.f32 %v1100_v47, %v1051_v33  ;;  %v1593_v33 = vmul.f32 %v5075_v17, %v4880_v38 }
 0x1ca   : > { %7292 = vst [vmem:[#allocation40_spill] sm:$0xff] %v5037_v42  ;;  %v1588_v27 = vmul.f32 %v5033_v4, %v5037_v42  ;;  %v5061_v42 = vsel %vm1317_vm13, 1.0, %v7146_v30  ;;  %v1655_v36 = vadd.f32 %v1590_v61, %v1589_v45  ;;  %v1272_v61 = vpop.permute.xlu2 %1271  ;;  %v5078_v45 = vsel %vm1320_vm0, 1.0, %v7146_v30 }
 0x1cb   : > { %7298 = vst [vmem:[#allocation46_spill] sm:$0xff] %v5070_v31  ;;  %vm1323_vm2 = vcmp.eq.s32.totalorder %v4969_v11, %v1272_v61  ;;  %vm1322_vm3 = vcmp.eq.s32.totalorder %v4972_v5, %v1272_v61  ;;  %vm1324_vm4 = vcmp.eq.s32.totalorder %v4975_v15, %v1272_v61  ;;  %vm1325_vm5 = vcmp.eq.s32.totalorder %v4983_v28, %v1272_v61 }
 0x1cc   : > { %v1652_v50 = vadd.f32 %v1651_v0, %v1588_v27  ;;  %v1054_v19 = vpop.f32.mrf.mxu1  ;;  %v5068_v27 = vsel %vm1319_vm14, 1.0, %v7146_v30  ;;  %v1656_v25 = vadd.f32 %v1655_v36, %v1591_v54  ;;  %7299 = vst [vmem:[#allocation47_spill] sm:$0xff] %v5078_v45  ;;  %v1595_v36 = vmul.f32 %v5078_v45, %v5070_v31 }
 0x1cd   : > { %7297 = vst [vmem:[#allocation45_spill] sm:$0xff] %v5068_v27  ;;  %v5103_v45 = vsel %vm1322_vm3, 1.0, %v7146_v30 }
 0x1ce   : > { %1653 = vadd.xlane.f32.xlu2 %v1652_v50 }
 0x1cf   : > { %v1196_v2 = vpop.f32.mrf.mxu2 }
 0x1d0   : > { %v1103_v21 = vpop.f32.mrf.mxu3  ;;  %v5065_v0 = vadd.f32 %v1196_v2, %v1147_v57  ;;  %v1149_v9 = vpop.f32.mrf.mxu0  ;;  %v1594_v57 = vmul.f32 %v5068_v27, %v4882_v43  ;;  %v5096_v43 = vsel %vm1323_vm2, 1.0, %v7146_v30  ;;  %v5106_v27 = vsel %vm1324_vm4, 1.0, %v7146_v30 }
 0x1d1   : > { %7301 = vst [vmem:[#allocation49_spill] sm:$0xff] %v5096_v43  ;;  %v5098_v38 = vadd.f32 %v1103_v21, %v1054_v19  ;;  %v1597_v19 = vmul.f32 %v5103_v45, %v4884_v46 }
 0x1d2   : > { %7296 = vst [vmem:[#allocation44_spill] sm:$0xff] %v5065_v0  ;;  %v1592_v50 = vmul.f32 %v5061_v42, %v5065_v0  ;;  %v5089_v0 = vsel %vm1321_vm1, 1.0, %v7146_v30 }
 0x1d3   : > { %7302 = vst [vmem:[#allocation50_spill] sm:$0xff] %v5098_v38  ;;  %v1599_v21 = vmul.f32 %v5106_v27, %v5098_v38 }
 0x1d4   : > { %v1657_v2 = vadd.f32 %v1656_v25, %v1592_v50  ;;  %v1056_v6 = vpop.f32.mrf.mxu1  ;;  %v1660_v50 = vadd.f32 %v1594_v57, %v1593_v33  ;;  %7303 = vst [vmem:[#allocation51_spill] sm:$0xff] %v5106_v27  ;;  %v1275_v57 = vpop.permute.xlu2 %1274 }
 0x1d5   : > { %vm1327_vm6 = vcmp.eq.s32.totalorder %v4969_v11, %v1275_v57  ;;  %vm1326_vm7 = vcmp.eq.s32.totalorder %v4972_v5, %v1275_v57  ;;  %vm1328_vm8 = vcmp.eq.s32.totalorder %v4975_v15, %v1275_v57  ;;  %vm1329_vm9 = vcmp.eq.s32.totalorder %v4983_v28, %v1275_v57 }
 0x1d6   : > { %1658 = vadd.xlane.f32.xlu0 %v1657_v2  ;;  %v1661_v31 = vadd.f32 %v1660_v50, %v1595_v36  ;;  %v5131_v27 = vsel %vm1326_vm7, 1.0, %v7146_v30 }
 0x1d7   : > { %v1198_v54 = vpop.f32.mrf.mxu2 }
 0x1d8   : > { %v1105_v47 = vpop.f32.mrf.mxu3  ;;  %v5093_v25 = vadd.f32 %v1198_v54, %v1149_v9  ;;  %v1152_v20 = vpop.f32.mrf.mxu0  ;;  %v1598_v9 = vmul.f32 %v5096_v43, %v4891_v49 }
 0x1d9   : > { %v5126_v46 = vadd.f32 %v1105_v47, %v1056_v6  ;;  %v1601_v6 = vmul.f32 %v5131_v27, %v4894_v51 }
 0x1da   : > { %7300 = vst [vmem:[#allocation48_spill] sm:$0xff] %v5093_v25  ;;  %v1596_v2 = vmul.f32 %v5089_v0, %v5093_v25  ;;  %v5117_v25 = vsel %vm1325_vm5, 1.0, %v7146_v30  ;;  %v1665_v49 = vadd.f32 %v1598_v9, %v1597_v19  ;;  %v5134_v9 = vsel %vm1328_vm8, 1.0, %v7146_v30 }
 0x1db   : > { %7306 = vst [vmem:[#allocation54_spill] sm:$0xff] %v5126_v46 }
 0x1dc   : > { %v1662_v54 = vadd.f32 %v1661_v31, %v1596_v2  ;;  %v1059_v33 = vpop.f32.mrf.mxu1  ;;  %v5124_v2 = vsel %vm1327_vm6, 1.0, %v7146_v30  ;;  %v1666_v38 = vadd.f32 %v1665_v49, %v1599_v21  ;;  %7307 = vst [vmem:[#allocation55_spill] sm:$0xff] %v5134_v9  ;;  %v1603_v49 = vmul.f32 %v5134_v9, %v5126_v46 }
 0x1dd   : > { %7305 = vst [vmem:[#allocation53_spill] sm:$0xff] %v5124_v2 }
 0x1de   : > { %1663 = vadd.xlane.f32.xlu2 %v1662_v54 }
 0x1df   : > { %v1201_v50 = vpop.f32.mrf.mxu2 }
 0x1e0   : > { %v1108_v36 = vpop.f32.mrf.mxu3  ;;  %v5121_v31 = vadd.f32 %v1201_v50, %v1152_v20  ;;  %v1154_v61 = vpop.f32.mrf.mxu0  ;;  %v1602_v20 = vmul.f32 %v5124_v2, %v4896_v59 }
 0x1e1   : > { %v1278_v50 = vpop.permute.xlu0 %1277  ;;  %v5154_v51 = vadd.f32 %v1108_v36, %v1059_v33 }
 0x1e2   : > { %7304 = vst [vmem:[#allocation52_spill] sm:$0xff] %v5121_v31  ;;  %v1600_v54 = vmul.f32 %v5117_v25, %v5121_v31  ;;  %vm1331_vm10 = vcmp.eq.s32.totalorder %v4969_v11, %v1278_v50  ;;  %v5145_v31 = vsel %vm1329_vm9, 1.0, %v7146_v30  ;;  %vm1330_vm11 = vcmp.eq.s32.totalorder %v4972_v5, %v1278_v50 }
 0x1e3   : > { %vm1332_vm12 = vcmp.eq.s32.totalorder %v4975_v15, %v1278_v50  ;;  %v5152_v59 = vsel %vm1331_vm10, 1.0, %v7146_v30  ;;  %7310 = vst [vmem:[#allocation58_spill] sm:$0xff] %v5154_v51  ;;  %v5159_v9 = vsel %vm1330_vm11, 1.0, %v7146_v30  ;;  %vm1333_vm13 = vcmp.eq.s32.totalorder %v4983_v28, %v1278_v50 }
 0x1e4   : > { %v1667_v19 = vadd.f32 %v1666_v38, %v1600_v54  ;;  %v1061_v43 = vpop.f32.mrf.mxu1  ;;  %v1670_v54 = vadd.f32 %v1602_v20, %v1601_v6  ;;  %7309 = vst [vmem:[#allocation57_spill] sm:$0xff] %v5152_v59  ;;  %v5162_v2 = vsel %vm1332_vm12, 1.0, %v7146_v30  ;;  %v1281_v20 = vpop.permute.xlu1 %1280  ;;  %v1605_v33 = vmul.f32 %v5159_v9, %v4898_v58 }
 0x1e5   : > { %7311 = vst [vmem:[#allocation59_spill] sm:$0xff] %v5159_v9  ;;  %vm1335_vm14 = vcmp.eq.s32.totalorder %v4969_v11, %v1281_v20  ;;  %v1607_v36 = vmul.f32 %v5162_v2, %v5154_v51  ;;  %vm1334_vm15 = vcmp.eq.s32.totalorder %v4972_v5, %v1281_v20  ;;  %vm1336_vm0 = vcmp.eq.s32.totalorder %v4975_v15, %v1281_v20 }
 0x1e6   : > { %1668 = vadd.xlane.f32.xlu1 %v1667_v19  ;;  %v1671_v46 = vadd.f32 %v1670_v54, %v1603_v49  ;;  %7312 = vst [vmem:[#allocation60_spill] sm:$0xff] %v5162_v2  ;;  %v5187_v2 = vsel %vm1334_vm15, 1.0, %v7146_v30  ;;  %vm1337_vm1 = vcmp.eq.s32.totalorder %v4983_v28, %v1281_v20 }
 0x1e7   : > { %v1203_v21 = vpop.f32.mrf.mxu2  ;;  %7317 = vst [vmem:[#allocation65_spill] sm:$0xff] %v5187_v2 }
 0x1e8   : > { %v1110_v47 = vpop.f32.mrf.mxu3  ;;  %v5149_v38 = vadd.f32 %v1203_v21, %v1154_v61  ;;  %v1157_v57 = vpop.f32.mrf.mxu0  ;;  %v1606_v61 = vmul.f32 %v5152_v59, %v4905_v63 }
 0x1e9   : > { %v5182_v58 = vadd.f32 %v1110_v47, %v1061_v43  ;;  %v1609_v43 = vmul.f32 %v5187_v2, %v4908_v1 }
 0x1ea   : > { %7308 = vst [vmem:[#allocation56_spill] sm:$0xff] %v5149_v38  ;;  %v1604_v19 = vmul.f32 %v5145_v31, %v5149_v38  ;;  %v5173_v38 = vsel %vm1333_vm13, 1.0, %v7146_v30  ;;  %v1675_v63 = vadd.f32 %v1606_v61, %v1605_v33  ;;  %v5190_v61 = vsel %vm1336_vm0, 1.0, %v7146_v30 }
 0x1eb   : > { %7313 = vst [vmem:[#allocation61_spill] sm:$0xff] %v5173_v38 }
 0x1ec   : > { %v1672_v21 = vadd.f32 %v1671_v46, %v1604_v19  ;;  %v1064_v6 = vpop.f32.mrf.mxu1  ;;  %v5180_v19 = vsel %vm1335_vm14, 1.0, %v7146_v30  ;;  %7316 = vst [vmem:[#allocation64_spill] sm:$0xff] %v5182_v58  ;;  %v1676_v51 = vadd.f32 %v1675_v63, %v1607_v36  ;;  %v1611_v63 = vmul.f32 %v5190_v61, %v5182_v58 }
 0x1ed   : > { %7315 = vst [vmem:[#allocation63_spill] sm:$0xff] %v5180_v19 }
 0x1ee   : > { %1673 = vadd.xlane.f32.xlu2 %v1672_v21  ;;  %7318 = vst [vmem:[#allocation66_spill] sm:$0xff] %v5190_v61 }
 0x1ef   : > { %v1206_v54 = vpop.f32.mrf.mxu2 }
 0x1f0   : > { %v1113_v49 = vpop.f32.mrf.mxu3  ;;  %v5177_v46 = vadd.f32 %v1206_v54, %v1157_v57  ;;  %v1159_v50 = vpop.f32.mrf.mxu0  ;;  %v1610_v57 = vmul.f32 %v5180_v19, %v4910_v13 }
 0x1f1   : > { %v1284_v54 = vpop.permute.xlu2 %1283  ;;  %v5210_v1 = vadd.f32 %v1113_v49, %v1064_v6 }
 0x1f2   : > { %7314 = vst [vmem:[#allocation62_spill] sm:$0xff] %v5177_v46  ;;  %v1608_v21 = vmul.f32 %v5173_v38, %v5177_v46  ;;  %vm1339_vm2 = vcmp.eq.s32.totalorder %v4969_v11, %v1284_v54  ;;  %v5201_v46 = vsel %vm1337_vm1, 1.0, %v7146_v30  ;;  %vm1338_vm3 = vcmp.eq.s32.totalorder %v4972_v5, %v1284_v54 }
 0x1f3   : > { %7319 = vst [vmem:[#allocation67_spill] sm:$0xff] %v5201_v46  ;;  %vm1340_vm4 = vcmp.eq.s32.totalorder %v4975_v15, %v1284_v54  ;;  %v5208_v13 = vsel %vm1339_vm2, 1.0, %v7146_v30  ;;  %v5215_v61 = vsel %vm1338_vm3, 1.0, %v7146_v30  ;;  %vm1341_vm5 = vcmp.eq.s32.totalorder %v4983_v28, %v1284_v54 }
 0x1f4   : > { %v1677_v33 = vadd.f32 %v1676_v51, %v1608_v21  ;;  %v1066_v59 = vpop.f32.mrf.mxu1  ;;  %v1680_v21 = vadd.f32 %v1610_v57, %v1609_v43  ;;  %7321 = vst [vmem:[#allocation69_spill] sm:$0xff] %v5208_v13  ;;  %v5218_v19 = vsel %vm1340_vm4, 1.0, %v7146_v30  ;;  %v1287_v57 = vpop.permute.xlu0 %1286  ;;  %v1613_v6 = vmul.f32 %v5215_v61, %v4912_v8 }
 0x1f5   : > { %7322 = vst [vmem:[#allocation70_spill] sm:$0xff] %v5210_v1  ;;  %vm1343_vm6 = vcmp.eq.s32.totalorder %v4969_v11, %v1287_v57  ;;  %v1615_v49 = vmul.f32 %v5218_v19, %v5210_v1  ;;  %vm1342_vm7 = vcmp.eq.s32.totalorder %v4972_v5, %v1287_v57  ;;  %vm1344_vm8 = vcmp.eq.s32.totalorder %v4975_v15, %v1287_v57 }
 0x1f6   : > { %1678 = vadd.xlane.f32.xlu0 %v1677_v33  ;;  %v1681_v58 = vadd.f32 %v1680_v21, %v1611_v63  ;;  %7323 = vst [vmem:[#allocation71_spill] sm:$0xff] %v5215_v61  ;;  %vm1345_vm10 = vcmp.eq.s32.totalorder %v4983_v28, %v1287_v57 }
 0x1f7   : > { %v1208_v36 = vpop.f32.mrf.mxu2  ;;  %7324 = vst [vmem:[#allocation72_spill] sm:$0xff] %v5218_v19  ;;  %v5243_v19 = vsel %vm1342_vm7, 1.0, %v7146_v30 }
 0x1f8   : > { %v1115_v47 = vpop.f32.mrf.mxu3  ;;  %v5205_v51 = vadd.f32 %v1208_v36, %v1159_v50  ;;  %v1162_v20 = vpop.f32.mrf.mxu0  ;;  %v1614_v50 = vmul.f32 %v5208_v13, %v4919_v12  ;;  %7329 = vst [vmem:[#allocation77_spill] sm:$0xff] %v5243_v19  ;;  %v1617_v13 = vmul.f32 %v5243_v19, %v4922_v16 }
 0x1f9   : > { %v5238_v8 = vadd.f32 %v1115_v47, %v1066_v59 }
 0x1fa   : > { %7320 = vst [vmem:[#allocation68_spill] sm:$0xff] %v5205_v51  ;;  %v1612_v33 = vmul.f32 %v5201_v46, %v5205_v51  ;;  %v5229_v51 = vsel %vm1341_vm5, 1.0, %v7146_v30  ;;  %v1685_v12 = vadd.f32 %v1614_v50, %v1613_v6  ;;  %v5246_v50 = vsel %vm1344_vm8, 1.0, %v7146_v30 }
 0x1fb   : > { %7325 = vst [vmem:[#allocation73_spill] sm:$0xff] %v5229_v51  ;;  %v1619_v59 = vmul.f32 %v5246_v50, %v5238_v8 }
 0x1fc   : > { %v1682_v36 = vadd.f32 %v1681_v58, %v1612_v33  ;;  %v1069_v43 = vpop.f32.mrf.mxu1  ;;  %v5236_v33 = vsel %vm1343_vm6, 1.0, %v7146_v30  ;;  %7328 = vst [vmem:[#allocation76_spill] sm:$0xff] %v5238_v8  ;;  %v1686_v1 = vadd.f32 %v1685_v12, %v1615_v49 }
 0x1fd   : > { %7327 = vst [vmem:[#allocation75_spill] sm:$0xff] %v5236_v33 }
 0x1fe   : > { %1683 = vadd.xlane.f32.xlu1 %v1682_v36  ;;  %7330 = vst [vmem:[#allocation78_spill] sm:$0xff] %v5246_v50  ;;  %v1293_v50 = vpop.permute.xlu2 %1292 }
 0x1ff   : > { %v1211_v21 = vpop.f32.mrf.mxu2  ;;  %vm1351_vm13 = vcmp.eq.s32.totalorder %v4969_v11, %v1293_v50  ;;  %vm1350_vm15 = vcmp.eq.s32.totalorder %v4972_v5, %v1293_v50  ;;  %vm1352_vm0 = vcmp.eq.s32.totalorder %v4975_v15, %v1293_v50  ;;  %vm1353_vm2 = vcmp.eq.s32.totalorder %v4983_v28, %v1293_v50 }
 0x200   : > { %v1118_v63 = vpop.f32.mrf.mxu3  ;;  %v5233_v58 = vadd.f32 %v1211_v21, %v1162_v20  ;;  %v1164_v54 = vpop.f32.mrf.mxu0  ;;  %v1618_v20 = vmul.f32 %v5236_v33, %v4924_v32  ;;  %v7332_v32 = vmov 0.0  }
 0x201   : > { %v1290_v21 = vpop.permute.xlu1 %1289  ;;  %v5264_v33 = vsel %vm1345_vm10, 1.0, %v7332_v32 }
 0x202   : > { %7326 = vst [vmem:[#allocation74_spill] sm:$0xff] %v5233_v58  ;;  %v1616_v36 = vmul.f32 %v5229_v51, %v5233_v58  ;;  %vm1347_vm9 = vcmp.eq.s32.totalorder %v4969_v11, %v1290_v21  ;;  %v1690_v30 = vadd.f32 %v1618_v20, %v1617_v13  ;;  %vm1346_vm11 = vcmp.eq.s32.totalorder %v4972_v5, %v1290_v21 }
 0x203   : > { %vm1348_vm12 = vcmp.eq.s32.totalorder %v4975_v15, %v1290_v21  ;;  %v5261_v16 = vsel %vm1347_vm9, 1.0, %v7332_v32  ;;  %7334 = vst [vmem:[#allocation81_spill] sm:$0xff] %v5264_v33  ;;  %v5271_v13 = vsel %vm1346_vm11, 1.0, %v7332_v32  ;;  %vm1349_vm14 = vcmp.eq.s32.totalorder %v4983_v28, %v1290_v21 }
 0x204   : > { %v1687_v6 = vadd.f32 %v1686_v1, %v1616_v36  ;;  %v1071_v12 = vpop.f32.mrf.mxu1  ;;  %7333 = vst [vmem:[#allocation80_spill] sm:$0xff] %v5261_v16  ;;  %v1691_v8 = vadd.f32 %v1690_v30, %v1619_v59  ;;  %v5274_v20 = vsel %vm1348_vm12, 1.0, %v7332_v32  ;;  %v1621_v19 = vmul.f32 %v5271_v13, %v4926_v23 }
 0x205   : > { %7336 = vst [vmem:[#allocation83_spill] sm:$0xff] %v5271_v13 }
 0x206   : > { %1688 = vadd.xlane.f32.xlu2 %v1687_v6  ;;  %v5266_v6 = vadd.f32 %v1118_v63, %v1069_v43  ;;  %7337 = vst [vmem:[#allocation84_spill] sm:$0xff] %v5274_v20 }
 0x207   : > { %v1213_v49 = vpop.f32.mrf.mxu2 }
 0x208   : > { %v1120_v47 = vpop.f32.mrf.mxu3  ;;  %v5258_v1 = vadd.f32 %v1213_v49, %v1164_v54  ;;  %v1167_v36 = vpop.f32.mrf.mxu0  ;;  %7335 = vst [vmem:[#allocation82_spill] sm:$0xff] %v5266_v6  ;;  %v1622_v54 = vmul.f32 %v5261_v16, %v4933_v29  ;;  %v1623_v43 = vmul.f32 %v5274_v20, %v5266_v6  ;;  %v5289_v29 = vsel %vm1351_vm13, 1.0, %v7332_v32 }
 0x209   : > { %7339 = vst [vmem:[#allocation86_spill] sm:$0xff] %v5289_v29  ;;  %v5292_v16 = vsel %vm1349_vm14, 1.0, %v7332_v32  ;;  %v1296_v20 = vpop.permute.xlu0 %1295 }
 0x20a   : > { %7331 = vst [vmem:[#allocation79_spill] sm:$0xff] %v5258_v1  ;;  %v1620_v57 = vmul.f32 %v5264_v33, %v5258_v1  ;;  %v1695_v63 = vadd.f32 %v1622_v54, %v1621_v19  ;;  %v5299_v54 = vsel %vm1350_vm15, 1.0, %v7332_v32  ;;  %vm1355_vm1 = vcmp.eq.s32.totalorder %v4969_v11, %v1296_v20 }
 0x20b   : > { %7340 = vst [vmem:[#allocation87_spill] sm:$0xff] %v5292_v16  ;;  %v1625_v13 = vmul.f32 %v5299_v54, %v4936_v40  ;;  %vm1354_vm3 = vcmp.eq.s32.totalorder %v4972_v5, %v1296_v20  ;;  %vm1356_vm4 = vcmp.eq.s32.totalorder %v4975_v15, %v1296_v20  ;;  %vm1357_vm6 = vcmp.eq.s32.totalorder %v4983_v28, %v1296_v20 }
 0x20c   : > { %v1692_v49 = vadd.f32 %v1691_v8, %v1620_v57  ;;  %v1074_v59 = vpop.f32.mrf.mxu1  ;;  %v1696_v21 = vadd.f32 %v1695_v63, %v1623_v43  ;;  %7342 = vst [vmem:[#allocation89_spill] sm:$0xff] %v5299_v54  ;;  %v4241_v54 = vld [vmem:[%s4564_s12 + $0x78] sm:$0xff] }
 0x20e   : > { %1693 = vadd.xlane.f32.xlu0 %v1692_v49  ;;  %v5294_v49 = vadd.f32 %v1120_v47, %v1071_v12 }
 0x20f   : > { %v1216_v30 = vpop.f32.mrf.mxu2 }
 0x210   : > { %v5286_v8 = vadd.f32 %v1216_v30, %v1167_v36  ;;  %v1169_v57 = vpop.f32.mrf.mxu0  ;;  %v1123_v23 = vpop.f32.mrf.mxu3  ;;  %7341 = vst [vmem:[#allocation88_spill] sm:$0xff] %v5294_v49  ;;  %v5302_v36 = vsel %vm1352_vm0, 1.0, %v7332_v32  ;;  %v1626_v30 = vmul.f32 %v5289_v29, %v4938_v52  ;;  %v5332_v29 = vsel %vm1356_vm4, 1.0, %v7332_v32 }
 0x211   : > { %7343 = vst [vmem:[#allocation90_spill] sm:$0xff] %v5302_v36  ;;  %v1627_v12 = vmul.f32 %v5302_v36, %v5294_v49  ;;  %v5321_v40 = vadd.f32 %v1123_v23, %v1074_v59  ;;  %v1299_v36 = vpop.permute.xlu1 %1298 }
 0x212   : > { %7338 = vst [vmem:[#allocation85_spill] sm:$0xff] %v5286_v8  ;;  %v1624_v19 = vmul.f32 %v5292_v16, %v5286_v8  ;;  %v1700_v43 = vadd.f32 %v1626_v30, %v1625_v13  ;;  %v5327_v30 = vsel %vm1354_vm3, 1.0, %v7332_v32  ;;  %vm1359_vm5 = vcmp.eq.s32.totalorder %v4969_v11, %v1299_v36 }
 0x213   : > { %7347 = vst [vmem:[#allocation94_spill] sm:$0xff] %v5321_v40  ;;  %v1629_v23 = vmul.f32 %v5327_v30, %v4940_v41  ;;  %v1631_v59 = vmul.f32 %v5332_v29, %v5321_v40  ;;  %vm1358_vm7 = vcmp.eq.s32.totalorder %v4972_v5, %v1299_v36  ;;  %vm1360_vm8 = vcmp.eq.s32.totalorder %v4975_v15, %v1299_v36 }
 0x214   : > { %v1697_v6 = vadd.f32 %v1696_v21, %v1624_v19  ;;  %v5316_v19 = vsel %vm1355_vm1, 1.0, %v7332_v32  ;;  %v5319_v21 = vsel %vm1353_vm2, 1.0, %v7332_v32  ;;  %v1701_v13 = vadd.f32 %v1700_v43, %v1627_v12  ;;  %7348 = vst [vmem:[#allocation95_spill] sm:$0xff] %v5327_v30  ;;  %v4240_v30 = vld [vmem:[%s4564_s12 + $0x58] sm:$0xff] }
 0x215   : > { %7345 = vst [vmem:[#allocation92_spill] sm:$0xff] %v5316_v19  ;;  %vm1361_vm10 = vcmp.eq.s32.totalorder %v4983_v28, %v1299_v36 }
 0x216   : > { %1698 = vadd.xlane.f32.xlu1 %v1697_v6  ;;  %7346 = vst [vmem:[#allocation93_spill] sm:$0xff] %v5319_v21  ;;  %v1076_v6 = vpop.f32.mrf.mxu1 }
 0x217   : > { %v1218_v47 = vpop.f32.mrf.mxu2  ;;  %7349 = vst [vmem:[#allocation96_spill] sm:$0xff] %v5332_v29  ;;  %v1302_v29 = vpop.permute.xlu2 %1301 }
 0x218   : > { %v5313_v63 = vadd.f32 %v1218_v47, %v1169_v57  ;;  %v1172_v52 = vpop.f32.mrf.mxu0  ;;  %v1125_v57 = vpop.f32.mrf.mxu3  ;;  %v1630_v47 = vmul.f32 %v5316_v19, %v4947_v26  ;;  %v5347_v26 = vsel %vm1357_vm6, 1.0, %v7332_v32  ;;  %v5360_v19 = vsel %vm1360_vm8, 1.0, %v7332_v32 }
 0x219   : > { %7352 = vst [vmem:[#allocation99_spill] sm:$0xff] %v5347_v26  ;;  %v5349_v41 = vadd.f32 %v1125_v57, %v1076_v6  ;;  %vm1363_vm9 = vcmp.eq.s32.totalorder %v4969_v11, %v1302_v29  ;;  %vm1362_vm11 = vcmp.eq.s32.totalorder %v4972_v5, %v1302_v29  ;;  %vm1364_vm12 = vcmp.eq.s32.totalorder %v4975_v15, %v1302_v29 }
 0x21a   : > { %7344 = vst [vmem:[#allocation91_spill] sm:$0xff] %v5313_v63  ;;  %v1628_v50 = vmul.f32 %v5319_v21, %v5313_v63  ;;  %v1705_v43 = vadd.f32 %v1630_v47, %v1629_v23  ;;  %v5355_v47 = vsel %vm1358_vm7, 1.0, %v7332_v32  ;;  %vm1365_vm14 = vcmp.eq.s32.totalorder %v4983_v28, %v1302_v29 }
 0x21b   : > { %7353 = vst [vmem:[#allocation100_spill] sm:$0xff] %v5349_v41  ;;  %v1633_v57 = vmul.f32 %v5355_v47, %v4950_v48 }
 0x21c   : > { %v1702_v49 = vadd.f32 %v1701_v13, %v1628_v50  ;;  %v5344_v13 = vsel %vm1359_vm5, 1.0, %v7332_v32  ;;  %v1706_v20 = vadd.f32 %v1705_v43, %v1631_v59  ;;  %7354 = vst [vmem:[#allocation101_spill] sm:$0xff] %v5355_v47  ;;  %v1635_v59 = vmul.f32 %v5360_v19, %v5349_v41  ;;  %v4237_v47 = vld [vmem:[%s4564_s12 + $0x40] sm:$0xff] }
 0x21d   : > { %7351 = vst [vmem:[#allocation98_spill] sm:$0xff] %v5344_v13  ;;  %v5388_v41 = vsel %vm1364_vm12, 1.0, %v7332_v32 }
 0x21e   : > { %1703 = vadd.xlane.f32.xlu2 %v1702_v49  ;;  %7355 = vst [vmem:[#allocation102_spill] sm:$0xff] %v5360_v19 }
 0x21f   : > { %v1221_v12 = vpop.f32.mrf.mxu2  ;;  %7361 = vst [vmem:[#allocation108_spill] sm:$0xff] %v5388_v41 }
 0x220   : > { %v5341_v50 = vadd.f32 %v1221_v12, %v1172_v52  ;;  %v1174_v23 = vpop.f32.mrf.mxu0  ;;  %v1634_v52 = vmul.f32 %v5344_v13, %v4952_v56  ;;  %v1079_v12 = vpop.f32.mrf.mxu1  ;;  %v4236_v13 = vld [vmem:[%s4564_s12 + $0x50] sm:$0xff] }
 0x221   : > { %v1128_v6 = vpop.f32.mrf.mxu3 }
 0x222   : > { %7350 = vst [vmem:[#allocation97_spill] sm:$0xff] %v5341_v50  ;;  %v1632_v49 = vmul.f32 %v5347_v26, %v5341_v50  ;;  %v1710_v56 = vadd.f32 %v1634_v52, %v1633_v57  ;;  %v5375_v50 = vsel %vm1361_vm10, 1.0, %v7332_v32  ;;  %v5377_v48 = vadd.f32 %v1128_v6, %v1079_v12  ;;  %v4238_v26 = vld [vmem:[%s4564_s12 + $0x60] sm:$0xff] }
 0x223   : > { %7358 = vst [vmem:[#allocation105_spill] sm:$0xff] %v5375_v50  ;;  %v5383_v52 = vsel %vm1362_vm11, 1.0, %v7332_v32 }
 0x224   : > { %v1707_v40 = vadd.f32 %v1706_v20, %v1632_v49  ;;  %v5372_v20 = vsel %vm1363_vm9, 1.0, %v7332_v32  ;;  %7359 = vst [vmem:[#allocation106_spill] sm:$0xff] %v5377_v48  ;;  %v1711_v36 = vadd.f32 %v1710_v56, %v1635_v59  ;;  %v1637_v12 = vmul.f32 %v5383_v52, %v4954_v53 }
 0x225   : > { %7357 = vst [vmem:[#allocation104_spill] sm:$0xff] %v5372_v20  ;;  %v1639_v56 = vmul.f32 %v5388_v41, %v5377_v48  ;;  %v5403_v53 = vsel %vm1365_vm14, 1.0, %v7332_v32  ;;  %v4234_v41 = vld [vmem:[%s4564_s12 + $0x28] sm:$0xff] }
 0x226   : > { %1708 = vadd.xlane.f32.xlu0 %v1707_v40  ;;  %7360 = vst [vmem:[#allocation107_spill] sm:$0xff] %v5383_v52 }
 0x227   : > { %v1223_v43 = vpop.f32.mrf.mxu2  ;;  %7364 = vst [vmem:[#allocation111_spill] sm:$0xff] %v5403_v53 }
 0x228   : > { %v5369_v49 = vadd.f32 %v1223_v43, %v1174_v23  ;;  %v1638_v23 = vmul.f32 %v5372_v20, %v4960_v3  ;;  %v1305_v43 = vpop.permute.xlu0 %1304  ;;  %v1177_v19 = vpop.f32.mrf.mxu0 }
 0x229   : > { %vm1367_vm13 = vcmp.eq.s32.totalorder %v4969_v11, %v1305_v43  ;;  %v1081_v6 = vpop.f32.mrf.mxu1  ;;  %v1130_v59 = vpop.f32.mrf.mxu3  ;;  %vm1366_vm15 = vcmp.eq.s32.totalorder %v4972_v5, %v1305_v43  ;;  %vm1368_vm0 = vcmp.eq.s32.totalorder %v4975_v15, %v1305_v43  ;;  %vm1369_vm1 = vcmp.eq.s32.totalorder %v4983_v28, %v1305_v43 }
 0x22a   : > { %7356 = vst [vmem:[#allocation103_spill] sm:$0xff] %v5369_v49  ;;  %v1636_v40 = vmul.f32 %v5375_v50, %v5369_v49  ;;  %v5400_v20 = vsel %vm1367_vm13, 1.0, %v7332_v32  ;;  %v5405_v52 = vadd.f32 %v1130_v59, %v1081_v6 }
 0x22b   : > { %7363 = vst [vmem:[#allocation110_spill] sm:$0xff] %v5400_v20 }
 0x22c   : > { %v1712_v57 = vadd.f32 %v1711_v36, %v1636_v40  ;;  %v1715_v40 = vadd.f32 %v1638_v23, %v1637_v12  ;;  %7365 = vst [vmem:[#allocation112_spill] sm:$0xff] %v5405_v52  ;;  %v5411_v23 = vsel %vm1366_vm15, 1.0, %v7332_v32  ;;  %v5416_v12 = vsel %vm1368_vm0, 1.0, %v7332_v32 }
 0x22d   : > { %7366 = vst [vmem:[#allocation113_spill] sm:$0xff] %v5411_v23  ;;  %v1641_v6 = vmul.f32 %v5411_v23, %v4966_v10  ;;  %v1643_v59 = vmul.f32 %v5416_v12, %v5405_v52  ;;  %v4227_v10 = vld [vmem:[%s4564_s12] sm:$0xff] }
 0x22e   : > { %1713 = vadd.xlane.f32.xlu1 %v1712_v57  ;;  %v1716_v57 = vadd.f32 %v1715_v40, %v1639_v56  ;;  %7367 = vst [vmem:[#allocation114_spill] sm:$0xff] %v5416_v12  ;;  %vm1498_vm2 = vcmp.ge.s32.totalorder %v4227_v10, %v4964_v60 }
 0x22f   : > { %v1226_v3 = vpop.f32.mrf.mxu2 }
 0x230   : > { %v5397_v36 = vadd.f32 %v1226_v3, %v1177_v19  ;;  %v1642_v3 = vmul.f32 %v5400_v20, %v4980_v14  ;;  %v1179_v56 = vpop.f32.mrf.mxu0 }
 0x232   : > { %7362 = vst [vmem:[#allocation109_spill] sm:$0xff] %v5397_v36  ;;  %v1640_v29 = vmul.f32 %v5403_v53, %v5397_v36  ;;  %v1720_v36 = vadd.f32 %v1642_v3, %v1641_v6  ;;  %v5436_v6 = vstv %s3952_s26 }
 0x233   : > { %vm1517_vm3 = vcmp.lt.s32.totalorder %v4227_v10, %v5436_v6 }
 0x234   : > { %v1717_v19 = vadd.f32 %v1716_v57, %v1640_v29  ;;  %v5426_v29 = vsel %vm1369_vm1, 1.0, %v7332_v32  ;;  %v1721_v52 = vadd.f32 %v1720_v36, %v1643_v59  ;;  %v4228_v36 = vld [vmem:[%s4564_s12 + $0x8] sm:$0xff]  ;;  %vm1533_vm6 = vmand %vm1498_vm2, %vm1517_vm3  ;;  %v4230_v59 = vld [vmem:[%s4564_s12 + $0x18] sm:$0xff] }
 0x235   : > { %7369 = vst [vmem:[#allocation116_spill] sm:$0xff] %v5426_v29  ;;  %vm1499_vm4 = vcmp.ge.s32.totalorder %v4228_v36, %v4964_v60  ;;  %vm1518_vm5 = vcmp.lt.s32.totalorder %v4228_v36, %v5436_v6  ;;  %vm1501_vm10 = vcmp.ge.s32.totalorder %v4230_v59, %v4964_v60  ;;  %vm1520_vm11 = vcmp.lt.s32.totalorder %v4230_v59, %v5436_v6 }
 0x236   : > { %1718 = vadd.xlane.f32.xlu2 %v1717_v19  ;;  %vm1534_vm9 = vmand %vm1499_vm4, %vm1518_vm5  ;;  %v5465_v36 = vsel %vm1533_vm6, 1.0, %v7332_v32  ;;  %vm1503_vm5 = vcmp.ge.s32.totalorder %v4234_v41, %v4964_v60  ;;  %vm1522_vm6 = vcmp.lt.s32.totalorder %v4234_v41, %v5436_v6 }
 0x237   : > { %v1228_v40 = vpop.f32.mrf.mxu2  ;;  %vm5473_vm1 = vmand %vm1501_vm10, %vm1520_vm11  ;;  %vm1508_vm11 = vcmp.ge.s32.totalorder %v4236_v13, %v4964_v60 }
 0x238   : > { %v5423_v48 = vadd.f32 %v1228_v40, %v1179_v56  ;;  %v5516_v50 = vsel %vm5473_vm1, 1.0, %v7332_v32  ;;  %vm1510_vm1 = vcmp.ge.s32.totalorder %v4238_v26, %v4964_v60 }
 0x239   : > { %v5428_v57 = vpop.xlane.xlu1 %1648 }
 0x23a   : > { %7368 = vst [vmem:[#allocation115_spill] sm:$0xff] %v5423_v48  ;;  %v1644_v14 = vmul.f32 %v5426_v29, %v5423_v48  ;;  %v1725_v19 = vmul.f32 %v5428_v57, %v5428_v57  ;;  %v4233_v29 = vld [vmem:[%s4564_s12 + $0x38] sm:$0xff]  ;;  %v1981_v41 = vmul.f32 0.9800666, %v5428_v57 }
 0x23b   : > { %vm1505_vm2 = vcmp.ge.s32.totalorder %v4233_v29, %v4964_v60  ;;  %vm1524_vm3 = vcmp.lt.s32.totalorder %v4233_v29, %v5436_v6 }
 0x23c   : > { %v1741_v43 = vsub.f32 1.0, %v1725_v19  ;;  %v1722_v3 = vadd.f32 %v1721_v52, %v1644_v14  ;;  %v4229_v52 = vld [vmem:[%s4564_s12 + $0x10] sm:$0xff]  ;;  %vm5522_vm10 = vmand %vm1505_vm2, %vm1524_vm3  ;;  %vm1529_vm2 = vcmp.lt.s32.totalorder %v4238_v26, %v5436_v6 }
 0x23d   : > { %vm1500_vm7 = vcmp.ge.s32.totalorder %v4229_v52, %v4964_v60  ;;  %vm1519_vm8 = vcmp.lt.s32.totalorder %v4229_v52, %v5436_v6  ;;  %v4232_v52 = vld [vmem:[%s4564_s12 + $0x20] sm:$0xff]  ;;  %v4242_v26 = vld [vmem:[%s4564_s12 + $0x70] sm:$0xff] }
 0x23e   : > { %v1757_v56 = vmax.f32 %v1741_v43, 0.0  ;;  %1723 = vadd.xlane.f32.xlu0 %v1722_v3  ;;  %vm5457_vm12 = vmand %vm1500_vm7, %vm1519_vm8  ;;  %v4231_v43 = vld [vmem:[%s4564_s12 + $0x30] sm:$0xff]  ;;  %vm1502_vm15 = vcmp.ge.s32.totalorder %v4232_v52, %v4964_v60  ;;  %vm1521_vm0 = vcmp.lt.s32.totalorder %v4232_v52, %v5436_v6 }
 0x23f   : > { %vm1504_vm13 = vcmp.ge.s32.totalorder %v4231_v43, %v4964_v60  ;;  %vm1523_vm14 = vcmp.lt.s32.totalorder %v4231_v43, %v5436_v6  ;;  %v5488_v23 = vsel %vm5457_vm12, 1.0, %v7332_v32  ;;  %vm5505_vm7 = vmand %vm1502_vm15, %vm1521_vm0  ;;  %v4235_v43 = vld [vmem:[%s4564_s12 + $0x48] sm:$0xff]  ;;  %vm1527_vm12 = vcmp.lt.s32.totalorder %v4236_v13, %v5436_v6 }
 0x240   : > { %v5438_v40 = vmin.f32 %v1757_v56, 1.0  ;;  %vm5494_vm4 = vmand %vm1504_vm13, %vm1523_vm14  ;;  %vm1507_vm8 = vcmp.ge.s32.totalorder %v4235_v43, %v4964_v60  ;;  %vm1506_vm14 = vcmp.ge.s32.totalorder %v4237_v47, %v4964_v60  ;;  %vm1525_vm15 = vcmp.lt.s32.totalorder %v4237_v47, %v5436_v6 }
 0x241   : > { %v5443_v48 = vpop.xlane.xlu2 %1653  ;;  %v5532_v59 = vsel %vm5494_vm4, 1.0, %v7332_v32  ;;  %vm5538_vm13 = vmand %vm1503_vm5, %vm1522_vm6  ;;  %v5548_v53 = vsel %vm5505_vm7, 1.0, %v7332_v32  ;;  %vm1509_vm7 = vcmp.ge.s32.totalorder %v4240_v30, %v4964_v60 }
 0x242   : > { %4035 = vrsqrt.f32 %v5438_v40  ;;  %v1726_v14 = vmul.f32 %v5443_v48, %v5443_v48  ;;  %vm5570_vm3 = vmand %vm1508_vm11, %vm1527_vm12  ;;  %v5580_v52 = vsel %vm5538_vm13, 1.0, %v7332_v32  ;;  %vm1532_vm11 = vcmp.lt.s32.totalorder %v4241_v54, %v5436_v6 }
 0x243   : > { %vm5586_vm6 = vmand %vm1506_vm14, %vm1525_vm15  ;;  %vm1512_vm13 = vcmp.ge.s32.totalorder %v4242_v26, %v4964_v60  ;;  %vm1531_vm14 = vcmp.lt.s32.totalorder %v4242_v26, %v5436_v6 }
 0x244   : > { %v1742_v10 = vsub.f32 1.0, %v1726_v14  ;;  %v5468_v14 = vsel %vm1534_vm9, 1.0, %v7332_v32  ;;  %vm1526_vm9 = vcmp.lt.s32.totalorder %v4235_v43, %v5436_v6  ;;  %v4239_v43 = vld [vmem:[%s4564_s12 + $0x68] sm:$0xff] }
 0x245   : > { %vm5554_vm0 = vmand %vm1507_vm8, %vm1526_vm9  ;;  %vm1511_vm4 = vcmp.ge.s32.totalorder %v4239_v43, %v4964_v60  ;;  %vm1530_vm5 = vcmp.lt.s32.totalorder %v4239_v43, %v5436_v6  ;;  %vm1528_vm8 = vcmp.lt.s32.totalorder %v4240_v30, %v5436_v6  ;;  %v5634_v43 = vsel %vm5586_vm6, 1.0, %v7332_v32 }
 0x246   : > { %v1758_v3 = vmax.f32 %v1742_v10, 0.0  ;;  %v5598_v29 = vsel %vm5554_vm0, 1.0, %v7332_v32  ;;  %vm5604_vm9 = vmand %vm1510_vm1, %vm1529_vm2  ;;  %vm1796_vm1 = vcmp.eq.f32.partialorder %v5438_v40, inf  ;;  %v1799_v30 = vand.u32 2147483648, %v5438_v40 }
 0x247   : > { %vm5617_vm12 = vmand %vm1511_vm4, %vm1530_vm5  ;;  %v5646_v19 = vsel %vm5604_vm9, 1.0, %v7332_v32  ;;  %vm2993_vm4 = vcmask 7168  }
 0x248   : > { %v4036_v56 = vpop.eup %4035  ;;  %v5481_v12 = vmin.f32 %v1758_v3, 1.0  ;;  %vm1544_vm15 = vmand %vm1509_vm7, %vm1528_vm8  ;;  %7393 = vst [vmem:[#allocation118_spill] sm:$0xff] %v5646_v19  ;;  %v3845_v19 = vadd.f32 0.9800666, %v5428_v57 }
 0x249   : > { %v1790_v10 = vmul.f32 %v4036_v56, %v5438_v40  ;;  %v5483_v20 = vpop.xlane.xlu0 %1658  ;;  %vm1547_vm2 = vmand %vm1512_vm13, %vm1531_vm14  ;;  %vm2366_vm13 = vcmp.lt.s32.totalorder %v4969_v11, 1000  ;;  %vm2367_vm14 = vcmp.lt.s32.totalorder %v4975_v15, 1000 }
 0x24a   : > { %v1727_v3 = vmul.f32 %v5483_v20, %v5483_v20  ;;  %4037 = vrsqrt.f32 %v5481_v12  ;;  %vm2045_vm5 = vcmp.gt.f32.partialorder %v3845_v19, 0.0  ;;  %v3026_v19 = vld [vmem:[#allocation4] sm:$0xff]  ;;  %vm1808_vm7 = vcmp.eq.f32.partialorder %v5481_v12, inf }
 0x24b   : > { %v1791_v49 = vmul.f32 %v4036_v56, %v1790_v10  ;;  %vm1810_vm8 = vcmp.eq.f32.partialorder %v5481_v12, 0.0 }
 0x24c   : > { %v1743_v10 = vsub.f32 1.0, %v1727_v3 }
 0x24d   : > { %v1792_v3 = vmul.f32 0.5, %v1791_v49  ;;  %v5564_v49 = vsel %vm5522_vm10, 1.0, %v7332_v32  ;;  %vm1513_vm10 = vcmp.ge.s32.totalorder %v4241_v54, %v4964_v60  ;;  %v5664_v54 = vsel %vm1544_vm15, 1.0, %v7332_v32 }
 0x24e   : > { %v1759_v63 = vmax.f32 %v1743_v10, 0.0  ;;  %vm1548_vm0 = vmand %vm1513_vm10, %vm1532_vm11  ;;  %7395 = vst [vmem:[#allocation120_spill] sm:$0xff] %v5664_v54 }
 0x24f   : > { %v1793_v10 = vsub.f32 1.5, %v1792_v3  ;;  %v5668_v58 = vsel %vm1548_vm0, 1.0, %v7332_v32  ;;  %vm2368_vm0 = vcmp.lt.s32.totalorder %v4983_v28, 1000 }
 0x250   : > { %v5593_v3 = vmin.f32 %v1759_v63, 1.0  ;;  %v4038_v21 = vpop.eup %4037  ;;  %7396 = vst [vmem:[#allocation121_spill] sm:$0xff] %v5668_v58 }
 0x251   : > { %v1794_v63 = vmul.f32 %v4036_v56, %v1793_v10  ;;  %v5611_v8 = vpop.xlane.xlu2 %1663  ;;  %v1802_v16 = vmul.f32 %v4038_v21, %v5481_v12  ;;  %v5629_v56 = vsel %vm5570_vm3, 1.0, %v7332_v32  ;;  %vm1798_vm3 = vcmp.eq.f32.partialorder %v5438_v40, 0.0 }
 0x252   : > { %4039 = vrsqrt.f32 %v5593_v3  ;;  %7392 = vst [vmem:[#allocation117_spill] sm:$0xff] %v5629_v56  ;;  %v1728_v1 = vmul.f32 %v5611_v8, %v5611_v8  ;;  %vm1820_vm9 = vcmp.eq.f32.partialorder %v5593_v3, inf  ;;  %vm1822_vm10 = vcmp.eq.f32.partialorder %v5593_v3, 0.0 }
 0x253   : > { %v1795_v10 = vmul.f32 %v1794_v63, %v5438_v40  ;;  %v1803_v13 = vmul.f32 %v4038_v21, %v1802_v16  ;;  %v5657_v63 = vsel %vm5617_vm12, 1.0, %v7332_v32  ;;  %vm2365_vm12 = vcmp.lt.s32.totalorder %v4972_v5, 1000 }
 0x254   : > { %7394 = vst [vmem:[#allocation119_spill] sm:$0xff] %v5657_v63  ;;  %v1744_v6 = vsub.f32 1.0, %v1728_v1 }
 0x255   : > { %v1797_v47 = vsel %vm1796_vm1, %v5438_v40, %v1795_v10  ;;  %v1804_v16 = vmul.f32 0.5, %v1803_v13  ;;  %v5672_v10 = vsel %vm1547_vm2, 1.0, %v7332_v32  ;;  %v3846_v40 = vadd.f32 0.9800666, %v5443_v48 }
 0x256   : > { %v1800_v33 = vsel %vm1798_vm3, %v1799_v30, %v1797_v47  ;;  %v1760_v60 = vmax.f32 %v1744_v6, 0.0  ;;  %7397 = vst [vmem:[#allocation122_spill] sm:$0xff] %v5672_v10  ;;  %v3861_v30 = vadd.f32 -0.039733864, %v5428_v57  ;;  %v1982_v6 = vmul.f32 0.9800666, %v5443_v48 }
 0x257   : > { %v1997_v63 = vmul.f32 0.19866933, %v1800_v33  ;;  %v1805_v1 = vsub.f32 1.5, %v1804_v16  ;;  %v3862_v16 = vadd.f32 -0.039733864, %v5443_v48  ;;  %vm2046_vm6 = vcmp.gt.f32.partialorder %v3846_v40, 0.0 }
 0x258   : > { %v4040_v26 = vpop.eup %4039  ;;  %v5677_v47 = vmin.f32 %v1760_v60, 1.0  ;;  %v5688_v60 = vmul.f32 0.9800666, %v5483_v20 }
 0x259   : > { %v2013_v51 = vsub.f32 %v1981_v41, %v1997_v63  ;;  %v1814_v13 = vmul.f32 %v4040_v26, %v5593_v3  ;;  %v5679_v58 = vpop.xlane.xlu1 %1668  ;;  %v1806_v33 = vmul.f32 %v4038_v21, %v1805_v1  ;;  %v1811_v21 = vand.u32 2147483648, %v5481_v12 }
 0x25a   : > { %v1729_v32 = vmul.f32 %v5679_v58, %v5679_v58  ;;  %4041 = vrsqrt.f32 %v5677_v47  ;;  %vm1832_vm15 = vcmp.eq.f32.partialorder %v5677_v47, inf  ;;  %vm1834_vm1 = vcmp.eq.f32.partialorder %v5677_v47, 0.0 }
 0x25b   : > { %v2077_v10 = vsel %vm2045_vm5, %v2013_v51, %v3861_v30  ;;  %v1815_v61 = vmul.f32 %v4040_v26, %v1814_v13  ;;  %v1807_v41 = vmul.f32 %v1806_v33, %v5481_v12  ;;  %v5696_v13 = vadd.f32 0.9800666, %v5483_v20 }
 0x25c   : > { %v3042_v63 = vmul.f32 30.0, %v2077_v10  ;;  %v1745_v54 = vsub.f32 1.0, %v1729_v32  ;;  %v2093_v33 = vsub.f32 %v2077_v10, %v5428_v57 }
 0x25d   : > { %v1816_v1 = vmul.f32 0.5, %v1815_v61  ;;  %v1809_v30 = vsel %vm1808_vm7, %v5481_v12, %v1807_v41  ;;  %v3863_v61 = vadd.f32 -0.039733864, %v5483_v20  ;;  %v1823_v12 = vand.u32 2147483648, %v5593_v3 }
 0x25e   : > { %v3058_v51 = vmul.f32 %v5465_v36, %v3042_v63  ;;  %v1812_v46 = vsel %vm1810_vm8, %v1811_v21, %v1809_v30  ;;  %v1761_v56 = vmax.f32 %v1745_v54, 0.0  ;;  %vm2047_vm11 = vcmp.gt.f32.partialorder %v5696_v13, 0.0 }
 0x25f   : > { %v1817_v2 = vsub.f32 1.5, %v1816_v1  ;;  %v1998_v9 = vmul.f32 0.19866933, %v1812_v46  ;;  %v5711_v54 = vmul.f32 0.9800666, %v5611_v8  ;;  %v2112_v30 = vmul.f32 %v5005_v55, %v2093_v33 }
 0x260   : > { %v3074_v38 = vadd.f32 %v3058_v51, %v3026_v19  ;;  %v4042_v32 = vpop.eup %4041  ;;  %v5703_v63 = vmin.f32 %v1761_v56, 1.0  ;;  %v5717_v56 = vadd.f32 0.9800666, %v5611_v8  ;;  %v2109_v19 = vmul.f32 %v4991_v37, %v2093_v33 }
 0x261   : > { %v1818_v36 = vmul.f32 %v4040_v26, %v1817_v2  ;;  %v5705_v41 = vpop.xlane.xlu2 %1673  ;;  %v2014_v57 = vsub.f32 %v1982_v6, %v1998_v9  ;;  %v1826_v46 = vmul.f32 %v4042_v32, %v5677_v47  ;;  %v2110_v51 = vmul.f32 %v4986_v34, %v2093_v33 }
 0x262   : > { %3090 = vst.msk [vmem:[#allocation4] sm:$0xff] %vm2993_vm4, %v3074_v38  ;;  %v1730_v2 = vmul.f32 %v5705_v41, %v5705_v41  ;;  %4043 = vrsqrt.f32 %v5703_v63  ;;  %v2111_v38 = vmul.f32 %v4994_v39, %v2093_v33  ;;  %v3027_v39 = vld [vmem:[#allocation4 + $0x8] sm:$0xff]  ;;  %v5740_v34 = vmul.f32 0.9800666, %v5679_v58 }
 0x263   : > { %v1819_v26 = vmul.f32 %v1818_v36, %v5593_v3  ;;  %v5722_v9 = vsel %vm2046_vm6, %v2014_v57, %v3862_v16  ;;  %v1827_v10 = vmul.f32 %v4042_v32, %v1826_v46  ;;  %v5735_v36 = vadd.f32 -0.039733864, %v5611_v8 }
 0x264   : > { %v1746_v6 = vsub.f32 1.0, %v1730_v2  ;;  %v3043_v21 = vmul.f32 30.0, %v5722_v9  ;;  %v2175_v55 = vadd.f32 %v2111_v38, %v4988_v35  ;;  %v5744_v2 = vadd.f32 0.9800666, %v5679_v58 }
 0x265   : > { %v1821_v1 = vsel %vm1820_vm9, %v5593_v3, %v1819_v26  ;;  %v1828_v16 = vmul.f32 0.5, %v1827_v10  ;;  %v2176_v35 = vadd.f32 %v2112_v30, %v5009_v44  ;;  %vm2048_vm2 = vcmp.gt.f32.partialorder %v5717_v56, 0.0  ;;  %v3028_v30 = vld [vmem:[#allocation4 + $0x10] sm:$0xff] }
 0x266   : > { %v1824_v40 = vsel %vm1822_vm10, %v1823_v12, %v1821_v1  ;;  %v1762_v37 = vmax.f32 %v1746_v6, 0.0  ;;  %v3059_v57 = vmul.f32 %v5468_v14, %v3043_v21  ;;  %v2173_v12 = vadd.f32 %v2109_v19, %v4856_v18 }
 0x267   : > { %v1999_v46 = vmul.f32 0.19866933, %v1824_v40  ;;  %v1829_v33 = vsub.f32 1.5, %v1828_v16  ;;  %v2174_v21 = vadd.f32 %v2110_v51, %v4863_v22  ;;  %v2239_v44 = vmul.f32 30.0, %v2175_v55 }
 0x268   : > { %v5746_v3 = vmin.f32 %v1762_v37, 1.0  ;;  %v4044_v26 = vpop.eup %4043  ;;  %v3075_v10 = vadd.f32 %v3059_v57, %v3027_v39  ;;  %v2237_v51 = vmul.f32 30.0, %v2173_v12  ;;  %v1835_v39 = vand.u32 2147483648, %v5677_v47 }
 0x269   : > { %v2015_v14 = vsub.f32 %v5688_v60, %v1999_v46  ;;  %v5751_v6 = vpop.xlane.xlu0 %1678  ;;  %v1830_v38 = vmul.f32 %v4042_v32, %v1829_v33  ;;  %v1838_v1 = vmul.f32 %v4044_v26, %v5703_v63  ;;  %v2240_v40 = vmul.f32 30.0, %v2176_v35 }
 0x26a   : > { %4045 = vrsqrt.f32 %v5746_v3  ;;  %3091 = vst.msk [vmem:[#allocation4 + $0x8] sm:$0xff] %vm2993_vm4, %v3075_v10  ;;  %v1731_v22 = vmul.f32 %v5751_v6, %v5751_v6  ;;  %v5776_v46 = vadd.f32 -0.039733864, %v5679_v58  ;;  %v5781_v33 = vmul.f32 0.9800666, %v5705_v41 }
 0x26b   : > { %v5762_v18 = vsel %vm2047_vm11, %v2015_v14, %v3863_v61  ;;  %v1831_v32 = vmul.f32 %v1830_v38, %v5677_v47  ;;  %v1839_v19 = vmul.f32 %v4044_v26, %v1838_v1  ;;  %v2238_v61 = vmul.f32 30.0, %v2174_v21 }
 0x26c   : > { %v3044_v60 = vmul.f32 30.0, %v5762_v18  ;;  %v1747_v13 = vsub.f32 1.0, %v1731_v22  ;;  %v2302_v10 = vpack.c.bf16 %v2240_v40, %v2239_v44  ;;  %v5785_v38 = vsel %vm2365_vm12, %v2237_v51, -inf }
 0x26d   : > { %v1833_v37 = vsel %vm1832_vm15, %v5677_v47, %v1831_v32  ;;  %v1840_v57 = vmul.f32 0.5, %v1839_v19  ;;  %vm1844_vm3 = vcmp.eq.f32.partialorder %v5703_v63, inf  ;;  %v5794_v47 = vsel %vm2366_vm13, %v2238_v61, -inf }
 0x26e   : > { %v3060_v16 = vmul.f32 %v5488_v23, %v3044_v60  ;;  %v1836_v55 = vsel %vm1834_vm1, %v1835_v39, %v1833_v37  ;;  %v1763_v12 = vmax.f32 %v1747_v13, 0.0  ;;  %2334 = vst [vmem:[%s4578_s27 + $0x8] sm:$0xff] %v2302_v10  ;;  %vm1846_vm5 = vcmp.eq.f32.partialorder %v5703_v63, 0.0 }
 0x26f   : > { %v2000_v23 = vmul.f32 0.19866933, %v1836_v55  ;;  %v1841_v35 = vsub.f32 1.5, %v1840_v57  ;;  %v2449_v19 = vmax.f32 %v5785_v38, %v5794_v47  ;;  %vm2049_vm6 = vcmp.gt.f32.partialorder %v5744_v2, 0.0 }
 0x270   : > { %v4046_v14 = vpop.eup %4045  ;;  %v3076_v21 = vadd.f32 %v3060_v16, %v3028_v30  ;;  %v5789_v22 = vmin.f32 %v1763_v12, 1.0  ;;  %v1847_v30 = vand.u32 2147483648, %v5703_v63  ;;  %v5806_v13 = vsel %vm2367_vm14, %v2239_v44, -inf }
 0x271   : > { %v1850_v1 = vmul.f32 %v4046_v14, %v5746_v3  ;;  %v2016_v60 = vsub.f32 %v5711_v54, %v2000_v23  ;;  %v1842_v32 = vmul.f32 %v4044_v26, %v1841_v35  ;;  %v5808_v16 = vpop.xlane.xlu1 %1683  ;;  %v2094_v54 = vsub.f32 %v5722_v9, %v5443_v48 }
 0x272   : > { %3092 = vst.msk [vmem:[#allocation4 + $0x10] sm:$0xff] %vm2993_vm4, %v3076_v21  ;;  %4047 = vrsqrt.f32 %v5789_v22  ;;  %v2450_v57 = vmax.f32 %v2449_v19, %v5806_v13  ;;  %v5822_v44 = vsel %vm2368_vm0, %v2240_v40, -inf  ;;  %v2301_v10 = vpack.c.bf16 %v2238_v61, %v2237_v51  ;;  %v3029_v21 = vld [vmem:[#allocation4 + $0x18] sm:$0xff] }
 0x273   : > { %v1851_v39 = vmul.f32 %v4046_v14, %v1850_v1  ;;  %v5815_v26 = vsel %vm2048_vm2, %v2016_v60, %v5735_v36  ;;  %v1843_v37 = vmul.f32 %v1842_v32, %v5703_v63  ;;  %v3850_v56 = vadd.f32 0.9800666, %v5705_v41 }
 0x274   : > { %v3045_v55 = vmul.f32 30.0, %v5815_v26  ;;  %v2451_v9 = vmax.f32 %v2450_v57, %v5822_v44  ;;  %v1732_v36 = vmul.f32 %v5808_v16, %v5808_v16  ;;  %v3866_v51 = vadd.f32 -0.039733864, %v5705_v41  ;;  %2333 = vst [vmem:[%s4578_s27] sm:$0xff] %v2301_v10 }
 0x275   : > { %v1852_v12 = vmul.f32 0.5, %v1851_v39  ;;  %v1845_v48 = vsel %vm1844_vm3, %v5703_v63, %v1843_v37  ;;  %vm1856_vm7 = vcmp.eq.f32.partialorder %v5746_v3, inf  ;;  %v2113_v60 = vmul.f32 %v5019_v7, %v2094_v54 }
 0x276   : > { %v3061_v23 = vmul.f32 %v5516_v50, %v3045_v55  ;;  %v1848_v35 = vsel %vm1846_vm5, %v1847_v30, %v1845_v48  ;;  %2452 = vmax.xlane.f32.xlu1 %v2451_v9  ;;  %v1748_v1 = vsub.f32 1.0, %v1732_v36  ;;  %v1859_v37 = vand.u32 2147483648, %v5746_v3  ;;  %v7398_v55 = vld [vmem:[#allocation39_spill] sm:$0xff]  ;;  %v7400_v48 = vld [vmem:[#allocation9_spill] sm:$0xff] }
 0x277   : > { %v1853_v40 = vsub.f32 1.5, %v1852_v12  ;;  %v2001_v61 = vmul.f32 0.19866933, %v1848_v35  ;;  %v2114_v50 = vmul.f32 %v5012_v62, %v2094_v54  ;;  %vm2050_vm8 = vcmp.gt.f32.partialorder %v3850_v56, 0.0  ;;  %v3031_v56 = vld [vmem:[#allocation4 + $0x28] sm:$0xff] }
 0x278   : > { %v4048_v32 = vpop.eup %4047  ;;  %v3077_v19 = vadd.f32 %v3061_v23, %v3029_v21  ;;  %v1764_v57 = vmax.f32 %v1748_v1, 0.0  ;;  %v2115_v12 = vmul.f32 %v7398_v55, %v2094_v54  ;;  %v2116_v7 = vmul.f32 %v5033_v4, %v2094_v54  ;;  %v7399_v21 = vld [vmem:[#allocation8_spill] sm:$0xff]  ;;  %v7401_v23 = vld [vmem:[#allocation38_spill] sm:$0xff] }
 0x279   : > { %v1854_v39 = vmul.f32 %v4046_v14, %v1853_v40  ;;  %v2017_v63 = vsub.f32 %v5740_v34, %v2001_v61  ;;  %v1862_v30 = vmul.f32 %v4048_v32, %v5789_v22  ;;  %v2177_v14 = vadd.f32 %v2113_v60, %v7399_v21  ;;  %v7402_v54 = vld [vmem:[#allocation40_spill] sm:$0xff] }
 0x27a   : > { %3093 = vst.msk [vmem:[#allocation4 + $0x18] sm:$0xff] %vm2993_vm4, %v3077_v19  ;;  %v2178_v9 = vadd.f32 %v2114_v50, %v7400_v48  ;;  %v5853_v36 = vmin.f32 %v1764_v57, 1.0  ;;  %v2179_v35 = vadd.f32 %v2115_v12, %v7401_v23  ;;  %vm1858_vm9 = vcmp.eq.f32.partialorder %v5746_v3, 0.0  ;;  %v5865_v19 = vpop.xlane.xlu2 %1688 }
 0x27b   : > { %v1855_v10 = vmul.f32 %v1854_v39, %v5746_v3  ;;  %v5851_v62 = vsel %vm2049_vm6, %v2017_v63, %v5776_v46  ;;  %v1863_v34 = vmul.f32 %v4048_v32, %v1862_v30  ;;  %v2180_v61 = vadd.f32 %v2116_v7, %v7402_v54  ;;  %v3030_v46 = vld [vmem:[#allocation4 + $0x20] sm:$0xff] }
 0x27c   : > { %v3046_v40 = vmul.f32 30.0, %v5851_v62  ;;  %v2095_v2 = vsub.f32 %v5762_v18, %v5483_v20  ;;  %4049 = vrsqrt.f32 %v5853_v36  ;;  %v1987_v63 = vmul.f32 0.9800666, %v5751_v6 }
 0x27d   : > { %v1857_v4 = vsel %vm1856_vm7, %v5746_v3, %v1855_v10  ;;  %v1864_v60 = vmul.f32 0.5, %v1863_v34  ;;  %v3851_v30 = vadd.f32 0.9800666, %v5751_v6  ;;  %v2241_v57 = vmul.f32 30.0, %v2177_v14 }
 0x27e   : > { %v1860_v1 = vsel %vm1858_vm9, %v1859_v37, %v1857_v4  ;;  %v3062_v39 = vmul.f32 %v5548_v53, %v3046_v40  ;;  %v2242_v55 = vmul.f32 30.0, %v2178_v9  ;;  %v2243_v12 = vmul.f32 30.0, %v2179_v35 }
 0x27f   : > { %v2002_v50 = vmul.f32 0.19866933, %v1860_v1  ;;  %v1865_v3 = vsub.f32 1.5, %v1864_v60  ;;  %v2244_v18 = vmul.f32 30.0, %v2180_v61  ;;  %v1733_v37 = vmul.f32 %v5865_v19, %v5865_v19 }
 0x280   : > { %v3078_v10 = vadd.f32 %v3062_v39, %v3030_v46  ;;  %v3867_v21 = vadd.f32 -0.039733864, %v5751_v6  ;;  %v5876_v53 = vsel %vm2365_vm12, %v2241_v57, -inf  ;;  %v5880_v14 = vsel %vm2366_vm13, %v2242_v55, -inf }
 0x281   : > { %v2018_v20 = vsub.f32 %v5781_v33, %v2002_v50  ;;  %v1866_v7 = vmul.f32 %v4048_v32, %v1865_v3  ;;  %vm1868_vm10 = vcmp.eq.f32.partialorder %v5789_v22, inf  ;;  %v2304_v48 = vpack.c.bf16 %v2244_v18, %v2243_v12 }
 0x282   : > { %3094 = vst.msk [vmem:[#allocation4 + $0x20] sm:$0xff] %vm2993_vm4, %v3078_v10  ;;  %v2454_v32 = vmax.f32 %v5876_v53, %v5880_v14  ;;  %v4050_v9 = vpop.eup %4049  ;;  %v5893_v35 = vsel %vm2367_vm14, %v2243_v12, -inf  ;;  %v2303_v40 = vpack.c.bf16 %v2242_v55, %v2241_v57  ;;  %v1749_v61 = vsub.f32 1.0, %v1733_v37  ;;  %v5908_v55 = vpop.xlane.xlu0 %1693  ;;  %v7403_v37 = vld [vmem:[#allocation41_spill] sm:$0xff] }
 0x283   : > { %v5884_v33 = vsel %vm2050_vm8, %v2018_v20, %v3866_v51  ;;  %v1867_v23 = vmul.f32 %v1866_v7, %v5789_v22  ;;  %v1871_v51 = vand.u32 2147483648, %v5789_v22  ;;  %v1874_v4 = vmul.f32 %v4050_v9, %v5853_v36  ;;  %2336 = vst [vmem:[%s4578_s27 + $0x18] sm:$0xff] %v2304_v48  ;;  %v7404_v7 = vld [vmem:[#allocation43_spill] sm:$0xff] }
 0x284   : > { %v3047_v34 = vmul.f32 30.0, %v5884_v33  ;;  %v2455_v54 = vmax.f32 %v2454_v32, %v5893_v35  ;;  %vm1870_vm11 = vcmp.eq.f32.partialorder %v5789_v22, 0.0  ;;  %v5904_v60 = vsel %vm2368_vm0, %v2244_v18, -inf  ;;  %2335 = vst [vmem:[%s4578_s27 + $0x10] sm:$0xff] %v2303_v40 }
 0x285   : > { %v1869_v1 = vsel %vm1868_vm10, %v5789_v22, %v1867_v23  ;;  %v1875_v50 = vmul.f32 %v4050_v9, %v1874_v4  ;;  %v1765_v57 = vmax.f32 %v1749_v61, 0.0  ;;  %vm2051_vm15 = vcmp.gt.f32.partialorder %v3851_v30, 0.0  ;;  %v7405_v23 = vld [vmem:[#allocation10_spill] sm:$0xff]  ;;  %v7406_v61 = vld [vmem:[#allocation11_spill] sm:$0xff] }
 0x286   : > { %v3063_v46 = vmul.f32 %v5580_v52, %v3047_v34  ;;  %v1872_v39 = vsel %vm1870_vm11, %v1871_v51, %v1869_v1  ;;  %v2456_v3 = vmax.f32 %v2455_v54, %v5904_v60  ;;  %v2117_v52 = vmul.f32 %v5047_v24, %v2095_v2 }
 0x287   : > { %v2003_v10 = vmul.f32 0.19866933, %v1872_v39  ;;  %v1876_v20 = vmul.f32 0.5, %v1875_v50  ;;  %v5911_v22 = vmin.f32 %v1765_v57, 1.0  ;;  %v2118_v18 = vmul.f32 %v7403_v37, %v2095_v2 }
 0x288   : > { %v3079_v12 = vadd.f32 %v3063_v46, %v3031_v56  ;;  %2457 = vmax.xlane.f32.xlu2 %v2456_v3  ;;  %v2119_v48 = vmul.f32 %v7404_v7, %v2095_v2  ;;  %v2120_v34 = vmul.f32 %v5061_v42, %v2095_v2  ;;  %v2181_v40 = vadd.f32 %v2117_v52, %v7405_v23  ;;  %v7407_v2 = vld [vmem:[#allocation42_spill] sm:$0xff] }
 0x289   : > { %v2019_v32 = vsub.f32 %v1987_v63, %v2003_v10  ;;  %v1734_v56 = vmul.f32 %v5908_v55, %v5908_v55  ;;  %v2096_v24 = vsub.f32 %v5815_v26, %v5611_v8  ;;  %v1877_v51 = vsub.f32 1.5, %v1876_v20  ;;  %v7408_v8 = vld [vmem:[#allocation44_spill] sm:$0xff]  ;;  %v3032_v3 = vld [vmem:[#allocation4 + $0x30] sm:$0xff] }
 0x28a   : > { %3095 = vst.msk [vmem:[#allocation4 + $0x28] sm:$0xff] %vm2993_vm4, %v3079_v12  ;;  %v1988_v4 = vmul.f32 0.9800666, %v5808_v16  ;;  %4051 = vrsqrt.f32 %v5911_v22  ;;  %v3852_v63 = vadd.f32 0.9800666, %v5808_v16  ;;  %v2182_v42 = vadd.f32 %v2118_v18, %v7406_v61 }
 0x28b   : > { %v5925_v54 = vsel %vm2051_vm15, %v2019_v32, %v3867_v21  ;;  %v2183_v46 = vadd.f32 %v2119_v48, %v7407_v2  ;;  %v1878_v39 = vmul.f32 %v4050_v9, %v1877_v51  ;;  %v3868_v50 = vadd.f32 -0.039733864, %v5808_v16 }
 0x28c   : > { %v3048_v1 = vmul.f32 30.0, %v5925_v54  ;;  %v2184_v26 = vadd.f32 %v2120_v34, %v7408_v8  ;;  %v2245_v57 = vmul.f32 30.0, %v2181_v40  ;;  %v2246_v12 = vmul.f32 30.0, %v2182_v42 }
 0x28d   : > { %v2247_v10 = vmul.f32 30.0, %v2183_v46  ;;  %v1750_v30 = vsub.f32 1.0, %v1734_v56  ;;  %v1879_v52 = vmul.f32 %v1878_v39, %v5853_v36  ;;  %vm1880_vm1 = vcmp.eq.f32.partialorder %v5853_v36, inf  ;;  %v7409_v39 = vld [vmem:[#allocation45_spill] sm:$0xff] }
 0x28e   : > { %v3064_v21 = vmul.f32 %v5532_v59, %v3048_v1  ;;  %v2248_v20 = vmul.f32 30.0, %v2184_v26  ;;  %v1883_v37 = vand.u32 2147483648, %v5853_v36  ;;  %v5939_v9 = vsel %vm2365_vm12, %v2245_v57, -inf }
 0x28f   : > { %v5943_v18 = vsel %vm2366_vm13, %v2246_v12, -inf  ;;  %v2305_v7 = vpack.c.bf16 %v2246_v12, %v2245_v57  ;;  %v1881_v32 = vsel %vm1880_vm1, %v5853_v36, %v1879_v52  ;;  %vm1882_vm2 = vcmp.eq.f32.partialorder %v5853_v36, 0.0  ;;  %v7410_v57 = vld [vmem:[#allocation47_spill] sm:$0xff]  ;;  %v5972_v52 = vpop.xlane.xlu1 %1698 }
 0x290   : > { %v4052_v48 = vpop.eup %4051  ;;  %v3080_v59 = vadd.f32 %v3064_v21, %v3032_v3  ;;  %v2306_v34 = vpack.c.bf16 %v2248_v20, %v2247_v10  ;;  %v1884_v23 = vsel %vm1882_vm2, %v1883_v37, %v1881_v32  ;;  %v2459_v56 = vmax.f32 %v5939_v9, %v5943_v18 }
 0x291   : > { %v1886_v40 = vmul.f32 %v4052_v48, %v5911_v22  ;;  %2337 = vst [vmem:[%s4578_s27 + $0x20] sm:$0xff] %v2305_v7  ;;  %v1766_v51 = vmax.f32 %v1750_v30, 0.0  ;;  %v2004_v61 = vmul.f32 0.19866933, %v1884_v23  ;;  %vm2052_vm3 = vcmp.gt.f32.partialorder %v3852_v63, 0.0  ;;  %v7413_v23 = vld [vmem:[#allocation46_spill] sm:$0xff] }
 0x292   : > { %3096 = vst.msk [vmem:[#allocation4 + $0x30] sm:$0xff] %vm2993_vm4, %v3080_v59  ;;  %v5954_v42 = vsel %vm2367_vm14, %v2247_v10, -inf  ;;  %v2121_v2 = vmul.f32 %v5075_v17, %v2096_v24  ;;  %v2122_v8 = vmul.f32 %v7409_v39, %v2096_v24  ;;  %v5964_v3 = vsel %vm2368_vm0, %v2248_v20, -inf  ;;  %v7412_v59 = vld [vmem:[#allocation13_spill] sm:$0xff] }
 0x293   : > { %v1887_v36 = vmul.f32 %v4052_v48, %v1886_v40  ;;  %2338 = vst [vmem:[%s4578_s27 + $0x28] sm:$0xff] %v2306_v34  ;;  %v2460_v46 = vmax.f32 %v2459_v56, %v5954_v42  ;;  %v5959_v1 = vmin.f32 %v1766_v51, 1.0  ;;  %v2020_v26 = vsub.f32 %v1988_v4, %v2004_v61  ;;  %v3033_v34 = vld [vmem:[#allocation4 + $0x38] sm:$0xff] }
 0x294   : > { %v2123_v12 = vmul.f32 %v7410_v57, %v2096_v24  ;;  %v2124_v10 = vmul.f32 %v5089_v0, %v2096_v24  ;;  %v2097_v17 = vsub.f32 %v5851_v62, %v5679_v58  ;;  %v5976_v4 = vsub.f32 %v5884_v33, %v5705_v41  ;;  %v7411_v0 = vld [vmem:[#allocation12_spill] sm:$0xff] }
 0x295   : > { %v1888_v30 = vmul.f32 0.5, %v1887_v36  ;;  %v2461_v21 = vmax.f32 %v2460_v46, %v5964_v3  ;;  %4053 = vrsqrt.f32 %v5959_v1  ;;  %v5979_v20 = vsel %vm2052_vm3, %v2020_v26, %v3868_v50  ;;  %v7414_v41 = vld [vmem:[#allocation48_spill] sm:$0xff] }
 0x296   : > { %v3853_v37 = vadd.f32 0.9800666, %v5865_v19  ;;  %v2185_v24 = vadd.f32 %v2121_v2, %v7411_v0  ;;  %v3049_v58 = vmul.f32 30.0, %v5979_v20  ;;  %v1989_v7 = vmul.f32 0.9800666, %v5865_v19 }
 0x297   : > { %v1889_v62 = vsub.f32 1.5, %v1888_v30  ;;  %2462 = vmax.xlane.f32.xlu0 %v2461_v21  ;;  %v2186_v32 = vadd.f32 %v2122_v8, %v7412_v59  ;;  %v2187_v40 = vadd.f32 %v2123_v12, %v7413_v23  ;;  %v2188_v33 = vadd.f32 %v2124_v10, %v7414_v41 }
 0x298   : > { %v2249_v63 = vmul.f32 30.0, %v2185_v24  ;;  %v1735_v50 = vmul.f32 %v5972_v52, %v5972_v52  ;;  %v3065_v56 = vmul.f32 %v5564_v49, %v3049_v58  ;;  %v3869_v61 = vadd.f32 -0.039733864, %v5865_v19 }
 0x299   : > { %v1890_v51 = vmul.f32 %v4052_v48, %v1889_v62  ;;  %v2250_v2 = vmul.f32 30.0, %v2186_v32  ;;  %vm2053_vm5 = vcmp.gt.f32.partialorder %v3853_v37, 0.0  ;;  %v2251_v36 = vmul.f32 30.0, %v2187_v40 }
 0x29a   : > { %v2252_v46 = vmul.f32 30.0, %v2188_v33  ;;  %v5994_v39 = vsel %vm2365_vm12, %v2249_v63, -inf  ;;  %v1751_v8 = vsub.f32 1.0, %v1735_v50  ;;  %v3081_v57 = vadd.f32 %v3065_v56, %v3033_v34  ;;  %v7416_v56 = vld [vmem:[#allocation51_spill] sm:$0xff] }
 0x29b   : > { %v4054_v26 = vpop.eup %4053  ;;  %v1891_v12 = vmul.f32 %v1890_v51, %v5911_v22  ;;  %v2307_v10 = vpack.c.bf16 %v2250_v2, %v2249_v63  ;;  %v5999_v49 = vsel %vm2366_vm13, %v2250_v2, -inf  ;;  %vm1892_vm6 = vcmp.eq.f32.partialorder %v5911_v22, inf  ;;  %v7415_v63 = vld [vmem:[#allocation49_spill] sm:$0xff] }
 0x29c   : > { %v1895_v48 = vand.u32 2147483648, %v5911_v22  ;;  %v1898_v30 = vmul.f32 %v4054_v26, %v5959_v1  ;;  %v2308_v21 = vpack.c.bf16 %v2252_v46, %v2251_v36  ;;  %3097 = vst.msk [vmem:[#allocation4 + $0x38] sm:$0xff] %vm2993_vm4, %v3081_v57  ;;  %vm1894_vm7 = vcmp.eq.f32.partialorder %v5911_v22, 0.0 }
 0x29d   : > { %v1893_v0 = vsel %vm1892_vm6, %v5911_v22, %v1891_v12  ;;  %v2464_v24 = vmax.f32 %v5994_v39, %v5999_v49  ;;  %v1767_v58 = vmax.f32 %v1751_v8, 0.0  ;;  %2339 = vst [vmem:[%s4578_s27 + $0x30] sm:$0xff] %v2307_v10  ;;  %v6012_v32 = vsel %vm2367_vm14, %v2251_v36, -inf  ;;  %v7417_v10 = vld [vmem:[#allocation14_spill] sm:$0xff] }
 0x29e   : > { %v1896_v62 = vsel %vm1894_vm7, %v1895_v48, %v1893_v0  ;;  %v1899_v59 = vmul.f32 %v4054_v26, %v1898_v30  ;;  %v2125_v34 = vmul.f32 %v5103_v45, %v2097_v17  ;;  %2340 = vst [vmem:[%s4578_s27 + $0x38] sm:$0xff] %v2308_v21  ;;  %v6018_v40 = vsel %vm2368_vm0, %v2252_v46, -inf  ;;  %v6035_v30 = vpop.xlane.xlu2 %1703  ;;  %v7419_v21 = vld [vmem:[#allocation50_spill] sm:$0xff] }
 0x29f   : > { %v2005_v23 = vmul.f32 0.19866933, %v1896_v62  ;;  %v2465_v22 = vmax.f32 %v2464_v24, %v6012_v32  ;;  %v6021_v41 = vmin.f32 %v1767_v58, 1.0  ;;  %v2126_v50 = vmul.f32 %v7415_v63, %v2097_v17  ;;  %v7420_v24 = vld [vmem:[#allocation52_spill] sm:$0xff] }
 0x2a0   : > { %v1900_v33 = vmul.f32 0.5, %v1899_v59  ;;  %v2127_v51 = vmul.f32 %v7416_v56, %v2097_v17  ;;  %v2128_v2 = vmul.f32 %v5117_v25, %v2097_v17  ;;  %v3854_v45 = vadd.f32 0.9800666, %v5908_v55  ;;  %v7418_v17 = vld [vmem:[#allocation15_spill] sm:$0xff] }
 0x2a1   : > { %v2021_v36 = vsub.f32 %v1989_v7, %v2005_v23  ;;  %v2466_v8 = vmax.f32 %v2465_v22, %v6018_v40  ;;  %4055 = vrsqrt.f32 %v6021_v41  ;;  %v6031_v46 = vsub.f32 %v5925_v54, %v5751_v6  ;;  %v3034_v23 = vld [vmem:[#allocation4 + $0x40] sm:$0xff] }
 0x2a2   : > { %v1901_v57 = vsub.f32 1.5, %v1900_v33  ;;  %v1990_v12 = vmul.f32 0.9800666, %v5908_v55  ;;  %v2189_v48 = vadd.f32 %v2125_v34, %v7417_v10  ;;  %v2190_v7 = vadd.f32 %v2126_v50, %v7418_v17 }
 0x2a3   : > { %v6038_v25 = vsel %vm2053_vm5, %v2021_v36, %v3869_v61  ;;  %2467 = vmax.xlane.f32.xlu1 %v2466_v8  ;;  %v2191_v0 = vadd.f32 %v2127_v51, %v7419_v21  ;;  %v2192_v58 = vadd.f32 %v2128_v2, %v7420_v24  ;;  %v3870_v62 = vadd.f32 -0.039733864, %v5908_v55 }
 0x2a4   : > { %v3050_v6 = vmul.f32 30.0, %v6038_v25  ;;  %v1902_v54 = vmul.f32 %v4054_v26, %v1901_v57  ;;  %v2253_v59 = vmul.f32 30.0, %v2189_v48  ;;  %vm2054_vm8 = vcmp.gt.f32.partialorder %v3854_v45, 0.0 }
 0x2a5   : > { %v2254_v34 = vmul.f32 30.0, %v2190_v7  ;;  %v2255_v22 = vmul.f32 30.0, %v2191_v0  ;;  %v2256_v37 = vmul.f32 30.0, %v2192_v58  ;;  %v1736_v61 = vmul.f32 %v6035_v30, %v6035_v30 }
 0x2a6   : > { %v3066_v33 = vmul.f32 %v5634_v43, %v3050_v6  ;;  %v1903_v63 = vmul.f32 %v1902_v54, %v5959_v1  ;;  %vm1904_vm9 = vcmp.eq.f32.partialorder %v5959_v1, inf  ;;  %v6052_v26 = vsel %vm2365_vm12, %v2253_v59, -inf }
 0x2a7   : > { %v4056_v50 = vpop.eup %4055  ;;  %vm1906_vm10 = vcmp.eq.f32.partialorder %v5959_v1, 0.0  ;;  %v1907_v56 = vand.u32 2147483648, %v5959_v1  ;;  %v2310_v51 = vpack.c.bf16 %v2256_v37, %v2255_v22  ;;  %v6058_v2 = vsel %vm2366_vm13, %v2254_v34, -inf }
 0x2a8   : > { %v3082_v43 = vadd.f32 %v3066_v33, %v3034_v23  ;;  %v1905_v36 = vsel %vm1904_vm9, %v5959_v1, %v1903_v63  ;;  %v1910_v8 = vmul.f32 %v4056_v50, %v6021_v41  ;;  %v2469_v57 = vmax.f32 %v6052_v26, %v6058_v2  ;;  %v7422_v63 = vld [vmem:[#allocation55_spill] sm:$0xff] }
 0x2a9   : > { %v1908_v10 = vsel %vm1906_vm10, %v1907_v56, %v1905_v36  ;;  %2342 = vst [vmem:[%s4578_s27 + $0x48] sm:$0xff] %v2310_v51  ;;  %v6067_v48 = vsel %vm2367_vm14, %v2255_v22, -inf  ;;  %v2309_v17 = vpack.c.bf16 %v2254_v34, %v2253_v59  ;;  %v1752_v7 = vsub.f32 1.0, %v1736_v61  ;;  %v7421_v59 = vld [vmem:[#allocation53_spill] sm:$0xff]  ;;  %v6083_v34 = vpop.xlane.xlu0 %1708 }
 0x2aa   : > { %3098 = vst.msk [vmem:[#allocation4 + $0x40] sm:$0xff] %vm2993_vm4, %v3082_v43  ;;  %v2006_v21 = vmul.f32 0.19866933, %v1908_v10  ;;  %v1911_v0 = vmul.f32 %v4056_v50, %v1910_v8  ;;  %v6071_v24 = vadd.f32 0.9800666, %v5972_v52  ;;  %v2470_v1 = vmax.f32 %v2469_v57, %v6067_v48  ;;  %v7423_v43 = vld [vmem:[#allocation16_spill] sm:$0xff] }
 0x2ab   : > { %v6076_v58 = vsel %vm2368_vm0, %v2256_v37, -inf  ;;  %2341 = vst [vmem:[%s4578_s27 + $0x40] sm:$0xff] %v2309_v17  ;;  %v1768_v6 = vmax.f32 %v1752_v7, 0.0  ;;  %v2129_v54 = vmul.f32 %v5131_v27, %v5976_v4  ;;  %v2130_v23 = vmul.f32 %v7421_v59, %v5976_v4  ;;  %v7424_v27 = vld [vmem:[#allocation17_spill] sm:$0xff] }
 0x2ac   : > { %v2022_v22 = vsub.f32 %v1990_v12, %v2006_v21  ;;  %v1912_v61 = vmul.f32 0.5, %v1911_v0  ;;  %v2471_v33 = vmax.f32 %v2470_v1, %v6076_v58  ;;  %v2131_v56 = vmul.f32 %v7422_v63, %v5976_v4  ;;  %v7425_v12 = vld [vmem:[#allocation54_spill] sm:$0xff] }
 0x2ad   : > { %v6088_v51 = vmin.f32 %v1768_v6, 1.0  ;;  %v2132_v37 = vmul.f32 %v5145_v31, %v5976_v4  ;;  %v2193_v36 = vadd.f32 %v2129_v54, %v7423_v43  ;;  %v2194_v8 = vadd.f32 %v2130_v23, %v7424_v27  ;;  %v3035_v4 = vld [vmem:[#allocation4 + $0x48] sm:$0xff] }
 0x2ae   : > { %v2086_v57 = vsel %vm2054_vm8, %v2022_v22, %v3870_v62  ;;  %v1913_v10 = vsub.f32 1.5, %v1912_v61  ;;  %2472 = vmax.xlane.f32.xlu2 %v2471_v33  ;;  %v2195_v17 = vadd.f32 %v2131_v56, %v7425_v12  ;;  %v1737_v7 = vmul.f32 %v6083_v34, %v6083_v34  ;;  %v7426_v62 = vld [vmem:[#allocation56_spill] sm:$0xff] }
 0x2af   : > { %v6100_v21 = vsub.f32 %v5979_v20, %v5808_v16  ;;  %v3051_v0 = vmul.f32 30.0, %v2086_v57  ;;  %v1991_v31 = vmul.f32 0.9800666, %v5972_v52  ;;  %4057 = vrsqrt.f32 %v6088_v51 }
 0x2b0   : > { %v1914_v1 = vmul.f32 %v4056_v50, %v1913_v10  ;;  %vm1916_vm11 = vcmp.eq.f32.partialorder %v6021_v41, inf  ;;  %v3871_v45 = vadd.f32 -0.039733864, %v5972_v52  ;;  %v2196_v6 = vadd.f32 %v2132_v37, %v7426_v62 }
 0x2b1   : > { %v3067_v54 = vmul.f32 %v5598_v29, %v3051_v0  ;;  %vm2055_vm15 = vcmp.gt.f32.partialorder %v6071_v24, 0.0  ;;  %v2257_v59 = vmul.f32 30.0, %v2193_v36  ;;  %v2258_v16 = vmul.f32 30.0, %v2194_v8  ;;  %v7438_v24 = vld [vmem:[#allocation62_spill] sm:$0xff] }
 0x2b2   : > { %v2259_v20 = vmul.f32 30.0, %v2195_v17  ;;  %v1915_v23 = vmul.f32 %v1914_v1, %v6021_v41  ;;  %vm1918_vm1 = vcmp.eq.f32.partialorder %v6021_v41, 0.0  ;;  %v2260_v22 = vmul.f32 30.0, %v2196_v6  ;;  %v7431_v1 = vld [vmem:[#allocation59_spill] sm:$0xff]  ;;  %v7432_v6 = vld [vmem:[#allocation57_spill] sm:$0xff] }
 0x2b3   : > { %v1753_v61 = vsub.f32 1.0, %v1737_v7  ;;  %v3083_v50 = vadd.f32 %v3067_v54, %v3035_v4  ;;  %v1919_v33 = vand.u32 2147483648, %v6021_v41  ;;  %v6114_v63 = vsel %vm2365_vm12, %v2257_v59, -inf }
 0x2b4   : > { %7427 = vst [vmem:[#allocation39_spill] sm:$0xff] %v6114_v63  ;;  %v6118_v29 = vsel %vm2366_vm13, %v2258_v16, -inf  ;;  %v6122_v56 = vsub.f32 %v6038_v25, %v5865_v19  ;;  %v1917_v37 = vsel %vm1916_vm11, %v6021_v41, %v1915_v23  ;;  %v2312_v43 = vpack.c.bf16 %v2260_v22, %v2259_v20  ;;  %v7433_v23 = vld [vmem:[#allocation60_spill] sm:$0xff] }
 0x2b5   : > { %7428 = vst [vmem:[#allocation8_spill] sm:$0xff] %v6118_v29  ;;  %v2474_v36 = vmax.f32 %v6114_v63, %v6118_v29  ;;  %v4058_v27 = vpop.eup %4057  ;;  %v1920_v8 = vsel %vm1918_vm1, %v1919_v33, %v1917_v37  ;;  %v6132_v10 = vsel %vm2367_vm14, %v2259_v20, -inf  ;;  %v2311_v12 = vpack.c.bf16 %v2258_v16, %v2257_v59  ;;  %v6164_v37 = vpop.xlane.xlu1 %1713  ;;  %v3038_v63 = vld [vmem:[#allocation4 + $0x60] sm:$0xff] }
 0x2b6   : > { %3099 = vst.msk [vmem:[#allocation4 + $0x48] sm:$0xff] %vm2993_vm4, %v3083_v50  ;;  %v1769_v19 = vmax.f32 %v1753_v61, 0.0  ;;  %v2007_v25 = vmul.f32 0.19866933, %v1920_v8  ;;  %v1922_v17 = vmul.f32 %v4058_v27, %v6088_v51  ;;  %v6136_v7 = vmul.f32 0.9800666, %v6035_v30 }
 0x2b7   : > { %7429 = vst [vmem:[#allocation9_spill] sm:$0xff] %v6132_v10  ;;  %v2475_v41 = vmax.f32 %v2474_v36, %v6132_v10  ;;  %v6142_v0 = vsel %vm2368_vm0, %v2260_v22, -inf  ;;  %v2133_v62 = vmul.f32 %v7431_v1, %v6031_v46  ;;  %v2134_v54 = vmul.f32 %v7432_v6, %v6031_v46  ;;  %v7434_v36 = vld [vmem:[#allocation61_spill] sm:$0xff]  ;;  %v3036_v1 = vld [vmem:[#allocation4 + $0x50] sm:$0xff]  ;;  %v7462_v10 = vld [vmem:[#allocation23_spill] sm:$0xff] }
 0x2b8   : > { %2344 = vst [vmem:[%s4578_s27 + $0x58] sm:$0xff] %v2312_v43  ;;  %v6145_v4 = vmin.f32 %v1769_v19, 1.0  ;;  %v2023_v59 = vsub.f32 %v1991_v31, %v2007_v25  ;;  %v1923_v16 = vmul.f32 %v4058_v27, %v1922_v17  ;;  %v2135_v61 = vmul.f32 %v7433_v23, %v6031_v46  ;;  %v7436_v19 = vld [vmem:[#allocation19_spill] sm:$0xff]  ;;  %v7437_v17 = vld [vmem:[#allocation58_spill] sm:$0xff] }
 0x2b9   : > { %7430 = vst [vmem:[#allocation38_spill] sm:$0xff] %v6142_v0  ;;  %v2476_v20 = vmax.f32 %v2475_v41, %v6142_v0  ;;  %v6155_v50 = vsub.f32 %v2086_v57, %v5908_v55  ;;  %v6158_v22 = vadd.f32 0.9800666, %v6035_v30  ;;  %v6161_v33 = vadd.f32 -0.039733864, %v6035_v30  ;;  %v7435_v57 = vld [vmem:[#allocation18_spill] sm:$0xff] }
 0x2ba   : > { %2343 = vst [vmem:[%s4578_s27 + $0x50] sm:$0xff] %v2311_v12  ;;  %4059 = vrsqrt.f32 %v6145_v4  ;;  %v6168_v31 = vsel %vm2055_vm15, %v2023_v59, %v3871_v45  ;;  %v1924_v43 = vmul.f32 0.5, %v1923_v16  ;;  %v2136_v55 = vmul.f32 %v7434_v36, %v6031_v46 }
 0x2bb   : > { %2477 = vmax.xlane.f32.xlu0 %v2476_v20  ;;  %v2197_v8 = vadd.f32 %v2133_v62, %v7435_v57  ;;  %v3052_v12 = vmul.f32 30.0, %v6168_v31  ;;  %vm1928_vm2 = vcmp.eq.f32.partialorder %v6088_v51, inf  ;;  %v2198_v25 = vadd.f32 %v2134_v54, %v7436_v19  ;;  %v7439_v20 = vld [vmem:[#allocation117_spill] sm:$0xff] }
 0x2bc   : > { %v2199_v41 = vadd.f32 %v2135_v61, %v7437_v17  ;;  %v1925_v6 = vsub.f32 1.5, %v1924_v43  ;;  %v2200_v45 = vadd.f32 %v2136_v55, %v7438_v24  ;;  %v1738_v16 = vmul.f32 %v6164_v37, %v6164_v37 }
 0x2bd   : > { %v2261_v59 = vmul.f32 30.0, %v2197_v8  ;;  %v3068_v46 = vmul.f32 %v7439_v20, %v3052_v12  ;;  %vm1930_vm3 = vcmp.eq.f32.partialorder %v6088_v51, 0.0  ;;  %v2262_v62 = vmul.f32 30.0, %v2198_v25 }
 0x2be   : > { %v2263_v23 = vmul.f32 30.0, %v2199_v41  ;;  %v1926_v36 = vmul.f32 %v4058_v27, %v1925_v6  ;;  %v2264_v57 = vmul.f32 30.0, %v2200_v45  ;;  %v1754_v61 = vsub.f32 1.0, %v1738_v16 }
 0x2bf   : > { %v6184_v54 = vsel %vm2365_vm12, %v2261_v59, -inf  ;;  %v3084_v19 = vadd.f32 %v3068_v46, %v3036_v1  ;;  %v1931_v55 = vand.u32 2147483648, %v6088_v51  ;;  %vm2056_vm5 = vcmp.gt.f32.partialorder %v6158_v22, 0.0  ;;  %v7444_v46 = vld [vmem:[#allocation65_spill] sm:$0xff] }
 0x2c0   : > { %7440 = vst [vmem:[#allocation40_spill] sm:$0xff] %v6184_v54  ;;  %v4060_v43 = vpop.eup %4059  ;;  %v2313_v8 = vpack.c.bf16 %v2262_v62, %v2261_v59  ;;  %v6190_v12 = vsel %vm2366_vm13, %v2262_v62, -inf  ;;  %v1927_v27 = vmul.f32 %v1926_v36, %v6088_v51  ;;  %v6195_v17 = vmul.f32 0.9800666, %v6083_v34 }
 0x2c1   : > { %7441 = vst [vmem:[#allocation41_spill] sm:$0xff] %v6190_v12  ;;  %v1934_v25 = vmul.f32 %v4060_v43, %v6145_v4  ;;  %v2314_v41 = vpack.c.bf16 %v2264_v57, %v2263_v23  ;;  %v6199_v1 = vadd.f32 0.9800666, %v6083_v34  ;;  %v6203_v6 = vsel %vm2367_vm14, %v2263_v23, -inf }
 0x2c2   : > { %3100 = vst.msk [vmem:[#allocation4 + $0x50] sm:$0xff] %vm2993_vm4, %v3084_v19  ;;  %v2479_v24 = vmax.f32 %v6184_v54, %v6190_v12  ;;  %v1770_v45 = vmax.f32 %v1754_v61, 0.0  ;;  %v1929_v59 = vsel %vm1928_vm2, %v6088_v51, %v1927_v27  ;;  %v6213_v20 = vsel %vm2368_vm0, %v2264_v57, -inf  ;;  %v7445_v19 = vld [vmem:[#allocation63_spill] sm:$0xff]  ;;  %v7446_v12 = vld [vmem:[#allocation66_spill] sm:$0xff] }
 0x2c3   : > { %7442 = vst [vmem:[#allocation43_spill] sm:$0xff] %v6203_v6  ;;  %v1935_v16 = vmul.f32 %v4060_v43, %v1934_v25  ;;  %v2137_v62 = vmul.f32 %v7444_v46, %v6100_v21  ;;  %v1932_v23 = vsel %vm1930_vm3, %v1931_v55, %v1929_v59  ;;  %v2138_v27 = vmul.f32 %v7445_v19, %v6100_v21  ;;  %v7447_v54 = vld [vmem:[#allocation67_spill] sm:$0xff]  ;;  %v6229_v46 = vpop.xlane.xlu2 %1718  ;;  %v7450_v59 = vld [vmem:[#allocation64_spill] sm:$0xff] }
 0x2c4   : > { %2345 = vst [vmem:[%s4578_s27 + $0x60] sm:$0xff] %v2313_v8  ;;  %v2480_v36 = vmax.f32 %v2479_v24, %v6203_v6  ;;  %v6221_v61 = vmin.f32 %v1770_v45, 1.0  ;;  %v2008_v25 = vmul.f32 0.19866933, %v1932_v23  ;;  %v2139_v57 = vmul.f32 %v7446_v12, %v6100_v21  ;;  %v7448_v12 = vld [vmem:[#allocation20_spill] sm:$0xff] }
 0x2c5   : > { %7443 = vst [vmem:[#allocation10_spill] sm:$0xff] %v6213_v20  ;;  %v1936_v8 = vmul.f32 0.5, %v1935_v16  ;;  %v2140_v0 = vmul.f32 %v7447_v54, %v6100_v21  ;;  %vm1940_vm6 = vcmp.eq.f32.partialorder %v6145_v4, inf  ;;  %v6233_v51 = vadd.f32 -0.039733864, %v6083_v34  ;;  %v7449_v21 = vld [vmem:[#allocation21_spill] sm:$0xff] }
 0x2c6   : > { %2346 = vst [vmem:[%s4578_s27 + $0x68] sm:$0xff] %v2314_v41  ;;  %v2481_v55 = vmax.f32 %v2480_v36, %v6213_v20  ;;  %4061 = vrsqrt.f32 %v6221_v61  ;;  %v2024_v41 = vsub.f32 %v6136_v7, %v2008_v25  ;;  %vm1942_vm7 = vcmp.eq.f32.partialorder %v6145_v4, 0.0  ;;  %v7451_v23 = vld [vmem:[#allocation68_spill] sm:$0xff]  ;;  %v7461_v20 = vld [vmem:[#allocation22_spill] sm:$0xff] }
 0x2c7   : > { %v1937_v24 = vsub.f32 1.5, %v1936_v8  ;;  %v2201_v45 = vadd.f32 %v2137_v62, %v7448_v12  ;;  %v2202_v54 = vadd.f32 %v2138_v27, %v7449_v21  ;;  %v2203_v16 = vadd.f32 %v2139_v57, %v7450_v59 }
 0x2c8   : > { %2482 = vmax.xlane.f32.xlu1 %v2481_v55  ;;  %v2204_v19 = vadd.f32 %v2140_v0, %v7451_v23  ;;  %v1739_v6 = vmul.f32 %v6229_v46, %v6229_v46  ;;  %v2088_v36 = vsel %vm2056_vm5, %v2024_v41, %v6161_v33  ;;  %v1943_v25 = vand.u32 2147483648, %v6145_v4  ;;  %v3037_v55 = vld [vmem:[#allocation4 + $0x58] sm:$0xff]  ;;  %v7453_v41 = vld [vmem:[#allocation120_spill] sm:$0xff] }
 0x2c9   : > { %v1938_v7 = vmul.f32 %v4060_v43, %v1937_v24  ;;  %v2265_v8 = vmul.f32 30.0, %v2201_v45  ;;  %v6251_v62 = vsub.f32 %v6168_v31, %v5972_v52  ;;  %v3053_v27 = vmul.f32 30.0, %v2088_v36 }
 0x2ca   : > { %vm2057_vm8 = vcmp.gt.f32.partialorder %v6199_v1, 0.0  ;;  %v2266_v57 = vmul.f32 30.0, %v2202_v54  ;;  %v2267_v0 = vmul.f32 30.0, %v2203_v16  ;;  %v2268_v21 = vmul.f32 30.0, %v2204_v19 }
 0x2cb   : > { %v1939_v12 = vmul.f32 %v1938_v7, %v6145_v4  ;;  %v6257_v22 = vsel %vm2365_vm12, %v2265_v8, -inf  ;;  %v1755_v33 = vsub.f32 1.0, %v1739_v6  ;;  %v3069_v24 = vmul.f32 %v7453_v41, %v3053_v27 }
 0x2cc   : > { %7452 = vst [vmem:[#allocation11_spill] sm:$0xff] %v6257_v22  ;;  %v4062_v43 = vpop.eup %4061  ;;  %v6261_v52 = vmul.f32 0.9800666, %v6164_v37  ;;  %v6265_v31 = vsel %vm2366_vm13, %v2266_v57, -inf  ;;  %v2315_v45 = vpack.c.bf16 %v2266_v57, %v2265_v8  ;;  %v6272_v6 = vadd.f32 0.9800666, %v6164_v37 }
 0x2cd   : > { %7454 = vst [vmem:[#allocation42_spill] sm:$0xff] %v6265_v31  ;;  %v1941_v54 = vsel %vm1940_vm6, %v6145_v4, %v1939_v12  ;;  %v1946_v59 = vmul.f32 %v4062_v43, %v6221_v61  ;;  %v2316_v16 = vpack.c.bf16 %v2268_v21, %v2267_v0  ;;  %v3085_v23 = vadd.f32 %v3069_v24, %v3037_v55  ;;  %v7456_v55 = vld [vmem:[#allocation71_spill] sm:$0xff]  ;;  %v7457_v24 = vld [vmem:[#allocation69_spill] sm:$0xff] }
 0x2ce   : > { %v1944_v19 = vsel %vm1942_vm7, %v1943_v25, %v1941_v54  ;;  %v2484_v7 = vmax.f32 %v6257_v22, %v6265_v31  ;;  %2347 = vst [vmem:[%s4578_s27 + $0x70] sm:$0xff] %v2315_v45  ;;  %v1771_v27 = vmax.f32 %v1755_v33, 0.0  ;;  %v6280_v41 = vadd.f32 -0.039733864, %v6164_v37  ;;  %v7464_v31 = vld [vmem:[#allocation74_spill] sm:$0xff]  ;;  %v7479_v22 = vld [vmem:[#allocation119_spill] sm:$0xff] }
 0x2cf   : > { %v2009_v8 = vmul.f32 0.19866933, %v1944_v19  ;;  %v1947_v57 = vmul.f32 %v4062_v43, %v1946_v59  ;;  %2348 = vst [vmem:[%s4578_s27 + $0x78] sm:$0xff] %v2316_v16  ;;  %v6285_v12 = vsel %vm2367_vm14, %v2267_v0, -inf  ;;  %vm1952_vm9 = vcmp.eq.f32.partialorder %v6221_v61, inf  ;;  %v7459_v16 = vld [vmem:[#allocation72_spill] sm:$0xff] }
 0x2d0   : > { %7455 = vst [vmem:[#allocation44_spill] sm:$0xff] %v6285_v12  ;;  %v2485_v4 = vmax.f32 %v2484_v7, %v6285_v12  ;;  %v6290_v25 = vmin.f32 %v1771_v27, 1.0  ;;  %v2141_v33 = vmul.f32 %v7456_v55, %v6122_v56  ;;  %v2142_v45 = vmul.f32 %v7457_v24, %v6122_v56  ;;  %v7460_v55 = vld [vmem:[#allocation73_spill] sm:$0xff] }
 0x2d1   : > { %3101 = vst.msk [vmem:[#allocation4 + $0x58] sm:$0xff] %vm2993_vm4, %v3085_v23  ;;  %v2025_v54 = vsub.f32 %v6195_v17, %v2009_v8  ;;  %v1948_v59 = vmul.f32 0.5, %v1947_v57  ;;  %vm1954_vm10 = vcmp.eq.f32.partialorder %v6221_v61, 0.0  ;;  %v6300_v0 = vsel %vm2368_vm0, %v2268_v21, -inf  ;;  %v6310_v17 = vpop.xlane.xlu0 %1723 }
 0x2d2   : > { %7458 = vst [vmem:[#allocation45_spill] sm:$0xff] %v6300_v0  ;;  %v2143_v23 = vmul.f32 %v7459_v16, %v6122_v56  ;;  %v1955_v19 = vand.u32 2147483648, %v6221_v61  ;;  %v2486_v7 = vmax.f32 %v2485_v4, %v6300_v0  ;;  %4063 = vrsqrt.f32 %v6290_v25 }
 0x2d3   : > { %v6308_v27 = vmul.f32 0.9800666, %v6229_v46  ;;  %v6313_v8 = vsub.f32 %v2088_v36, %v6035_v30  ;;  %v2089_v21 = vsel %vm2057_vm8, %v2025_v54, %v6233_v51  ;;  %v1949_v57 = vsub.f32 1.5, %v1948_v59  ;;  %v7463_v36 = vld [vmem:[#allocation70_spill] sm:$0xff] }
 0x2d4   : > { %v2144_v24 = vmul.f32 %v7460_v55, %v6122_v56  ;;  %v3054_v16 = vmul.f32 30.0, %v2089_v21  ;;  %2487 = vmax.xlane.f32.xlu2 %v2486_v7  ;;  %v6321_v4 = vadd.f32 0.9800666, %v6229_v46  ;;  %v2205_v0 = vadd.f32 %v2141_v33, %v7461_v20  ;;  %v7465_v54 = vld [vmem:[#allocation118_spill] sm:$0xff] }
 0x2d5   : > { %v2206_v29 = vadd.f32 %v2142_v45, %v7462_v10  ;;  %v1950_v30 = vmul.f32 %v4062_v43, %v1949_v57  ;;  %v2207_v12 = vadd.f32 %v2143_v23, %v7463_v36  ;;  %v1740_v51 = vmul.f32 %v6310_v17, %v6310_v17 }
 0x2d6   : > { %v2208_v1 = vadd.f32 %v2144_v24, %v7464_v31  ;;  %v3070_v56 = vmul.f32 %v7465_v54, %v3054_v16  ;;  %vm2058_vm11 = vcmp.gt.f32.partialorder %v6272_v6, 0.0  ;;  %v6332_v59 = vadd.f32 -0.039733864, %v6229_v46 }
 0x2d7   : > { %v2269_v7 = vmul.f32 30.0, %v2205_v0  ;;  %v2270_v20 = vmul.f32 30.0, %v2206_v29  ;;  %v1951_v10 = vmul.f32 %v1950_v30, %v6221_v61  ;;  %v2271_v33 = vmul.f32 30.0, %v2207_v12 }
 0x2d8   : > { %v2272_v43 = vmul.f32 30.0, %v2208_v1  ;;  %v1756_v45 = vsub.f32 1.0, %v1740_v51  ;;  %v4064_v23 = vpop.eup %4063  ;;  %v3086_v31 = vadd.f32 %v3070_v56, %v3038_v63  ;;  %v1967_v0 = vand.u32 2147483648, %v6290_v25 }
 0x2d9   : > { %v6337_v57 = vsel %vm2365_vm12, %v2269_v7, -inf  ;;  %v6341_v55 = vsel %vm2366_vm13, %v2270_v20, -inf  ;;  %v2317_v24 = vpack.c.bf16 %v2270_v20, %v2269_v7  ;;  %v1953_v29 = vsel %vm1952_vm9, %v6221_v61, %v1951_v10  ;;  %v7470_v20 = vld [vmem:[#allocation75_spill] sm:$0xff] }
 0x2da   : > { %7466 = vst [vmem:[#allocation47_spill] sm:$0xff] %v6337_v57  ;;  %v1958_v12 = vmul.f32 %v4064_v23, %v6290_v25  ;;  %v2318_v16 = vpack.c.bf16 %v2272_v43, %v2271_v33  ;;  %v6349_v63 = vsub.f32 %v2089_v21, %v6083_v34  ;;  %v1956_v30 = vsel %vm1954_vm10, %v1955_v19, %v1953_v29  ;;  %v7469_v19 = vld [vmem:[#allocation77_spill] sm:$0xff]  ;;  %v7472_v29 = vld [vmem:[#allocation78_spill] sm:$0xff] }
 0x2db   : > { %7467 = vst [vmem:[#allocation12_spill] sm:$0xff] %v6341_v55  ;;  %v2489_v36 = vmax.f32 %v6337_v57, %v6341_v55  ;;  %v1772_v1 = vmax.f32 %v1756_v45, 0.0  ;;  %v2010_v51 = vmul.f32 0.19866933, %v1956_v30  ;;  %v6359_v56 = vsel %vm2367_vm14, %v2271_v33, -inf  ;;  %v7476_v57 = vld [vmem:[#allocation76_spill] sm:$0xff] }
 0x2dc   : > { %3102 = vst.msk [vmem:[#allocation4 + $0x60] sm:$0xff] %vm2993_vm4, %v3086_v31  ;;  %v1959_v54 = vmul.f32 %v4064_v23, %v1958_v12  ;;  %v6362_v7 = vmul.f32 0.9800666, %v6310_v17  ;;  %vm1964_vm15 = vcmp.eq.f32.partialorder %v6290_v25, inf  ;;  %v2145_v21 = vmul.f32 %v7469_v19, %v6155_v50  ;;  %v7474_v19 = vld [vmem:[#allocation24_spill] sm:$0xff] }
 0x2dd   : > { %2350 = vst [vmem:[%s4578_s27 + $0x88] sm:$0xff] %v2318_v16  ;;  %v2490_v34 = vmax.f32 %v2489_v36, %v6359_v56  ;;  %v6367_v61 = vmin.f32 %v1772_v1, 1.0  ;;  %v2146_v10 = vmul.f32 %v7470_v20, %v6155_v50  ;;  %v2026_v45 = vsub.f32 %v6261_v52, %v2010_v51  ;;  %v7473_v1 = vld [vmem:[#allocation81_spill] sm:$0xff] }
 0x2de   : > { %7468 = vst [vmem:[#allocation13_spill] sm:$0xff] %v6359_v56  ;;  %v1960_v33 = vmul.f32 0.5, %v1959_v54  ;;  %vm1966_vm1 = vcmp.eq.f32.partialorder %v6290_v25, 0.0  ;;  %v6377_v31 = vsel %vm2368_vm0, %v2272_v43, -inf  ;;  %v6384_v16 = vadd.f32 0.9800666, %v6310_v17 }
 0x2df   : > { %2349 = vst [vmem:[%s4578_s27 + $0x80] sm:$0xff] %v2317_v24  ;;  %v2147_v24 = vmul.f32 %v7472_v29, %v6155_v50  ;;  %v2491_v12 = vmax.f32 %v2490_v34, %v6377_v31  ;;  %4065 = vrsqrt.f32 %v6367_v61  ;;  %v6387_v30 = vadd.f32 -0.039733864, %v6310_v17  ;;  %v7475_v29 = vld [vmem:[#allocation25_spill] sm:$0xff] }
 0x2e0   : > { %7471 = vst [vmem:[#allocation46_spill] sm:$0xff] %v6377_v31  ;;  %v2090_v52 = vsel %vm2058_vm11, %v2026_v45, %v6280_v41  ;;  %v1961_v36 = vsub.f32 1.5, %v1960_v33  ;;  %v2148_v51 = vmul.f32 %v7473_v1, %v6155_v50  ;;  %v2209_v20 = vadd.f32 %v2145_v21, %v7474_v19  ;;  %v3039_v56 = vld [vmem:[#allocation4 + $0x68] sm:$0xff]  ;;  %v7477_v41 = vld [vmem:[#allocation79_spill] sm:$0xff] }
 0x2e1   : > { %v6396_v54 = vsub.f32 %v2090_v52, %v6164_v37  ;;  %v3055_v34 = vmul.f32 30.0, %v2090_v52  ;;  %2492 = vmax.xlane.f32.xlu0 %v2491_v12  ;;  %v2210_v31 = vadd.f32 %v2146_v10, %v7475_v29  ;;  %v2211_v6 = vadd.f32 %v2147_v24, %v7476_v57  ;;  %v7478_v33 = vld [vmem:[#allocation83_spill] sm:$0xff]  ;;  %v7480_v12 = vld [vmem:[#allocation80_spill] sm:$0xff] }
 0x2e2   : > { %v1962_v55 = vmul.f32 %v4064_v23, %v1961_v36  ;;  %v2212_v45 = vadd.f32 %v2148_v51, %v7477_v41  ;;  %v2149_v43 = vmul.f32 %v7478_v33, %v6251_v62  ;;  %vm2059_vm2 = vcmp.gt.f32.partialorder %v6321_v4, 0.0  ;;  %v7481_v57 = vld [vmem:[#allocation84_spill] sm:$0xff] }
 0x2e3   : > { %v3071_v50 = vmul.f32 %v7479_v22, %v3055_v34  ;;  %v2273_v37 = vmul.f32 30.0, %v2209_v20  ;;  %v2274_v52 = vmul.f32 30.0, %v2210_v31  ;;  %v2150_v21 = vmul.f32 %v7480_v12, %v6251_v62 }
 0x2e4   : > { %v1963_v10 = vmul.f32 %v1962_v55, %v6290_v25  ;;  %v2275_v1 = vmul.f32 30.0, %v2211_v6  ;;  %v2276_v23 = vmul.f32 30.0, %v2212_v45  ;;  %v2151_v24 = vmul.f32 %v7481_v57, %v6251_v62  ;;  %v7483_v45 = vld [vmem:[#allocation87_spill] sm:$0xff]  ;;  %v7487_v57 = vld [vmem:[#allocation85_spill] sm:$0xff] }
 0x2e5   : > { %v4066_v36 = vpop.eup %4065  ;;  %v3087_v51 = vadd.f32 %v3071_v50, %v3039_v56  ;;  %v2319_v19 = vpack.c.bf16 %v2274_v52, %v2273_v37  ;;  %v6413_v22 = vsel %vm2365_vm12, %v2273_v37, -inf  ;;  %v6417_v31 = vsel %vm2366_vm13, %v2274_v52, -inf  ;;  %v7484_v52 = vld [vmem:[#allocation26_spill] sm:$0xff] }
 0x2e6   : > { %7482 = vst [vmem:[#allocation48_spill] sm:$0xff] %v6417_v31  ;;  %v1965_v55 = vsel %vm1964_vm15, %v6290_v25, %v1963_v10  ;;  %v1970_v34 = vmul.f32 %v4066_v36, %v6367_v61  ;;  %v2320_v20 = vpack.c.bf16 %v2276_v23, %v2275_v1  ;;  %v6425_v56 = vsel %vm2367_vm14, %v2275_v1, -inf  ;;  %v7485_v10 = vld [vmem:[#allocation27_spill] sm:$0xff] }
 0x2e7   : > { %3103 = vst.msk [vmem:[#allocation4 + $0x68] sm:$0xff] %vm2993_vm4, %v3087_v51  ;;  %v1968_v29 = vsel %vm1966_vm1, %v1967_v0, %v1965_v55  ;;  %v6432_v6 = vsel %vm2368_vm0, %v2276_v23, -inf  ;;  %v2494_v41 = vmax.f32 %v6413_v22, %v6417_v31  ;;  %v2152_v33 = vmul.f32 %v7483_v45, %v6251_v62  ;;  %v7486_v0 = vld [vmem:[#allocation82_spill] sm:$0xff]  ;;  %v7488_v55 = vld [vmem:[#allocation89_spill] sm:$0xff] }
 0x2e8   : > { %v2011_v50 = vmul.f32 0.19866933, %v1968_v29  ;;  %v1971_v37 = vmul.f32 %v4066_v36, %v1970_v34  ;;  %2351 = vst [vmem:[%s4578_s27 + $0x90] sm:$0xff] %v2319_v19  ;;  %v2213_v12 = vadd.f32 %v2149_v43, %v7484_v52  ;;  %v2214_v1 = vadd.f32 %v2150_v21, %v7485_v10 }
 0x2e9   : > { %vm1976_vm3 = vcmp.eq.f32.partialorder %v6367_v61, inf  ;;  %2352 = vst [vmem:[%s4578_s27 + $0x98] sm:$0xff] %v2320_v20  ;;  %v2495_v25 = vmax.f32 %v2494_v41, %v6425_v56  ;;  %v2215_v23 = vadd.f32 %v2151_v24, %v7486_v0  ;;  %v2216_v51 = vadd.f32 %v2152_v33, %v7487_v57  ;;  %v7489_v41 = vld [vmem:[#allocation86_spill] sm:$0xff] }
 0x2ea   : > { %v2153_v31 = vmul.f32 %v7488_v55, %v6313_v8  ;;  %v2027_v62 = vsub.f32 %v6308_v27, %v2011_v50  ;;  %v1972_v34 = vmul.f32 0.5, %v1971_v37  ;;  %vm1978_vm5 = vcmp.eq.f32.partialorder %v6367_v61, 0.0  ;;  %v7491_v57 = vld [vmem:[#allocation90_spill] sm:$0xff]  ;;  %v7492_v55 = vld [vmem:[#allocation93_spill] sm:$0xff] }
 0x2eb   : > { %v2277_v43 = vmul.f32 30.0, %v2213_v12  ;;  %v2278_v19 = vmul.f32 30.0, %v2214_v1  ;;  %v2496_v21 = vmax.f32 %v2495_v25, %v6432_v6  ;;  %v2279_v29 = vmul.f32 30.0, %v2215_v23 }
 0x2ec   : > { %v2280_v20 = vmul.f32 30.0, %v2216_v51  ;;  %v2154_v45 = vmul.f32 %v7489_v41, %v6313_v8  ;;  %v2091_v24 = vsel %vm2059_vm2, %v2027_v62, %v6332_v59  ;;  %v1973_v33 = vsub.f32 1.5, %v1972_v34  ;;  %v3040_v59 = vld [vmem:[#allocation4 + $0x70] sm:$0xff] }
 0x2ed   : > { %v6458_v27 = vsel %vm2365_vm12, %v2277_v43, -inf  ;;  %v6462_v50 = vsel %vm2366_vm13, %v2278_v19, -inf  ;;  %v6465_v37 = vsub.f32 %v2091_v24, %v6229_v46  ;;  %v3056_v52 = vmul.f32 30.0, %v2091_v24  ;;  %2497 = vmax.xlane.f32.xlu1 %v2496_v21  ;;  %v7490_v46 = vld [vmem:[#allocation122_spill] sm:$0xff] }
 0x2ee   : > { %v2322_v12 = vpack.c.bf16 %v2280_v20, %v2279_v29  ;;  %v6469_v4 = vsel %vm2367_vm14, %v2279_v29, -inf  ;;  %v1974_v10 = vmul.f32 %v4066_v36, %v1973_v33  ;;  %v6473_v1 = vsel %vm2368_vm0, %v2280_v20, -inf  ;;  %v7493_v36 = vld [vmem:[#allocation28_spill] sm:$0xff]  ;;  %v7494_v20 = vld [vmem:[#allocation29_spill] sm:$0xff] }
 0x2ef   : > { %v2499_v25 = vmax.f32 %v6458_v27, %v6462_v50  ;;  %v2321_v0 = vpack.c.bf16 %v2278_v19, %v2277_v43  ;;  %v3072_v23 = vmul.f32 %v7490_v46, %v3056_v52  ;;  %vm2060_vm6 = vcmp.gt.f32.partialorder %v6384_v16, 0.0  ;;  %v7495_v19 = vld [vmem:[#allocation95_spill] sm:$0xff]  ;;  %v7496_v33 = vld [vmem:[#allocation88_spill] sm:$0xff] }
 0x2f0   : > { %2354 = vst [vmem:[%s4578_s27 + $0xa8] sm:$0xff] %v2322_v12  ;;  %v2155_v51 = vmul.f32 %v7491_v57, %v6313_v8  ;;  %v2156_v62 = vmul.f32 %v7492_v55, %v6313_v8  ;;  %v2217_v34 = vadd.f32 %v2153_v31, %v7493_v36  ;;  %v1975_v21 = vmul.f32 %v1974_v10, %v6367_v61  ;;  %v7497_v12 = vld [vmem:[#allocation91_spill] sm:$0xff] }
 0x2f1   : > { %v2500_v29 = vmax.f32 %v2499_v25, %v6469_v4  ;;  %2353 = vst [vmem:[%s4578_s27 + $0xa0] sm:$0xff] %v2321_v0  ;;  %v2218_v43 = vadd.f32 %v2154_v45, %v7494_v20  ;;  %v2157_v41 = vmul.f32 %v7495_v19, %v6349_v63  ;;  %v3088_v24 = vadd.f32 %v3072_v23, %v3040_v59  ;;  %v7498_v25 = vld [vmem:[#allocation92_spill] sm:$0xff] }
 0x2f2   : > { %v2219_v52 = vadd.f32 %v2155_v51, %v7496_v33  ;;  %v2220_v46 = vadd.f32 %v2156_v62, %v7497_v12  ;;  %v2281_v57 = vmul.f32 30.0, %v2217_v34  ;;  %v1977_v8 = vsel %vm1976_vm3, %v6367_v61, %v1975_v21  ;;  %v7500_v21 = vld [vmem:[#allocation96_spill] sm:$0xff]  ;;  %v7501_v33 = vld [vmem:[#allocation99_spill] sm:$0xff]  ;;  %v7502_v12 = vld [vmem:[#allocation30_spill] sm:$0xff] }
 0x2f3   : > { %v2501_v31 = vmax.f32 %v2500_v29, %v6473_v1  ;;  %v2282_v10 = vmul.f32 30.0, %v2218_v43  ;;  %v2158_v0 = vmul.f32 %v7498_v25, %v6349_v63  ;;  %3104 = vst.msk [vmem:[#allocation4 + $0x70] sm:$0xff] %vm2993_vm4, %v3088_v24  ;;  %v7499_v45 = vand.u32 2147483648, %v6367_v61 }
 0x2f4   : > { %v2283_v23 = vmul.f32 30.0, %v2219_v52  ;;  %v2284_v51 = vmul.f32 30.0, %v2220_v46  ;;  %v6506_v55 = vsel %vm2365_vm12, %v2281_v57, -inf  ;;  %v2159_v29 = vmul.f32 %v7500_v21, %v6349_v63 }
 0x2f5   : > { %v1980_v59 = vsel %vm1978_vm5, %v7499_v45, %v1977_v8  ;;  %2502 = vmax.xlane.f32.xlu2 %v2501_v31  ;;  %v6510_v36 = vsel %vm2366_vm13, %v2282_v10, -inf  ;;  %v2323_v34 = vpack.c.bf16 %v2282_v10, %v2281_v57  ;;  %v2160_v52 = vmul.f32 %v7501_v33, %v6349_v63  ;;  %v7503_v57 = vld [vmem:[#allocation31_spill] sm:$0xff]  ;;  %v7504_v10 = vld [vmem:[#allocation94_spill] sm:$0xff]  ;;  %v7505_v45 = vld [vmem:[#allocation101_spill] sm:$0xff] }
 0x2f6   : > { %v2012_v62 = vmul.f32 0.19866933, %v1980_v59  ;;  %v2324_v20 = vpack.c.bf16 %v2284_v51, %v2283_v23  ;;  %v6516_v61 = vsel %vm2367_vm14, %v2283_v23, -inf  ;;  %v6520_v43 = vsel %vm2368_vm0, %v2284_v51, -inf  ;;  %v7506_v23 = vld [vmem:[#allocation98_spill] sm:$0xff]  ;;  %v7507_v63 = vld [vmem:[#allocation97_spill] sm:$0xff] }
 0x2f7   : > { %v2504_v19 = vmax.f32 %v6506_v55, %v6510_v36  ;;  %2355 = vst [vmem:[%s4578_s27 + $0xb0] sm:$0xff] %v2323_v34  ;;  %v2221_v46 = vadd.f32 %v2157_v41, %v7502_v12  ;;  %v2222_v8 = vadd.f32 %v2158_v0, %v7503_v57  ;;  %v2223_v25 = vadd.f32 %v2159_v29, %v7504_v10 }
 0x2f8   : > { %v2028_v24 = vsub.f32 %v6362_v7, %v2012_v62  ;;  %2356 = vst [vmem:[%s4578_s27 + $0xb8] sm:$0xff] %v2324_v20  ;;  %v2161_v59 = vmul.f32 %v7505_v45, %v6396_v54  ;;  %v2162_v51 = vmul.f32 %v7506_v23, %v6396_v54  ;;  %v2224_v62 = vadd.f32 %v2160_v52, %v7507_v63  ;;  %v7515_v23 = vld [vmem:[#allocation32_spill] sm:$0xff] }
 0x2f9   : > { %v2505_v31 = vmax.f32 %v2504_v19, %v6516_v61  ;;  %v2285_v41 = vmul.f32 30.0, %v2221_v46  ;;  %v2286_v34 = vmul.f32 30.0, %v2222_v8  ;;  %v2287_v20 = vmul.f32 30.0, %v2223_v25  ;;  %v3041_v19 = vld [vmem:[#allocation4 + $0x78] sm:$0xff]  ;;  %v7512_v46 = vld [vmem:[#allocation102_spill] sm:$0xff]  ;;  %v7514_v25 = vld [vmem:[#allocation105_spill] sm:$0xff] }
 0x2fa   : > { %v2092_v7 = vsel %vm2060_vm6, %v2028_v24, %v6387_v30  ;;  %v2288_v33 = vmul.f32 30.0, %v2224_v62  ;;  %v7510_v30 = vld [vmem:[#allocation121_spill] sm:$0xff]  ;;  %v2163_v8 = vmul.f32 %v7512_v46, %v6396_v54  ;;  %v2164_v45 = vmul.f32 %v7514_v25, %v6396_v54  ;;  %v7519_v46 = vld [vmem:[#allocation107_spill] sm:$0xff] }
 0x2fb   : > { %v6542_v0 = vsub.f32 %v2092_v7, %v6310_v17  ;;  %v3057_v21 = vmul.f32 30.0, %v2092_v7  ;;  %v2506_v29 = vmax.f32 %v2505_v31, %v6520_v43  ;;  %v2325_v12 = vpack.c.bf16 %v2286_v34, %v2285_v41 }
 0x2fc   : > { %v6547_v57 = vsel %vm2365_vm12, %v2285_v41, -inf  ;;  %v6551_v16 = vsel %vm2366_vm13, %v2286_v34, -inf  ;;  %v6556_v17 = vsel %vm2367_vm14, %v2287_v20, -inf  ;;  %v2326_v31 = vpack.c.bf16 %v2288_v33, %v2287_v20  ;;  %v7516_v41 = vld [vmem:[#allocation33_spill] sm:$0xff] }
 0x2fd   : > { %7508 = vst [vmem:[#allocation49_spill] sm:$0xff] %v6547_v57  ;;  %v3073_v24 = vmul.f32 %v7510_v30, %v3057_v21  ;;  %2507 = vmax.xlane.f32.xlu0 %v2506_v29  ;;  %v2509_v52 = vmax.f32 %v6547_v57, %v6551_v16  ;;  %v6565_v10 = vsel %vm2368_vm0, %v2288_v33, -inf  ;;  %v2225_v7 = vadd.f32 %v2161_v59, %v7515_v23  ;;  %v7517_v21 = vld [vmem:[#allocation100_spill] sm:$0xff]  ;;  %v7518_v30 = vld [vmem:[#allocation103_spill] sm:$0xff] }
 0x2fe   : > { %7509 = vst [vmem:[#allocation51_spill] sm:$0xff] %v6551_v16  ;;  %v2226_v34 = vadd.f32 %v2162_v51, %v7516_v41  ;;  %v2227_v29 = vadd.f32 %v2163_v8, %v7517_v21  ;;  %v2228_v20 = vadd.f32 %v2164_v45, %v7518_v30  ;;  %v2165_v33 = vmul.f32 %v7519_v46, %v6465_v37  ;;  %v7520_v16 = vld [vmem:[#allocation104_spill] sm:$0xff]  ;;  %v7523_v45 = vld [vmem:[#allocation34_spill] sm:$0xff] }
 0x2ff   : > { %7511 = vst [vmem:[#allocation14_spill] sm:$0xff] %v6556_v17  ;;  %v3089_v63 = vadd.f32 %v3073_v24, %v3041_v19  ;;  %v2510_v62 = vmax.f32 %v2509_v52, %v6556_v17  ;;  %v2166_v57 = vmul.f32 %v7520_v16, %v6465_v37  ;;  %v7521_v51 = vld [vmem:[#allocation108_spill] sm:$0xff] }
 0x300   : > { %2357 = vst [vmem:[%s4578_s27 + $0xc0] sm:$0xff] %v2325_v12  ;;  %v2289_v12 = vmul.f32 30.0, %v2225_v7  ;;  %v2290_v59 = vmul.f32 30.0, %v2226_v34  ;;  %v2291_v19 = vmul.f32 30.0, %v2227_v29  ;;  %v2167_v24 = vmul.f32 %v7521_v51, %v6465_v37  ;;  %v6590_v23 = vld [vmem:[#allocation2] sm:$0xff]  ;;  %v2453_v7 = vpop.xlane.xlu1 %2452  ;;  %v7525_v34 = vld [vmem:[#allocation35_spill] sm:$0xff] }
 0x301   : > { %7513 = vst [vmem:[#allocation15_spill] sm:$0xff] %v6565_v10  ;;  %v2511_v54 = vmax.f32 %v2510_v62, %v6565_v10  ;;  %v2292_v52 = vmul.f32 30.0, %v2228_v20  ;;  %v2229_v16 = vadd.f32 %v2165_v33, %v7523_v45  ;;  %v2230_v21 = vadd.f32 %v2166_v57, %v7525_v34  ;;  %v7526_v20 = vld [vmem:[#allocation106_spill] sm:$0xff]  ;;  %v7527_v33 = vld [vmem:[#allocation109_spill] sm:$0xff]  ;;  %v7537_v10 = vld [vmem:[#allocation115_spill] sm:$0xff] }
 0x302   : > { %2358 = vst [vmem:[%s4578_s27 + $0xc8] sm:$0xff] %v2326_v31  ;;  %v6585_v8 = vsel %vm2365_vm12, %v2289_v12, -inf  ;;  %v7522_v31 = vld [vmem:[#allocation111_spill] sm:$0xff]  ;;  %v6598_v62 = vsel %vm2367_vm14, %v2291_v19, -inf  ;;  %v2327_v41 = vpack.c.bf16 %v2290_v59, %v2289_v12  ;;  %v2231_v46 = vadd.f32 %v2167_v24, %v7526_v20  ;;  %v2458_v20 = vpop.xlane.xlu2 %2457 }
 0x303   : > { %3105 = vst.msk [vmem:[#allocation4 + $0x78] sm:$0xff] %vm2993_vm4, %v3089_v63  ;;  %v2168_v25 = vmul.f32 %v7522_v31, %v6465_v37  ;;  %2512 = vmax.xlane.f32.xlu1 %v2511_v54  ;;  %v6594_v63 = vsel %vm2366_vm13, %v2290_v59, -inf  ;;  %v2328_v29 = vpack.c.bf16 %v2292_v52, %v2291_v19  ;;  %v6603_v37 = vsel %vm2368_vm0, %v2292_v52, -inf  ;;  %v7528_v59 = vld [vmem:[#allocation113_spill] sm:$0xff]  ;;  %v7529_v52 = vld [vmem:[#allocation110_spill] sm:$0xff] }
 0x304   : > { %7524 = vst [vmem:[#allocation50_spill] sm:$0xff] %v6590_v23  ;;  %v2514_v30 = vmax.f32 %v6585_v8, %v6594_v63  ;;  %v2293_v51 = vmul.f32 30.0, %v2229_v16  ;;  %v2294_v31 = vmul.f32 30.0, %v2230_v21  ;;  %v6611_v45 = vmax.f32 %v6590_v23, %v2453_v7  ;;  %v7535_v23 = vld [vmem:[#allocation37_spill] sm:$0xff] }
 0x305   : > { %2359 = vst [vmem:[%s4578_s27 + $0xd0] sm:$0xff] %v2327_v41  ;;  %v2232_v54 = vadd.f32 %v2168_v25, %v7527_v33  ;;  %v2295_v12 = vmul.f32 30.0, %v2231_v46  ;;  %v2169_v19 = vmul.f32 %v7528_v59, %v6542_v0  ;;  %v2170_v34 = vmul.f32 %v7529_v52, %v6542_v0  ;;  %v7534_v52 = vld [vmem:[#allocation36_spill] sm:$0xff] }
 0x306   : > { %2360 = vst [vmem:[%s4578_s27 + $0xd8] sm:$0xff] %v2328_v29  ;;  %v2515_v57 = vmax.f32 %v2514_v30, %v6598_v62  ;;  %v6621_v25 = vsel %vm2365_vm12, %v2293_v51, -inf  ;;  %v6625_v16 = vsel %vm2366_vm13, %v2294_v31, -inf  ;;  %v2329_v7 = vpack.c.bf16 %v2294_v31, %v2293_v51  ;;  %v6634_v30 = vld [vmem:[#allocation2 + $0x8] sm:$0xff]  ;;  %v7533_v31 = vld [vmem:[#allocation116_spill] sm:$0xff] }
 0x307   : > { %v2296_v24 = vmul.f32 30.0, %v2232_v54  ;;  %7530 = vst [vmem:[#allocation52_spill] sm:$0xff] %v6621_v25  ;;  %v2519_v21 = vmax.f32 %v6621_v25, %v6625_v16  ;;  %v6638_v33 = vsel %vm2367_vm14, %v2295_v12, -inf  ;;  %v7532_v54 = vld [vmem:[#allocation114_spill] sm:$0xff]  ;;  %v2233_v29 = vadd.f32 %v2169_v19, %v7534_v52 }
 0x308   : > { %7531 = vst [vmem:[#allocation53_spill] sm:$0xff] %v6625_v16  ;;  %v2516_v41 = vmax.f32 %v2515_v57, %v6603_v37  ;;  %v2171_v51 = vmul.f32 %v7532_v54, %v6542_v0  ;;  %v2172_v57 = vmul.f32 %v7533_v31, %v6542_v0  ;;  %v2234_v16 = vadd.f32 %v2170_v34, %v7535_v23 }
 0x309   : > { %3010 = vst.msk [vmem:[#allocation2] sm:$0xff] %vm2993_vm4, %v6611_v45  ;;  %v2330_v46 = vpack.c.bf16 %v2296_v24, %v2295_v12  ;;  %v2520_v59 = vmax.f32 %v2519_v21, %v6638_v33  ;;  %v6651_v25 = vsel %vm2368_vm0, %v2296_v24, -inf  ;;  %v7536_v12 = vld [vmem:[#allocation112_spill] sm:$0xff]  ;;  %v6656_v54 = vmax.f32 %v6634_v30, %v2458_v20  ;;  %v6663_v24 = vld [vmem:[#allocation2 + $0x10] sm:$0xff] }
 0x30a   : > { %2361 = vst [vmem:[%s4578_s27 + $0xe0] sm:$0xff] %v2329_v7  ;;  %2517 = vmax.xlane.f32.xlu2 %v2516_v41  ;;  %v2235_v7 = vadd.f32 %v2171_v51, %v7536_v12  ;;  %v2236_v17 = vadd.f32 %v2172_v57, %v7537_v10  ;;  %v2297_v41 = vmul.f32 30.0, %v2233_v29  ;;  %v2298_v21 = vmul.f32 30.0, %v2234_v16  ;;  %v2463_v29 = vpop.xlane.xlu0 %2462 }
 0x30b   : > { %2362 = vst [vmem:[%s4578_s27 + $0xe8] sm:$0xff] %v2330_v46  ;;  %v2521_v0 = vmax.f32 %v2520_v59, %v6651_v25  ;;  %v6681_v31 = vmax.f32 %v6663_v24, %v2463_v29  ;;  %v6694_v59 = vld [vmem:[#allocation2 + $0x18] sm:$0xff] }
 0x30c   : > { %v2299_v19 = vmul.f32 30.0, %v2235_v7  ;;  %v2300_v23 = vmul.f32 30.0, %v2236_v17  ;;  %3011 = vst.msk [vmem:[#allocation2 + $0x8] sm:$0xff] %vm2993_vm4, %v6656_v54  ;;  %v2331_v10 = vpack.c.bf16 %v2298_v21, %v2297_v41  ;;  %v6667_v20 = vsel %vm2365_vm12, %v2297_v41, -inf  ;;  %v6705_v7 = vld [vmem:[#allocation2 + $0x20] sm:$0xff] }
 0x30d   : > { %2522 = vmax.xlane.f32.xlu0 %v2521_v0  ;;  %v6671_v16 = vsel %vm2366_vm13, %v2298_v21, -inf  ;;  %3012 = vst.msk [vmem:[#allocation2 + $0x10] sm:$0xff] %vm2993_vm4, %v6681_v31 }
 0x30e   : > { %v2332_v17 = vpack.c.bf16 %v2300_v23, %v2299_v19  ;;  %v2524_v46 = vmax.f32 %v6667_v20, %v6671_v16  ;;  %2363 = vst [vmem:[%s4578_s27 + $0xf0] sm:$0xff] %v2331_v10  ;;  %v6678_v51 = vsel %vm2367_vm14, %v2299_v19, -inf  ;;  %v6687_v11 = vsel %vm2368_vm0, %v2300_v23, -inf  ;;  %v6717_v19 = vld [vmem:[#allocation2 + $0x28] sm:$0xff] }
 0x310   : > { %2364 = vst [vmem:[%s4578_s27 + $0xf8] sm:$0xff] %v2332_v17  ;;  %v2525_v5 = vmax.f32 %v2524_v46, %v6678_v51  ;;  %v6727_v17 = vld [vmem:[#allocation2 + $0x30] sm:$0xff] }
 0x311   : > { %7539 = vst [vmem:[#allocation16_spill] sm:$0xff] %v6727_v17 }
 0x312   : > { %v2526_v15 = vmax.f32 %v2525_v5, %v6687_v11 }
 0x314   : > { %2527 = vmax.xlane.f32.xlu1 %v2526_v15 }
 0x316   : > { %v2468_v52 = vpop.xlane.xlu1 %2467 }
 0x317   : > { %v6697_v12 = vmax.f32 %v6694_v59, %v2468_v52  ;;  %v6737_v52 = vld [vmem:[#allocation2 + $0x38] sm:$0xff] }
 0x318   : > { %7541 = vst [vmem:[#allocation54_spill] sm:$0xff] %v6737_v52 }
 0x319   : > { %3013 = vst.msk [vmem:[#allocation2 + $0x18] sm:$0xff] %vm2993_vm4, %v6697_v12 }
 0x321   : > { %2632 = vperm.xlu0 %4032, %v6656_v54   ;;  %v2473_v0 = vpop.xlane.xlu2 %2472 }
 0x322   : > { %2627 = vperm.xlu2 %4034, %v6611_v45   ;;  %v6708_v41 = vmax.f32 %v6705_v7, %v2473_v0 }
 0x324   : > { %3014 = vst.msk [vmem:[#allocation2 + $0x20] sm:$0xff] %vm2993_vm4, %v6708_v41 }
 0x329   : > { %2642 = vperm.xlu0 %4032, %v6697_v12  }
 0x32a   : > { %2647 = vperm.xlu2 %4034, %v6708_v41  }
 0x32d   : > { %2637 = vperm.xlu1 %4033, %v6681_v31  }
 0x32e   : > { %v2478_v23 = vpop.xlane.xlu0 %2477 }
 0x32f   : > { %v6720_v10 = vmax.f32 %v6717_v19, %v2478_v23 }
 0x331   : > { %7538 = vst [vmem:[#allocation55_spill] sm:$0xff] %v6720_v10 }
 0x332   : > { %3015 = vst.msk [vmem:[#allocation2 + $0x28] sm:$0xff] %vm2993_vm4, %v6720_v10 }
 0x335   : > { %2652 = vperm.xlu1 %4033, %v6720_v10  }
 0x33b   : > { %v2483_v46 = vpop.xlane.xlu1 %2482 }
 0x33c   : > { %v6730_v5 = vmax.f32 %v6727_v17, %v2483_v46  ;;  %v6747_v46 = vld [vmem:[#allocation2 + $0x40] sm:$0xff] }
 0x33d   : > { %7543 = vst [vmem:[#allocation59_spill] sm:$0xff] %v6747_v46 }
 0x33e   : > { %7540 = vst [vmem:[#allocation17_spill] sm:$0xff] %v6730_v5  ;;  %2657 = vperm.xlu0 %4032, %v6730_v5  }
 0x33f   : > { %3016 = vst.msk [vmem:[#allocation2 + $0x30] sm:$0xff] %vm2993_vm4, %v6730_v5 }
 0x347   : > { %v2488_v0 = vpop.xlane.xlu2 %2487 }
 0x348   : > { %v6740_v23 = vmax.f32 %v6737_v52, %v2488_v0  ;;  %v6757_v0 = vld [vmem:[#allocation2 + $0x48] sm:$0xff] }
 0x349   : > { %7545 = vst [vmem:[#allocation60_spill] sm:$0xff] %v6757_v0 }
 0x34a   : > { %7542 = vst [vmem:[#allocation56_spill] sm:$0xff] %v6740_v23  ;;  %2662 = vperm.xlu2 %4034, %v6740_v23  }
 0x34b   : > { %3017 = vst.msk [vmem:[#allocation2 + $0x38] sm:$0xff] %vm2993_vm4, %v6740_v23 }
 0x354   : > { %v2493_v15 = vpop.xlane.xlu0 %2492 }
 0x355   : > { %v6750_v21 = vmax.f32 %v6747_v46, %v2493_v15  ;;  %v6767_v15 = vld [vmem:[#allocation2 + $0x50] sm:$0xff] }
 0x356   : > { %7547 = vst [vmem:[#allocation18_spill] sm:$0xff] %v6767_v15 }
 0x357   : > { %7544 = vst [vmem:[#allocation57_spill] sm:$0xff] %v6750_v21  ;;  %2667 = vperm.xlu1 %4033, %v6750_v21  }
 0x358   : > { %3018 = vst.msk [vmem:[#allocation2 + $0x40] sm:$0xff] %vm2993_vm4, %v6750_v21 }
 0x360   : > { %v2498_v29 = vpop.xlane.xlu1 %2497 }
 0x361   : > { %v6760_v28 = vmax.f32 %v6757_v0, %v2498_v29  ;;  %v6777_v29 = vld [vmem:[#allocation2 + $0x58] sm:$0xff] }
 0x362   : > { %7549 = vst [vmem:[#allocation58_spill] sm:$0xff] %v6777_v29 }
 0x363   : > { %7546 = vst [vmem:[#allocation61_spill] sm:$0xff] %v6760_v28  ;;  %2672 = vperm.xlu0 %4032, %v6760_v28  }
 0x364   : > { %3019 = vst.msk [vmem:[#allocation2 + $0x48] sm:$0xff] %vm2993_vm4, %v6760_v28 }
 0x368   : > { %v2503_v57 = vpop.xlane.xlu2 %2502 }
 0x369   : > { %v6770_v46 = vmax.f32 %v6767_v15, %v2503_v57  ;;  %v6787_v57 = vld [vmem:[#allocation2 + $0x60] sm:$0xff] }
 0x36a   : > { %7551 = vst [vmem:[#allocation117_spill] sm:$0xff] %v6787_v57 }
 0x36b   : > { %7548 = vst [vmem:[#allocation19_spill] sm:$0xff] %v6770_v46  ;;  %2677 = vperm.xlu2 %4034, %v6770_v46  }
 0x36c   : > { %3020 = vst.msk [vmem:[#allocation2 + $0x50] sm:$0xff] %vm2993_vm4, %v6770_v46 }
 0x370   : > { %v2508_v34 = vpop.xlane.xlu0 %2507 }
 0x371   : > { %v6780_v0 = vmax.f32 %v6777_v29, %v2508_v34  ;;  %v6797_v34 = vld [vmem:[#allocation2 + $0x68] sm:$0xff] }
 0x372   : > { %7553 = vst [vmem:[#allocation63_spill] sm:$0xff] %v6797_v34 }
 0x373   : > { %7550 = vst [vmem:[#allocation62_spill] sm:$0xff] %v6780_v0  ;;  %2682 = vperm.xlu1 %4033, %v6780_v0  }
 0x374   : > { %3021 = vst.msk [vmem:[#allocation2 + $0x58] sm:$0xff] %vm2993_vm4, %v6780_v0  ;;  %v6802_v0 = vld [vmem:[#allocation2 + $0x70] sm:$0xff] }
 0x375   : > { %7555 = vst [vmem:[#allocation67_spill] sm:$0xff] %v6802_v0 }
 0x376   : > { %v2513_v21 = vpop.xlane.xlu1 %2512 }
 0x377   : > { %v6790_v15 = vmax.f32 %v6787_v57, %v2513_v21 }
 0x379   : > { %7552 = vst [vmem:[#allocation65_spill] sm:$0xff] %v6790_v15  ;;  %2687 = vperm.xlu0 %4032, %v6790_v15  }
 0x37a   : > { %3022 = vst.msk [vmem:[#allocation2 + $0x60] sm:$0xff] %vm2993_vm4, %v6790_v15 }
 0x37d   : > { %v2518_v28 = vpop.xlane.xlu2 %2517 }
 0x37e   : > { %v6800_v29 = vmax.f32 %v6797_v34, %v2518_v28  ;;  %v6817_v28 = vld [vmem:[#allocation2 + $0x78] sm:$0xff] }
 0x37f   : > { %7557 = vst [vmem:[#allocation21_spill] sm:$0xff] %v6817_v28 }
 0x380   : > { %7554 = vst [vmem:[#allocation66_spill] sm:$0xff] %v6800_v29  ;;  %2692 = vperm.xlu2 %4034, %v6800_v29   ;;  %v2523_v46 = vpop.xlane.xlu0 %2522 }
 0x381   : > { %3023 = vst.msk [vmem:[#allocation2 + $0x68] sm:$0xff] %vm2993_vm4, %v6800_v29  ;;  %v6810_v57 = vmax.f32 %v6802_v0, %v2523_v46 }
 0x383   : > { %7556 = vst [vmem:[#allocation20_spill] sm:$0xff] %v6810_v57  ;;  %2697 = vperm.xlu1 %4033, %v6810_v57  }
 0x384   : > { %3024 = vst.msk [vmem:[#allocation2 + $0x70] sm:$0xff] %vm2993_vm4, %v6810_v57 }
 0x385   : > { %v2628_v34 = vpop.permute.xlu2 %2627 }
 0x386   : > { %v2705_v46 = vsub.f32 %v5785_v38, %v2628_v34  ;;  %v2706_v15 = vsub.f32 %v5794_v47, %v2628_v34  ;;  %v2707_v57 = vsub.f32 %v5806_v13, %v2628_v34 }
 0x387   : > { %v2528_v21 = vpop.xlane.xlu1 %2527 }
 0x388   : > { %v6820_v5 = vmax.f32 %v6817_v28, %v2528_v21  ;;  %v2769_v0 = vmul.f32 1.442695, %v2705_v46  ;;  %v2771_v17 = vmul.f32 1.442695, %v2706_v15  ;;  %v2708_v21 = vsub.f32 %v5822_v44, %v2628_v34 }
 0x389   : > { %v2773_v52 = vmul.f32 1.442695, %v2707_v57 }
 0x38a   : > { %7558 = vst [vmem:[#allocation64_spill] sm:$0xff] %v6820_v5  ;;  %2702 = vperm.xlu0 %4032, %v6820_v5   ;;  %4067 = vpow2.f32 %v2769_v0  ;;  %v2775_v46 = vmul.f32 1.442695, %v2708_v21 }
 0x38b   : > { %3025 = vst.msk [vmem:[#allocation2 + $0x78] sm:$0xff] %vm2993_vm4, %v6820_v5  ;;  %4069 = vpow2.f32 %v2771_v17 }
 0x38c   : > { %4071 = vpow2.f32 %v2773_v52 }
 0x38d   : > { %v6830_v23 = vpop.permute.xlu2 %2647 }
 0x38e   : > { %v2721_v29 = vsub.f32 %v6052_v26, %v6830_v23  ;;  %v2722_v38 = vsub.f32 %v6058_v2, %v6830_v23  ;;  %v2723_v15 = vsub.f32 %v6067_v48, %v6830_v23 }
 0x390   : > { %v2801_v34 = vmul.f32 1.442695, %v2721_v29  ;;  %v2803_v17 = vmul.f32 1.442695, %v2722_v38  ;;  %v4068_v5 = vpop.eup %4067  ;;  %v2805_v2 = vmul.f32 1.442695, %v2723_v15 }
 0x393   : > { %v2633_v28 = vpop.permute.xlu0 %2632 }
 0x394   : > { %v2709_v47 = vsub.f32 %v5876_v53, %v2633_v28  ;;  %v2710_v13 = vsub.f32 %v5880_v14, %v2633_v28  ;;  %v2711_v44 = vsub.f32 %v5893_v35, %v2633_v28  ;;  %v2712_v26 = vsub.f32 %v5904_v60, %v2633_v28  ;;  %v4070_v53 = vpop.eup %4069 }
 0x395   : > { %v4072_v29 = vpop.eup %4071  ;;  %v2897_v60 = vadd.f32 %v4070_v53, %v4068_v5 }
 0x396   : > { %v2777_v0 = vmul.f32 1.442695, %v2709_v47  ;;  %v2779_v57 = vmul.f32 1.442695, %v2710_v13  ;;  %v2781_v14 = vmul.f32 1.442695, %v2711_v44 }
 0x397   : > { %v2783_v10 = vmul.f32 1.442695, %v2712_v26 }
 0x398   : > { %4073 = vpow2.f32 %v2777_v0 }
 0x399   : > { %4075 = vpow2.f32 %v2779_v57 }
 0x39a   : > { %4077 = vpow2.f32 %v2775_v46  ;;  %v2724_v46 = vsub.f32 %v6076_v58, %v6830_v23 }
 0x39b   : > { %4079 = vpow2.f32 %v2801_v34  ;;  %v2643_v48 = vpop.permute.xlu0 %2642 }
 0x39c   : > { %4081 = vpow2.f32 %v2803_v17  ;;  %v2717_v35 = vsub.f32 %v5994_v39, %v2643_v48  ;;  %v2718_v21 = vsub.f32 %v5999_v49, %v2643_v48  ;;  %v2719_v52 = vsub.f32 %v6012_v32, %v2643_v48 }
 0x39d   : > { %4083 = vpow2.f32 %v2805_v2  ;;  %v2720_v38 = vsub.f32 %v6018_v40, %v2643_v48  ;;  %v2898_v40 = vadd.f32 %v4072_v29, %v2897_v60  ;;  %v2807_v48 = vmul.f32 1.442695, %v2724_v46  ;;  %v7559_v60 = vld [vmem:[#allocation11_spill] sm:$0xff] }
 0x39e   : > { %v4074_v28 = vpop.eup %4073  ;;  %4085 = vpow2.f32 %v2781_v14  ;;  %v2793_v47 = vmul.f32 1.442695, %v2717_v35  ;;  %v2795_v13 = vmul.f32 1.442695, %v2718_v21  ;;  %v2797_v44 = vmul.f32 1.442695, %v2719_v52 }
 0x39f   : > { %v4076_v15 = vpop.eup %4075  ;;  %4087 = vpow2.f32 %v2783_v10  ;;  %v2638_v39 = vpop.permute.xlu1 %2637  ;;  %v2799_v17 = vmul.f32 1.442695, %v2720_v38  ;;  %v7562_v46 = vld [vmem:[#allocation39_spill] sm:$0xff] }
 0x3a0   : > { %v4078_v0 = vpop.eup %4077  ;;  %4089 = vpow2.f32 %v2793_v47  ;;  %v2713_v49 = vsub.f32 %v5939_v9, %v2638_v39  ;;  %v2714_v32 = vsub.f32 %v5943_v18, %v2638_v39  ;;  %v2715_v5 = vsub.f32 %v5954_v42, %v2638_v39  ;;  %v7561_v47 = vld [vmem:[#allocation44_spill] sm:$0xff] }
 0x3a1   : > { %v4080_v57 = vpop.eup %4079  ;;  %4091 = vpow2.f32 %v2795_v13  ;;  %v2902_v34 = vadd.f32 %v4076_v15, %v4074_v28  ;;  %v2716_v2 = vsub.f32 %v5964_v3, %v2638_v39  ;;  %v2899_v21 = vadd.f32 %v4078_v0, %v2898_v40  ;;  %v7560_v28 = vld [vmem:[#allocation42_spill] sm:$0xff]  ;;  %v7563_v39 = vld [vmem:[#allocation8_spill] sm:$0xff] }
 0x3a2   : > { %v4082_v26 = vpop.eup %4081  ;;  %v2785_v58 = vmul.f32 1.442695, %v2713_v49  ;;  %v2787_v10 = vmul.f32 1.442695, %v2714_v32  ;;  %4093 = vpow2.f32 %v2797_v44  ;;  %v2789_v53 = vmul.f32 1.442695, %v2715_v5 }
 0x3a3   : > { %v4084_v23 = vpop.eup %4083  ;;  %v2791_v35 = vmul.f32 1.442695, %v2716_v2  ;;  %v2917_v40 = vadd.f32 %v4082_v26, %v4080_v57 }
 0x3a4   : > { %v4086_v14 = vpop.eup %4085  ;;  %4095 = vpow2.f32 %v2785_v58  ;;  %v2663_v52 = vpop.permute.xlu2 %2662  ;;  %v7564_v58 = vld [vmem:[#allocation9_spill] sm:$0xff] }
 0x3a5   : > { %v4088_v9 = vpop.eup %4087  ;;  %4097 = vpow2.f32 %v2787_v10  ;;  %v2903_v18 = vadd.f32 %v4086_v14, %v2902_v34  ;;  %v2733_v3 = vsub.f32 %v7559_v60, %v2663_v52  ;;  %v2734_v38 = vsub.f32 %v7560_v28, %v2663_v52  ;;  %v7565_v60 = vld [vmem:[#allocation45_spill] sm:$0xff] }
 0x3a6   : > { %v4090_v42 = vpop.eup %4089  ;;  %4099 = vpow2.f32 %v2799_v17  ;;  %v2735_v13 = vsub.f32 %v7561_v47, %v2663_v52  ;;  %v2736_v28 = vsub.f32 %v7565_v60, %v2663_v52  ;;  %v2918_v57 = vadd.f32 %v4084_v23, %v2917_v40 }
 0x3a7   : > { %v4092_v29 = vpop.eup %4091  ;;  %4101 = vpow2.f32 %v2789_v53  ;;  %v2653_v15 = vpop.permute.xlu1 %2652  ;;  %v2825_v5 = vmul.f32 1.442695, %v2733_v3  ;;  %v2827_v34 = vmul.f32 1.442695, %v2734_v38  ;;  %v2904_v0 = vadd.f32 %v4088_v9, %v2903_v18 }
 0x3a8   : > { %4103 = vpow2.f32 %v2807_v48  ;;  %v2725_v44 = vsub.f32 %v7562_v46, %v2653_v15  ;;  %v2726_v49 = vsub.f32 %v7563_v39, %v2653_v15  ;;  %v4094_v32 = vpop.eup %4093  ;;  %v2829_v2 = vmul.f32 1.442695, %v2735_v13  ;;  %v7566_v48 = vld [vmem:[#allocation38_spill] sm:$0xff] }
 0x3a9   : > { %2900 = vadd.xlane.f32.xlu2 %v2899_v21  ;;  %4105 = vpow2.f32 %v2791_v35  ;;  %v2727_v10 = vsub.f32 %v7564_v58, %v2653_v15  ;;  %v2912_v53 = vadd.f32 %v4092_v29, %v4090_v42  ;;  %v2728_v21 = vsub.f32 %v7566_v48, %v2653_v15 }
 0x3aa   : > { %v4096_v17 = vpop.eup %4095  ;;  %4107 = vpow2.f32 %v2825_v5  ;;  %v2809_v47 = vmul.f32 1.442695, %v2725_v44  ;;  %v2811_v39 = vmul.f32 1.442695, %v2726_v49  ;;  %v2831_v29 = vmul.f32 1.442695, %v2736_v28 }
 0x3ab   : > { %v4098_v14 = vpop.eup %4097  ;;  %4109 = vpow2.f32 %v2827_v34  ;;  %v2913_v3 = vadd.f32 %v4094_v32, %v2912_v53  ;;  %v2813_v18 = vmul.f32 1.442695, %v2727_v10  ;;  %v2815_v13 = vmul.f32 1.442695, %v2728_v21  ;;  %v7567_v34 = vld [vmem:[#allocation40_spill] sm:$0xff]  ;;  %v7570_v10 = vld [vmem:[#allocation10_spill] sm:$0xff] }
 0x3ac   : > { %v4100_v46 = vpop.eup %4099  ;;  %v2907_v38 = vadd.f32 %v4098_v14, %v4096_v17  ;;  %4111 = vpow2.f32 %v2829_v2  ;;  %v7569_v17 = vld [vmem:[#allocation43_spill] sm:$0xff] }
 0x3ad   : > { %v4102_v9 = vpop.eup %4101  ;;  %2905 = vadd.xlane.f32.xlu1 %v2904_v0  ;;  %v2914_v35 = vadd.f32 %v4100_v46, %v2913_v3  ;;  %4113 = vpow2.f32 %v2809_v47  ;;  %v7568_v0 = vld [vmem:[#allocation41_spill] sm:$0xff] }
 0x3ae   : > { %v4104_v26 = vpop.eup %4103  ;;  %v2908_v42 = vadd.f32 %v4102_v9, %v2907_v38  ;;  %4115 = vpow2.f32 %v2811_v39 }
 0x3af   : > { %v4106_v52 = vpop.eup %4105  ;;  %4117 = vpow2.f32 %v2813_v18  ;;  %v2919_v49 = vadd.f32 %v4104_v26, %v2918_v57 }
 0x3b0   : > { %v4108_v15 = vpop.eup %4107  ;;  %v2658_v32 = vpop.permute.xlu0 %2657  ;;  %v2909_v5 = vadd.f32 %v4106_v52, %v2908_v42  ;;  %4119 = vpow2.f32 %v2831_v29 }
 0x3b1   : > { %2915 = vadd.xlane.f32.xlu2 %v2914_v35  ;;  %v4110_v44 = vpop.eup %4109  ;;  %v2729_v23 = vsub.f32 %v7567_v34, %v2658_v32  ;;  %v2730_v40 = vsub.f32 %v7568_v0, %v2658_v32  ;;  %v2731_v2 = vsub.f32 %v7569_v17, %v2658_v32  ;;  %4121 = vpow2.f32 %v2815_v13 }
 0x3b2   : > { %v4112_v58 = vpop.eup %4111  ;;  %v2732_v53 = vsub.f32 %v7570_v10, %v2658_v32  ;;  %v2932_v14 = vadd.f32 %v4110_v44, %v4108_v15 }
 0x3b3   : > { %v4114_v60 = vpop.eup %4113  ;;  %v2817_v28 = vmul.f32 1.442695, %v2729_v23  ;;  %v2819_v48 = vmul.f32 1.442695, %v2730_v40  ;;  %v2821_v47 = vmul.f32 1.442695, %v2731_v2 }
 0x3b4   : > { %2910 = vadd.xlane.f32.xlu0 %v2909_v5  ;;  %v4116_v21 = vpop.eup %4115  ;;  %v2933_v46 = vadd.f32 %v4112_v58, %v2932_v14  ;;  %v2823_v38 = vmul.f32 1.442695, %v2732_v53  ;;  %v7571_v53 = vld [vmem:[#allocation47_spill] sm:$0xff] }
 0x3b5   : > { %2920 = vadd.xlane.f32.xlu1 %v2919_v49  ;;  %4123 = vpow2.f32 %v2817_v28  ;;  %v2922_v39 = vadd.f32 %v4116_v21, %v4114_v60  ;;  %v4118_v3 = vpop.eup %4117  ;;  %v7572_v60 = vld [vmem:[#allocation12_spill] sm:$0xff] }
 0x3b6   : > { %4125 = vpow2.f32 %v2819_v48  ;;  %v4120_v9 = vpop.eup %4119  ;;  %v7573_v48 = vld [vmem:[#allocation13_spill] sm:$0xff] }
 0x3b7   : > { %v2923_v57 = vadd.f32 %v4118_v3, %v2922_v39  ;;  %v4122_v26 = vpop.eup %4121  ;;  %4127 = vpow2.f32 %v2821_v47  ;;  %v2934_v18 = vadd.f32 %v4120_v9, %v2933_v46 }
 0x3b8   : > { %4129 = vpow2.f32 %v2823_v38 }
 0x3b9   : > { %v2924_v35 = vadd.f32 %v4122_v26, %v2923_v57 }
 0x3bb   : > { %v4124_v42 = vpop.eup %4123 }
 0x3bc   : > { %2925 = vadd.xlane.f32.xlu0 %v2924_v35  ;;  %v4126_v29 = vpop.eup %4125 }
 0x3bd   : > { %2935 = vadd.xlane.f32.xlu1 %v2934_v18  ;;  %v2927_v52 = vadd.f32 %v4126_v29, %v4124_v42  ;;  %v4128_v13 = vpop.eup %4127 }
 0x3be   : > { %v4130_v44 = vpop.eup %4129 }
 0x3bf   : > { %v2928_v15 = vadd.f32 %v4128_v13, %v2927_v52  ;;  %v7575_v13 = vld [vmem:[#allocation48_spill] sm:$0xff] }
 0x3c1   : > { %v2929_v49 = vadd.f32 %v4130_v44, %v2928_v15 }
 0x3c3   : > { %2930 = vadd.xlane.f32.xlu2 %v2929_v49 }
 0x3c5   : > { %v2678_v32 = vpop.permute.xlu2 %2677 }
 0x3c6   : > { %v2745_v5 = vsub.f32 %v6458_v27, %v2678_v32  ;;  %v2746_v34 = vsub.f32 %v6462_v50, %v2678_v32  ;;  %v2747_v23 = vsub.f32 %v6469_v4, %v2678_v32  ;;  %v2748_v0 = vsub.f32 %v6473_v1, %v2678_v32  ;;  %v7574_v4 = vld [vmem:[#allocation46_spill] sm:$0xff] }
 0x3c8   : > { %v2849_v40 = vmul.f32 1.442695, %v2745_v5  ;;  %v2851_v17 = vmul.f32 1.442695, %v2746_v34  ;;  %v2853_v2 = vmul.f32 1.442695, %v2747_v23 }
 0x3c9   : > { %v2855_v58 = vmul.f32 1.442695, %v2748_v0  ;;  %v2668_v10 = vpop.permute.xlu1 %2667 }
 0x3ca   : > { %4131 = vpow2.f32 %v2849_v40  ;;  %v2737_v14 = vsub.f32 %v7571_v53, %v2668_v10  ;;  %v2738_v28 = vsub.f32 %v7572_v60, %v2668_v10  ;;  %v2739_v21 = vsub.f32 %v7573_v48, %v2668_v10 }
 0x3cb   : > { %4133 = vpow2.f32 %v2851_v17  ;;  %v2740_v47 = vsub.f32 %v7574_v4, %v2668_v10 }
 0x3cc   : > { %4135 = vpow2.f32 %v2853_v2  ;;  %v2833_v27 = vmul.f32 1.442695, %v2737_v14  ;;  %v2835_v50 = vmul.f32 1.442695, %v2738_v28  ;;  %v2837_v46 = vmul.f32 1.442695, %v2739_v21 }
 0x3cd   : > { %4137 = vpow2.f32 %v2855_v58  ;;  %v2839_v3 = vmul.f32 1.442695, %v2740_v47 }
 0x3ce   : > { %4139 = vpow2.f32 %v2833_v27 }
 0x3cf   : > { %4141 = vpow2.f32 %v2835_v50 }
 0x3d0   : > { %v4132_v1 = vpop.eup %4131  ;;  %4143 = vpow2.f32 %v2837_v46 }
 0x3d1   : > { %v4134_v39 = vpop.eup %4133  ;;  %4145 = vpow2.f32 %v2839_v3 }
 0x3d2   : > { %v2947_v38 = vadd.f32 %v4134_v39, %v4132_v1  ;;  %v4136_v9 = vpop.eup %4135 }
 0x3d3   : > { %v4138_v57 = vpop.eup %4137 }
 0x3d4   : > { %v2948_v26 = vadd.f32 %v4136_v9, %v2947_v38  ;;  %v4140_v18 = vpop.eup %4139 }
 0x3d5   : > { %v4142_v35 = vpop.eup %4141  ;;  %v2673_v42 = vpop.permute.xlu0 %2672 }
 0x3d6   : > { %v2949_v29 = vadd.f32 %v4138_v57, %v2948_v26  ;;  %v2741_v52 = vsub.f32 %v6413_v22, %v2673_v42  ;;  %v2742_v15 = vsub.f32 %v7575_v13, %v2673_v42  ;;  %v2743_v44 = vsub.f32 %v6425_v56, %v2673_v42  ;;  %v4144_v0 = vpop.eup %4143  ;;  %v7577_v13 = vld [vmem:[#allocation51_spill] sm:$0xff] }
 0x3d7   : > { %v2937_v49 = vadd.f32 %v4142_v35, %v4140_v18  ;;  %v2744_v32 = vsub.f32 %v6432_v6, %v2673_v42  ;;  %v4146_v10 = vpop.eup %4145 }
 0x3d8   : > { %2950 = vadd.xlane.f32.xlu1 %v2949_v29  ;;  %v2841_v5 = vmul.f32 1.442695, %v2741_v52  ;;  %v2843_v34 = vmul.f32 1.442695, %v2742_v15  ;;  %v2845_v40 = vmul.f32 1.442695, %v2743_v44 }
 0x3d9   : > { %v2938_v22 = vadd.f32 %v4144_v0, %v2937_v49  ;;  %v2847_v14 = vmul.f32 1.442695, %v2744_v32  ;;  %v7576_v52 = vld [vmem:[#allocation49_spill] sm:$0xff]  ;;  %v7579_v49 = vld [vmem:[#allocation15_spill] sm:$0xff] }
 0x3da   : > { %v2693_v23 = vpop.permute.xlu2 %2692  ;;  %4147 = vpow2.f32 %v2841_v5 }
 0x3db   : > { %v2757_v17 = vsub.f32 %v6585_v8, %v2693_v23  ;;  %v2758_v2 = vsub.f32 %v6594_v63, %v2693_v23  ;;  %v2759_v58 = vsub.f32 %v6598_v62, %v2693_v23  ;;  %4149 = vpow2.f32 %v2843_v34 }
 0x3dc   : > { %v2760_v6 = vsub.f32 %v6603_v37, %v2693_v23  ;;  %v2939_v60 = vadd.f32 %v4146_v10, %v2938_v22  ;;  %4151 = vpow2.f32 %v2845_v40 }
 0x3dd   : > { %v2873_v56 = vmul.f32 1.442695, %v2757_v17  ;;  %v2875_v53 = vmul.f32 1.442695, %v2758_v2  ;;  %v2877_v28 = vmul.f32 1.442695, %v2759_v58 }
 0x3de   : > { %2940 = vadd.xlane.f32.xlu0 %v2939_v60  ;;  %v2879_v63 = vmul.f32 1.442695, %v2760_v6 }
 0x3df   : > { %4153 = vpow2.f32 %v2873_v56 }
 0x3e0   : > { %4155 = vpow2.f32 %v2875_v53  ;;  %v4148_v8 = vpop.eup %4147 }
 0x3e1   : > { %4157 = vpow2.f32 %v2847_v14  ;;  %v4150_v48 = vpop.eup %4149 }
 0x3e2   : > { %4159 = vpow2.f32 %v2877_v28  ;;  %v2942_v62 = vadd.f32 %v4150_v48, %v4148_v8  ;;  %v4152_v21 = vpop.eup %4151  ;;  %v7580_v28 = vld [vmem:[#allocation52_spill] sm:$0xff] }
 0x3e3   : > { %4161 = vpow2.f32 %v2879_v63  ;;  %v7581_v63 = vld [vmem:[#allocation53_spill] sm:$0xff] }
 0x3e4   : > { %v2943_v39 = vadd.f32 %v4152_v21, %v2942_v62 }
 0x3e5   : > { %v2683_v27 = vpop.permute.xlu1 %2682  ;;  %v4154_v50 = vpop.eup %4153 }
 0x3e6   : > { %v2749_v4 = vsub.f32 %v6506_v55, %v2683_v27  ;;  %v2750_v37 = vsub.f32 %v6510_v36, %v2683_v27  ;;  %v2751_v47 = vsub.f32 %v6516_v61, %v2683_v27  ;;  %v4156_v1 = vpop.eup %4155  ;;  %v2752_v46 = vsub.f32 %v6520_v43, %v2683_v27  ;;  %v7578_v43 = vld [vmem:[#allocation14_spill] sm:$0xff] }
 0x3e7   : > { %v4158_v3 = vpop.eup %4157  ;;  %v2962_v57 = vadd.f32 %v4156_v1, %v4154_v50 }
 0x3e8   : > { %v2857_v38 = vmul.f32 1.442695, %v2749_v4  ;;  %v2859_v9 = vmul.f32 1.442695, %v2750_v37  ;;  %v4160_v26 = vpop.eup %4159  ;;  %v2861_v18 = vmul.f32 1.442695, %v2751_v47  ;;  %v2944_v35 = vadd.f32 %v4158_v3, %v2943_v39 }
 0x3e9   : > { %v2963_v42 = vadd.f32 %v4160_v26, %v2962_v57  ;;  %v2863_v29 = vmul.f32 1.442695, %v2752_v46  ;;  %v4162_v36 = vpop.eup %4161 }
 0x3ea   : > { %4163 = vpow2.f32 %v2857_v38  ;;  %2945 = vadd.xlane.f32.xlu2 %v2944_v35 }
 0x3eb   : > { %4165 = vpow2.f32 %v2859_v9  ;;  %v2688_v55 = vpop.permute.xlu0 %2687  ;;  %v2964_v5 = vadd.f32 %v4162_v36, %v2963_v42 }
 0x3ec   : > { %v2753_v61 = vsub.f32 %v7576_v52, %v2688_v55  ;;  %v2754_v15 = vsub.f32 %v7577_v13, %v2688_v55  ;;  %v2755_v44 = vsub.f32 %v7578_v43, %v2688_v55  ;;  %4167 = vpow2.f32 %v2861_v18 }
 0x3ed   : > { %v2756_v32 = vsub.f32 %v7579_v49, %v2688_v55  ;;  %4169 = vpow2.f32 %v2863_v29  ;;  %2965 = vadd.xlane.f32.xlu1 %v2964_v5  ;;  %v7582_v49 = vld [vmem:[#allocation50_spill] sm:$0xff] }
 0x3ee   : > { %v2865_v34 = vmul.f32 1.442695, %v2753_v61  ;;  %v2867_v23 = vmul.f32 1.442695, %v2754_v15  ;;  %v2869_v0 = vmul.f32 1.442695, %v2755_v44 }
 0x3ef   : > { %v2871_v2 = vmul.f32 1.442695, %v2756_v32  ;;  %v7583_v32 = vsub.f32 %v7582_v49, %v6611_v45  ;;  %v7587_v45 = vsub.f32 %v6705_v7, %v6708_v41  ;;  %v7590_v7 = vld [vmem:[#allocation54_spill] sm:$0xff]  ;;  %v7591_v41 = vld [vmem:[#allocation56_spill] sm:$0xff]  ;;  %v7597_v49 = vld [vmem:[#allocation19_spill] sm:$0xff] }
 0x3f0   : > { %v4164_v40 = vpop.eup %4163  ;;  %4171 = vpow2.f32 %v2865_v34 }
 0x3f1   : > { %v4166_v17 = vpop.eup %4165  ;;  %4173 = vpow2.f32 %v2867_v23  ;;  %v2577_v5 = vmul.f32 1.442695, %v7583_v32  ;;  %v7584_v23 = vsub.f32 %v6634_v30, %v6656_v54 }
 0x3f2   : > { %v2952_v58 = vadd.f32 %v4166_v17, %v4164_v40  ;;  %v4168_v22 = vpop.eup %4167  ;;  %4175 = vpow2.f32 %v2869_v0  ;;  %v7585_v40 = vsub.f32 %v6694_v59, %v6697_v12 }
 0x3f3   : > { %v4170_v56 = vpop.eup %4169  ;;  %4177 = vpow2.f32 %v2871_v2  ;;  %v2579_v0 = vmul.f32 1.442695, %v7584_v23  ;;  %v7600_v23 = vld [vmem:[#allocation57_spill] sm:$0xff] }
 0x3f4   : > { %v2953_v10 = vadd.f32 %v4168_v22, %v2952_v58  ;;  %v2583_v17 = vmul.f32 1.442695, %v7585_v40  ;;  %v2545_v58 = vld [vmem:[#allocation3] sm:$0xff]  ;;  %v7586_v22 = vsub.f32 %v6663_v24, %v6681_v31  ;;  %v7588_v24 = vld [vmem:[#allocation55_spill] sm:$0xff] }
 0x3f5   : > { %v2698_v6 = vpop.permute.xlu1 %2697  ;;  %v7589_v31 = vsub.f32 %v6717_v19, %v7588_v24 }
 0x3f6   : > { %v4172_v53 = vpop.eup %4171  ;;  %v2954_v14 = vadd.f32 %v4170_v56, %v2953_v10  ;;  %v2761_v8 = vsub.f32 %v7580_v28, %v2698_v6  ;;  %v2762_v48 = vsub.f32 %v7581_v63, %v2698_v6  ;;  %v2763_v62 = vsub.f32 %v6638_v33, %v2698_v6 }
 0x3f7   : > { %v4174_v60 = vpop.eup %4173  ;;  %v2764_v21 = vsub.f32 %v6651_v25, %v2698_v6  ;;  %v2581_v10 = vmul.f32 1.442695, %v7586_v22  ;;  %v2585_v56 = vmul.f32 1.442695, %v7587_v45  ;;  %v2546_v6 = vld [vmem:[#allocation3 + $0x8] sm:$0xff] }
 0x3f8   : > { %2955 = vadd.xlane.f32.xlu0 %v2954_v14  ;;  %v2957_v27 = vadd.f32 %v4174_v60, %v4172_v53  ;;  %v4176_v50 = vpop.eup %4175  ;;  %v2881_v4 = vmul.f32 1.442695, %v2761_v8  ;;  %v2883_v37 = vmul.f32 1.442695, %v2762_v48  ;;  %v2885_v47 = vmul.f32 1.442695, %v2763_v62 }
 0x3f9   : > { %v4178_v46 = vpop.eup %4177  ;;  %v2887_v39 = vmul.f32 1.442695, %v2764_v21  ;;  %v2548_v60 = vld [vmem:[#allocation3 + $0x18] sm:$0xff]  ;;  %v2587_v8 = vmul.f32 1.442695, %v7589_v31  ;;  %v7592_v48 = vsub.f32 %v7590_v7, %v7591_v41  ;;  %v7608_v7 = vld [vmem:[#allocation58_spill] sm:$0xff] }
 0x3fa   : > { %v2958_v1 = vadd.f32 %v4176_v50, %v2957_v27  ;;  %4179 = vpow2.f32 %v2881_v4  ;;  %v2547_v4 = vld [vmem:[#allocation3 + $0x10] sm:$0xff] }
 0x3fb   : > { %4181 = vpow2.f32 %v2883_v37  ;;  %v2591_v62 = vmul.f32 1.442695, %v7592_v48  ;;  %v7609_v41 = vld [vmem:[#allocation62_spill] sm:$0xff] }
 0x3fc   : > { %v2959_v3 = vadd.f32 %v4178_v46, %v2958_v1  ;;  %v2703_v38 = vpop.permute.xlu0 %2702  ;;  %4183 = vpow2.f32 %v2885_v47  ;;  %v2549_v1 = vld [vmem:[#allocation3 + $0x20] sm:$0xff]  ;;  %v7610_v48 = vsub.f32 %v7608_v7, %v7609_v41 }
 0x3fd   : > { %v2765_v9 = vsub.f32 %v6667_v20, %v2703_v38  ;;  %v2766_v33 = vsub.f32 %v6671_v16, %v2703_v38  ;;  %v2767_v25 = vsub.f32 %v6678_v51, %v2703_v38  ;;  %v2768_v57 = vsub.f32 %v6687_v11, %v2703_v38 }
 0x3fe   : > { %2960 = vadd.xlane.f32.xlu2 %v2959_v3  ;;  %4185 = vpow2.f32 %v2887_v39 }
 0x3ff   : > { %v2889_v26 = vmul.f32 1.442695, %v2765_v9  ;;  %v2891_v18 = vmul.f32 1.442695, %v2766_v33  ;;  %v2893_v42 = vmul.f32 1.442695, %v2767_v25 }
 0x400   : > { %v4180_v35 = vpop.eup %4179  ;;  %v2895_v55 = vmul.f32 1.442695, %v2768_v57  ;;  %v7593_v33 = vld [vmem:[#allocation16_spill] sm:$0xff]  ;;  %v7594_v25 = vld [vmem:[#allocation17_spill] sm:$0xff] }
 0x401   : > { %v4182_v29 = vpop.eup %4181  ;;  %4187 = vpow2.f32 %v2889_v26  ;;  %v7595_v57 = vsub.f32 %v7593_v33, %v7594_v25  ;;  %v2556_v33 = vld [vmem:[#allocation3 + $0x58] sm:$0xff] }
 0x402   : > { %4189 = vpow2.f32 %v2891_v18  ;;  %v2967_v36 = vadd.f32 %v4182_v29, %v4180_v35  ;;  %v4184_v52 = vpop.eup %4183  ;;  %v2550_v29 = vld [vmem:[#allocation3 + $0x28] sm:$0xff] }
 0x403   : > { %4191 = vpow2.f32 %v2893_v42  ;;  %v2589_v26 = vmul.f32 1.442695, %v7595_v57  ;;  %v2552_v42 = vld [vmem:[#allocation3 + $0x38] sm:$0xff] }
 0x404   : > { %v2968_v61 = vadd.f32 %v4184_v52, %v2967_v36  ;;  %v4186_v20 = vpop.eup %4185  ;;  %4193 = vpow2.f32 %v2895_v55 }
 0x405   : > { %4195 = vpow2.f32 %v2577_v5 }
 0x406   : > { %v2969_v16 = vadd.f32 %v4186_v20, %v2968_v61  ;;  %4197 = vpow2.f32 %v2579_v0 }
 0x407   : > { %v4188_v13 = vpop.eup %4187  ;;  %4199 = vpow2.f32 %v2583_v17 }
 0x408   : > { %v4190_v51 = vpop.eup %4189  ;;  %2970 = vadd.xlane.f32.xlu0 %v2969_v16  ;;  %4201 = vpow2.f32 %v2581_v10 }
 0x409   : > { %v2972_v11 = vadd.f32 %v4190_v51, %v4188_v13  ;;  %v4192_v15 = vpop.eup %4191  ;;  %4203 = vpow2.f32 %v2585_v56  ;;  %v2551_v51 = vld [vmem:[#allocation3 + $0x30] sm:$0xff]  ;;  %v2553_v56 = vld [vmem:[#allocation3 + $0x40] sm:$0xff] }
 0x40a   : > { %v4194_v44 = vpop.eup %4193  ;;  %4205 = vpow2.f32 %v2587_v8 }
 0x40b   : > { %v2973_v43 = vadd.f32 %v4192_v15, %v2972_v11  ;;  %v4196_v2 = vpop.eup %4195  ;;  %4207 = vpow2.f32 %v2591_v62  ;;  %v2599_v62 = vmul.f32 1.442695, %v7610_v48 }
 0x40c   : > { %v2609_v53 = vmul.f32 %v4196_v2, %v2545_v58  ;;  %v4198_v30 = vpop.eup %4197  ;;  %4209 = vpow2.f32 %v2589_v26  ;;  %v2555_v2 = vld [vmem:[#allocation3 + $0x50] sm:$0xff] }
 0x40d   : > { %v2974_v34 = vadd.f32 %v4194_v44, %v2973_v43  ;;  %v4200_v59 = vpop.eup %4199  ;;  %v2610_v12 = vmul.f32 %v4198_v30, %v2546_v6  ;;  %v7596_v44 = vld [vmem:[#allocation18_spill] sm:$0xff] }
 0x40e   : > { %v2612_v21 = vmul.f32 %v4200_v59, %v2548_v60  ;;  %v4202_v27 = vpop.eup %4201  ;;  %v7598_v32 = vsub.f32 %v7596_v44, %v7597_v49  ;;  %v7606_v60 = vld [vmem:[#allocation66_spill] sm:$0xff] }
 0x40f   : > { %2975 = vadd.xlane.f32.xlu2 %v2974_v34  ;;  %v4204_v37 = vpop.eup %4203  ;;  %v2611_v19 = vmul.f32 %v4202_v27, %v2547_v4  ;;  %v7599_v34 = vld [vmem:[#allocation59_spill] sm:$0xff]  ;;  %v2558_v4 = vld [vmem:[#allocation3 + $0x68] sm:$0xff] }
 0x410   : > { %v2613_v39 = vmul.f32 %v4204_v37, %v2549_v1  ;;  %v4206_v18 = vpop.eup %4205  ;;  %v2597_v5 = vmul.f32 1.442695, %v7598_v32  ;;  %v7601_v0 = vsub.f32 %v7599_v34, %v7600_v23  ;;  %v2560_v34 = vld [vmem:[#allocation3 + $0x78] sm:$0xff] }
 0x411   : > { %v4208_v35 = vpop.eup %4207  ;;  %v2614_v36 = vmul.f32 %v4206_v18, %v2550_v29  ;;  %v7615_v29 = vld [vmem:[#allocation20_spill] sm:$0xff] }
 0x412   : > { %v2616_v55 = vmul.f32 %v4208_v35, %v2552_v42  ;;  %v4210_v13 = vpop.eup %4209  ;;  %4211 = vpow2.f32 %v2597_v5  ;;  %v2593_v40 = vmul.f32 1.442695, %v7601_v0  ;;  %v2557_v35 = vld [vmem:[#allocation3 + $0x60] sm:$0xff]  ;;  %v7614_v42 = vld [vmem:[#allocation67_spill] sm:$0xff] }
 0x413   : > { %v2615_v11 = vmul.f32 %v4210_v13, %v2551_v51  ;;  %v7618_v13 = vld [vmem:[#allocation64_spill] sm:$0xff] }
 0x414   : > { %4213 = vpow2.f32 %v2593_v40 }
 0x418   : > { %v4212_v17 = vpop.eup %4211 }
 0x419   : > { %v2619_v58 = vmul.f32 %v4212_v17, %v2555_v2 }
 0x41a   : > { %v4214_v45 = vpop.eup %4213 }
 0x41b   : > { %v2617_v6 = vmul.f32 %v4214_v45, %v2553_v56 }
 0x41c   : > { %v2901_v14 = vpop.xlane.xlu2 %2900 }
 0x41d   : > { %v2977_v54 = vadd.f32 %v2901_v14, %v2609_v53  ;;  %v7602_v53 = vld [vmem:[#allocation60_spill] sm:$0xff]  ;;  %v7603_v14 = vld [vmem:[#allocation61_spill] sm:$0xff] }
 0x41e   : > { %v7604_v30 = vsub.f32 %v7602_v53, %v7603_v14 }
 0x41f   : > { %2994 = vst.msk [vmem:[#allocation3] sm:$0xff] %vm2993_vm4, %v2977_v54 }
 0x420   : > { %v2906_v28 = vpop.xlane.xlu1 %2905  ;;  %v2595_v54 = vmul.f32 1.442695, %v7604_v30 }
 0x421   : > { %v2978_v63 = vadd.f32 %v2906_v28, %v2610_v12  ;;  %v7605_v12 = vld [vmem:[#allocation63_spill] sm:$0xff] }
 0x422   : > { %4215 = vpow2.f32 %v2595_v54  ;;  %v7607_v28 = vsub.f32 %v7605_v12, %v7606_v60 }
 0x423   : > { %2995 = vst.msk [vmem:[#allocation3 + $0x8] sm:$0xff] %vm2993_vm4, %v2978_v63  ;;  %v2554_v63 = vld [vmem:[#allocation3 + $0x48] sm:$0xff] }
 0x424   : > { %v2916_v50 = vpop.xlane.xlu2 %2915  ;;  %v2603_v24 = vmul.f32 1.442695, %v7607_v28 }
 0x425   : > { %v2980_v47 = vadd.f32 %v2916_v50, %v2612_v21 }
 0x426   : > { %4217 = vpow2.f32 %v2603_v24 }
 0x427   : > { %2997 = vst.msk [vmem:[#allocation3 + $0x18] sm:$0xff] %vm2993_vm4, %v2980_v47  ;;  %v2911_v46 = vpop.xlane.xlu0 %2910  ;;  %4219 = vpow2.f32 %v2599_v62 }
 0x428   : > { %v2979_v3 = vadd.f32 %v2911_v46, %v2611_v19  ;;  %v2921_v38 = vpop.xlane.xlu1 %2920  ;;  %v4216_v8 = vpop.eup %4215  ;;  %v7611_v19 = vld [vmem:[#allocation117_spill] sm:$0xff] }
 0x429   : > { %v2981_v9 = vadd.f32 %v2921_v38, %v2613_v39  ;;  %v2618_v21 = vmul.f32 %v4216_v8, %v2554_v63  ;;  %v7612_v46 = vld [vmem:[#allocation65_spill] sm:$0xff] }
 0x42a   : > { %2996 = vst.msk [vmem:[#allocation3 + $0x10] sm:$0xff] %vm2993_vm4, %v2979_v3  ;;  %v7613_v39 = vsub.f32 %v7611_v19, %v7612_v46 }
 0x42b   : > { %2998 = vst.msk [vmem:[#allocation3 + $0x20] sm:$0xff] %vm2993_vm4, %v2981_v9 }
 0x42c   : > { %v4218_v27 = vpop.eup %4217  ;;  %v2601_v3 = vmul.f32 1.442695, %v7613_v39 }
 0x42d   : > { %v2622_v47 = vmul.f32 %v4218_v27, %v2558_v4  ;;  %v4220_v9 = vpop.eup %4219 }
 0x42e   : > { %4221 = vpow2.f32 %v2601_v3  ;;  %v2620_v25 = vmul.f32 %v4220_v9, %v2556_v33 }
 0x42f   : > { %v2926_v61 = vpop.xlane.xlu0 %2925 }
 0x430   : > { %v2936_v52 = vpop.xlane.xlu1 %2935  ;;  %v2982_v16 = vadd.f32 %v2926_v61, %v2614_v36 }
 0x431   : > { %v2984_v20 = vadd.f32 %v2936_v52, %v2616_v55  ;;  %v7616_v55 = vsub.f32 %v7614_v42, %v7615_v29 }
 0x432   : > { %2999 = vst.msk [vmem:[#allocation3 + $0x28] sm:$0xff] %vm2993_vm4, %v2982_v16  ;;  %v7617_v16 = vld [vmem:[#allocation21_spill] sm:$0xff] }
 0x433   : > { %3001 = vst.msk [vmem:[#allocation3 + $0x38] sm:$0xff] %vm2993_vm4, %v2984_v20  ;;  %v2605_v36 = vmul.f32 1.442695, %v7616_v55  ;;  %v7619_v51 = vsub.f32 %v7617_v16, %v7618_v13 }
 0x434   : > { %v4222_v18 = vpop.eup %4221 }
 0x435   : > { %v2621_v52 = vmul.f32 %v4222_v18, %v2557_v35  ;;  %4223 = vpow2.f32 %v2605_v36 }
 0x436   : > { %v2931_v15 = vpop.xlane.xlu2 %2930 }
 0x437   : > { %v2983_v43 = vadd.f32 %v2931_v15, %v2615_v11  ;;  %v2607_v11 = vmul.f32 1.442695, %v7619_v51 }
 0x439   : > { %3000 = vst.msk [vmem:[#allocation3 + $0x30] sm:$0xff] %vm2993_vm4, %v2983_v43  ;;  %v2559_v43 = vld [vmem:[#allocation3 + $0x70] sm:$0xff]  ;;  %4225 = vpow2.f32 %v2607_v11 }
 0x43b   : > { %v4224_v15 = vpop.eup %4223 }
 0x43c   : > { %v2623_v44 = vmul.f32 %v4224_v15, %v2559_v43 }
 0x43f   : > { %v4226_v5 = vpop.eup %4225 }
 0x440   : > { %v2624_v23 = vmul.f32 %v4226_v5, %v2560_v34 }
 0x44b   : > { %v2951_v22 = vpop.xlane.xlu1 %2950 }
 0x44c   : > { %v2987_v10 = vadd.f32 %v2951_v22, %v2619_v58 }
 0x44e   : > { %3004 = vst.msk [vmem:[#allocation3 + $0x50] sm:$0xff] %vm2993_vm4, %v2987_v10 }
 0x451   : > { %v2941_v59 = vpop.xlane.xlu0 %2940 }
 0x452   : > { %v2985_v31 = vadd.f32 %v2941_v59, %v2617_v6 }
 0x454   : > { %3002 = vst.msk [vmem:[#allocation3 + $0x40] sm:$0xff] %vm2993_vm4, %v2985_v31 }
 0x45d   : > { %v2946_v50 = vpop.xlane.xlu2 %2945 }
 0x45e   : > { %v2986_v37 = vadd.f32 %v2946_v50, %v2618_v21 }
 0x460   : > { %3003 = vst.msk [vmem:[#allocation3 + $0x48] sm:$0xff] %vm2993_vm4, %v2986_v37  ;;  %v2966_v1 = vpop.xlane.xlu1 %2965 }
 0x461   : > { %v2990_v38 = vadd.f32 %v2966_v1, %v2622_v47 }
 0x463   : > { %3007 = vst.msk [vmem:[#allocation3 + $0x68] sm:$0xff] %vm2993_vm4, %v2990_v38 }
 0x46b   : > { %v2956_v57 = vpop.xlane.xlu0 %2955 }
 0x46c   : > { %v2988_v26 = vadd.f32 %v2956_v57, %v2620_v25 }
 0x46e   : > { %3005 = vst.msk [vmem:[#allocation3 + $0x58] sm:$0xff] %vm2993_vm4, %v2988_v26 }
 0x471   : > { %v2961_v61 = vpop.xlane.xlu2 %2960 }
 0x472   : > { %v2989_v20 = vadd.f32 %v2961_v61, %v2621_v52 }
 0x474   : > { %3006 = vst.msk [vmem:[#allocation3 + $0x60] sm:$0xff] %vm2993_vm4, %v2989_v20 }
 0x47b   : > { %v2971_v49 = vpop.xlane.xlu0 %2970 }
 0x47c   : > { %v2991_v32 = vadd.f32 %v2971_v49, %v2623_v44 }
 0x47e   : > { %3008 = vst.msk [vmem:[#allocation3 + $0x70] sm:$0xff] %vm2993_vm4, %v2991_v32 }
 0x481   : > { %3109 = sbr.rel (%p3877_p2) target bundleno = 1188 (0x4a4), region = 63 }
 0x482   : > { %v2976_v0 = vpop.xlane.xlu2 %2975 }
 0x483   : > { %v2992_v40 = vadd.f32 %v2976_v0, %v2624_v23 }
 0x485   : > { %3009 = vst.msk [vmem:[#allocation3 + $0x78] sm:$0xff] %vm2993_vm4, %v2992_v40 }
 0x486   : > { %v3126_v17 = vld [vmem:[#allocation3] sm:$0xff]  ;;  %v3127_v2 = vld [vmem:[#allocation3 + $0x8] sm:$0xff]  ;;  %v3128_v58 = vld [vmem:[#allocation3 + $0x10] sm:$0xff] }
 0x487   : > { %4243 = vlog2.f32 %v3126_v17  ;;  %v3129_v22 = vld [vmem:[#allocation3 + $0x18] sm:$0xff]  ;;  %v3130_v10 = vld [vmem:[#allocation3 + $0x20] sm:$0xff]  ;;  %v3131_v45 = vld [vmem:[#allocation3 + $0x28] sm:$0xff] }
 0x488   : > { %4245 = vlog2.f32 %v3127_v2  ;;  %v3132_v56 = vld [vmem:[#allocation3 + $0x30] sm:$0xff]  ;;  %v3110_v14 = vld [vmem:[#allocation2] sm:$0xff]  ;;  %v3133_v30 = vld [vmem:[#allocation3 + $0x38] sm:$0xff] }
 0x489   : > { %4247 = vlog2.f32 %v3128_v58  ;;  %v3111_v59 = vld [vmem:[#allocation2 + $0x8] sm:$0xff]  ;;  %v3134_v12 = vld [vmem:[#allocation3 + $0x40] sm:$0xff]  ;;  %v3112_v31 = vld [vmem:[#allocation2 + $0x10] sm:$0xff] }
 0x48a   : > { %4249 = vlog2.f32 %v3129_v22  ;;  %v3190_v28 = vld [vmem:[#allocation4] sm:$0xff]  ;;  %v3135_v8 = vld [vmem:[#allocation3 + $0x48] sm:$0xff]  ;;  %v3113_v62 = vld [vmem:[#allocation2 + $0x18] sm:$0xff] }
 0x48b   : > { %4251 = vlog2.f32 %v3130_v10  ;;  %v3191_v41 = vld [vmem:[#allocation4 + $0x8] sm:$0xff]  ;;  %v3136_v21 = vld [vmem:[#allocation3 + $0x50] sm:$0xff]  ;;  %v3114_v47 = vld [vmem:[#allocation2 + $0x20] sm:$0xff] }
 0x48c   : > { %4253 = vlog2.f32 %v3131_v45  ;;  %v3192_v4 = vld [vmem:[#allocation4 + $0x10] sm:$0xff]  ;;  %v3137_v1 = vld [vmem:[#allocation3 + $0x58] sm:$0xff]  ;;  %v3115_v9 = vld [vmem:[#allocation2 + $0x28] sm:$0xff] }
 0x48d   : > { %v4244_v53 = vpop.eup %4243  ;;  %4255 = vlog2.f32 %v3132_v56  ;;  %v3193_v3 = vld [vmem:[#allocation4 + $0x18] sm:$0xff]  ;;  %v3138_v33 = vld [vmem:[#allocation3 + $0x60] sm:$0xff]  ;;  %v3116_v42 = vld [vmem:[#allocation2 + $0x30] sm:$0xff] }
 0x48e   : > { %v4246_v54 = vpop.eup %4245  ;;  %v3143_v6 = vmul.f32 0.6931472, %v4244_v53  ;;  %4257 = vlog2.f32 %v3133_v30  ;;  %v3194_v18 = vld [vmem:[#allocation4 + $0x20] sm:$0xff]  ;;  %v3139_v29 = vld [vmem:[#allocation3 + $0x68] sm:$0xff]  ;;  %v3117_v16 = vld [vmem:[#allocation2 + $0x38] sm:$0xff] }
 0x48f   : > { %v4248_v60 = vpop.eup %4247  ;;  %v3145_v24 = vmul.f32 0.6931472, %v4246_v54  ;;  %4259 = vlog2.f32 %v3134_v12  ;;  %v3195_v61 = vld [vmem:[#allocation4 + $0x28] sm:$0xff]  ;;  %v3140_v13 = vld [vmem:[#allocation3 + $0x70] sm:$0xff]  ;;  %v3118_v49 = vld [vmem:[#allocation2 + $0x40] sm:$0xff] }
 0x490   : > { %v4250_v63 = vpop.eup %4249  ;;  %v3174_v7 = vadd.f32 %v3143_v6, %v3110_v14  ;;  %v3147_v48 = vmul.f32 0.6931472, %v4248_v60  ;;  %4261 = vlog2.f32 %v3135_v8  ;;  %v3196_v43 = vld [vmem:[#allocation4 + $0x30] sm:$0xff]  ;;  %v3141_v32 = vld [vmem:[#allocation3 + $0x78] sm:$0xff]  ;;  %v3119_v17 = vld [vmem:[#allocation2 + $0x48] sm:$0xff] }
 0x491   : > { %v4252_v27 = vpop.eup %4251  ;;  %v3175_v50 = vadd.f32 %v3145_v24, %v3111_v59  ;;  %v3149_v37 = vmul.f32 0.6931472, %v4250_v63  ;;  %4263 = vlog2.f32 %v3136_v21  ;;  %v3197_v0 = vld [vmem:[#allocation4 + $0x38] sm:$0xff]  ;;  %v3198_v10 = vld [vmem:[#allocation4 + $0x40] sm:$0xff]  ;;  %v3120_v56 = vld [vmem:[#allocation2 + $0x50] sm:$0xff] }
 0x492   : > { %v4254_v19 = vpop.eup %4253  ;;  %v3206_v46 = vsub.f32 %v3174_v7, %v3190_v28  ;;  %v3176_v39 = vadd.f32 %v3147_v48, %v3112_v31  ;;  %v3151_v38 = vmul.f32 0.6931472, %v4252_v27  ;;  %4265 = vlog2.f32 %v3137_v1  ;;  %v3199_v54 = vld [vmem:[#allocation4 + $0x48] sm:$0xff]  ;;  %v3121_v59 = vld [vmem:[#allocation2 + $0x58] sm:$0xff]  ;;  %v3200_v24 = vld [vmem:[#allocation4 + $0x50] sm:$0xff] }
 0x493   : > { %v4256_v25 = vpop.eup %4255  ;;  %v3207_v57 = vsub.f32 %v3175_v50, %v3191_v41  ;;  %v3177_v26 = vadd.f32 %v3149_v37, %v3113_v62  ;;  %v3153_v35 = vmul.f32 0.6931472, %v4254_v19  ;;  %4267 = vlog2.f32 %v3138_v33  ;;  %v3122_v8 = vld [vmem:[#allocation2 + $0x60] sm:$0xff]  ;;  %v3201_v48 = vld [vmem:[#allocation4 + $0x58] sm:$0xff]  ;;  %v3123_v21 = vld [vmem:[#allocation2 + $0x68] sm:$0xff] }
 0x494   : > { %v4258_v55 = vpop.eup %4257  ;;  %3222 = vst.msk [vmem:[%s4574_s15] sm:$0xff] %vm2993_vm4, %v3206_v46  ;;  %v3208_v36 = vsub.f32 %v3176_v39, %v3192_v4  ;;  %v3178_v52 = vadd.f32 %v3151_v38, %v3114_v47  ;;  %v3155_v20 = vmul.f32 0.6931472, %v4256_v25  ;;  %4269 = vlog2.f32 %v3139_v29  ;;  %v3202_v37 = vld [vmem:[#allocation4 + $0x60] sm:$0xff]  ;;  %v3124_v1 = vld [vmem:[#allocation2 + $0x70] sm:$0xff] }
 0x495   : > { %v4260_v51 = vpop.eup %4259  ;;  %3223 = vst.msk [vmem:[%s4574_s15 + $0x8] sm:$0xff] %vm2993_vm4, %v3207_v57  ;;  %v3209_v11 = vsub.f32 %v3177_v26, %v3193_v3  ;;  %v3179_v15 = vadd.f32 %v3153_v35, %v3115_v9  ;;  %v3157_v44 = vmul.f32 0.6931472, %v4258_v55  ;;  %4271 = vlog2.f32 %v3140_v13  ;;  %v3203_v3 = vld [vmem:[#allocation4 + $0x68] sm:$0xff]  ;;  %v3125_v9 = vld [vmem:[#allocation2 + $0x78] sm:$0xff]  ;;  %v3204_v57 = vld [vmem:[#allocation4 + $0x70] sm:$0xff] }
 0x496   : > { %v4262_v5 = vpop.eup %4261  ;;  %3224 = vst.msk [vmem:[%s4574_s15 + $0x10] sm:$0xff] %vm2993_vm4, %v3208_v36  ;;  %v3210_v34 = vsub.f32 %v3178_v52, %v3194_v18  ;;  %v3180_v23 = vadd.f32 %v3155_v20, %v3116_v42  ;;  %v3159_v40 = vmul.f32 0.6931472, %v4260_v51  ;;  %4273 = vlog2.f32 %v3141_v32  ;;  %v3205_v42 = vld [vmem:[#allocation4 + $0x78] sm:$0xff] }
 0x497   : > { %v4264_v2 = vpop.eup %4263  ;;  %3225 = vst.msk [vmem:[%s4574_s15 + $0x18] sm:$0xff] %vm2993_vm4, %v3209_v11  ;;  %v3211_v58 = vsub.f32 %v3179_v15, %v3195_v61  ;;  %v3181_v22 = vadd.f32 %v3157_v44, %v3117_v16  ;;  %v3161_v45 = vmul.f32 0.6931472, %v4262_v5 }
 0x498   : > { %v4266_v53 = vpop.eup %4265  ;;  %3226 = vst.msk [vmem:[%s4574_s15 + $0x20] sm:$0xff] %vm2993_vm4, %v3210_v34  ;;  %v3212_v14 = vsub.f32 %v3180_v23, %v3196_v43  ;;  %v3182_v30 = vadd.f32 %v3159_v40, %v3118_v49  ;;  %v3163_v6 = vmul.f32 0.6931472, %v4264_v2 }
 0x499   : > { %v4268_v12 = vpop.eup %4267  ;;  %3227 = vst.msk [vmem:[%s4574_s15 + $0x28] sm:$0xff] %vm2993_vm4, %v3211_v58  ;;  %v3213_v60 = vsub.f32 %v3181_v22, %v3197_v0  ;;  %v3183_v28 = vadd.f32 %v3161_v45, %v3119_v17  ;;  %v3165_v31 = vmul.f32 0.6931472, %v4266_v53 }
 0x49a   : > { %v4270_v63 = vpop.eup %4269  ;;  %3228 = vst.msk [vmem:[%s4574_s15 + $0x30] sm:$0xff] %vm2993_vm4, %v3212_v14  ;;  %v3214_v7 = vsub.f32 %v3182_v30, %v3198_v10  ;;  %v3184_v41 = vadd.f32 %v3163_v6, %v3120_v56  ;;  %v3167_v62 = vmul.f32 0.6931472, %v4268_v12 }
 0x49b   : > { %v4272_v27 = vpop.eup %4271  ;;  %3229 = vst.msk [vmem:[%s4574_s15 + $0x38] sm:$0xff] %vm2993_vm4, %v3213_v60  ;;  %v3215_v50 = vsub.f32 %v3183_v28, %v3199_v54  ;;  %v3185_v4 = vadd.f32 %v3165_v31, %v3121_v59  ;;  %v3169_v47 = vmul.f32 0.6931472, %v4270_v63 }
 0x49c   : > { %v4274_v19 = vpop.eup %4273  ;;  %3230 = vst.msk [vmem:[%s4574_s15 + $0x40] sm:$0xff] %vm2993_vm4, %v3214_v7  ;;  %v3216_v46 = vsub.f32 %v3184_v41, %v3200_v24  ;;  %v3186_v39 = vadd.f32 %v3167_v62, %v3122_v8  ;;  %v3171_v38 = vmul.f32 0.6931472, %v4272_v27 }
 0x49d   : > { %3231 = vst.msk [vmem:[%s4574_s15 + $0x48] sm:$0xff] %vm2993_vm4, %v3215_v50  ;;  %v3217_v33 = vsub.f32 %v3185_v4, %v3201_v48  ;;  %v3187_v25 = vadd.f32 %v3169_v47, %v3123_v21  ;;  %v3173_v26 = vmul.f32 0.6931472, %v4274_v19 }
 0x49e   : > { %3232 = vst.msk [vmem:[%s4574_s15 + $0x50] sm:$0xff] %vm2993_vm4, %v3216_v46  ;;  %v3218_v18 = vsub.f32 %v3186_v39, %v3202_v37  ;;  %v3188_v35 = vadd.f32 %v3171_v38, %v3124_v1 }
 0x49f   : > { %3233 = vst.msk [vmem:[%s4574_s15 + $0x58] sm:$0xff] %vm2993_vm4, %v3217_v33  ;;  %v3219_v29 = vsub.f32 %v3187_v25, %v3203_v3  ;;  %v3189_v55 = vadd.f32 %v3173_v26, %v3125_v9 }
 0x4a0   : > { %3234 = vst.msk [vmem:[%s4574_s15 + $0x60] sm:$0xff] %vm2993_vm4, %v3218_v18  ;;  %v3220_v36 = vsub.f32 %v3188_v35, %v3204_v57 }
 0x4a1   : > { %3235 = vst.msk [vmem:[%s4574_s15 + $0x68] sm:$0xff] %vm2993_vm4, %v3219_v29  ;;  %v3221_v52 = vsub.f32 %v3189_v55, %v3205_v42 }
 0x4a2   : > { %3236 = vst.msk [vmem:[%s4574_s15 + $0x70] sm:$0xff] %vm2993_vm4, %v3220_v36 }
 0x4a3   : > { %3237 = vst.msk [vmem:[%s4574_s15 + $0x78] sm:$0xff] %vm2993_vm4, %v3221_v52 }
 0x4a4 PF: > { %3249 = sbr.rel (!%p4443_p9) target bundleno = 1225 (0x4c9), region = 67  ;;  %s3880_s28 = sshll.u32 (%p4443_p9), %s4329_s19, 2  ;;  %v3268_v61 = vld [vmem:[%s4578_s27] sm:$0xff] (%p4443_p9)  ;;  %v3270_v20 = vld [vmem:[%s4578_s27 + $0x8] sm:$0xff] (%p4443_p9)  ;;  %v3272_v16 = vld [vmem:[%s4578_s27 + $0x10] sm:$0xff] (%p4443_p9) }
 0x4a5   : > { %s3953_s29 = sshll.u32 (%p4443_p9), %s4333_s20, 7  ;;  %v3274_v13 = vld [vmem:[%s4578_s27 + $0x18] sm:$0xff] (%p4443_p9)  ;;  %v3276_v51 = vld [vmem:[%s4578_s27 + $0x20] sm:$0xff] (%p4443_p9)  ;;  %v3278_v11 = vld [vmem:[%s4578_s27 + $0x28] sm:$0xff] (%p4443_p9) }
 0x4a6   : > { %s3253_s5 = sadd.s32 (%p4443_p9), %s3953_s29, %s3880_s28  ;;  %v3280_v15 = vld [vmem:[%s4578_s27 + $0x30] sm:$0xff] (%p4443_p9)  ;;  %v3282_v43 = vld [vmem:[%s4578_s27 + $0x38] sm:$0xff] (%p4443_p9)  ;;  %v3284_v44 = vld [vmem:[%s4578_s27 + $0x40] sm:$0xff] (%p4443_p9) }
 0x4a7   : > { %s3882_s6 = sshll.u32 (%p4443_p9), %s3253_s5, 2  ;;  %v3286_v49 = vld [vmem:[%s4578_s27 + $0x48] sm:$0xff] (%p4443_p9)  ;;  %v3288_v32 = vld [vmem:[%s4578_s27 + $0x50] sm:$0xff] (%p4443_p9)  ;;  %v3290_v5 = vld [vmem:[%s4578_s27 + $0x58] sm:$0xff] (%p4443_p9) }
 0x4a8   : > { %s7003_s10 = scalar_lea.vmem (%p4443_p9), %s7097_s3, %s3882_s6  ;;  %v3292_v34 = vld [vmem:[%s4578_s27 + $0x60] sm:$0xff] (%p4443_p9)  ;;  %v3294_v23 = vld [vmem:[%s4578_s27 + $0x68] sm:$0xff] (%p4443_p9)  ;;  %v3296_v0 = vld [vmem:[%s4578_s27 + $0x70] sm:$0xff] (%p4443_p9) }
 0x4a9   : > { %3269 = vst [vmem:[%s7003_s10] sm:$0xff] %v3268_v61  ;;  %v3298_v40 = vld [vmem:[%s4578_s27 + $0x78] sm:$0xff]  ;;  %v3300_v17 = vld [vmem:[%s4578_s27 + $0x80] sm:$0xff]  ;;  %v3302_v2 = vld [vmem:[%s4578_s27 + $0x88] sm:$0xff] }
 0x4aa   : > { %3271 = vst [vmem:[%s7003_s10 + $0x8] sm:$0xff] %v3270_v20  ;;  %v3304_v58 = vld [vmem:[%s4578_s27 + $0x90] sm:$0xff]  ;;  %v3306_v22 = vld [vmem:[%s4578_s27 + $0x98] sm:$0xff]  ;;  %v3308_v10 = vld [vmem:[%s4578_s27 + $0xa0] sm:$0xff] }
 0x4ab   : > { %3273 = vst [vmem:[%s7003_s10 + $0x20] sm:$0xff] %v3272_v16  ;;  %v3310_v45 = vld [vmem:[%s4578_s27 + $0xa8] sm:$0xff]  ;;  %v3312_v56 = vld [vmem:[%s4578_s27 + $0xb0] sm:$0xff]  ;;  %v3314_v53 = vld [vmem:[%s4578_s27 + $0xb8] sm:$0xff] }
 0x4ac   : > { %3275 = vst [vmem:[%s7003_s10 + $0x28] sm:$0xff] %v3274_v13  ;;  %v3316_v14 = vld [vmem:[%s4578_s27 + $0xc0] sm:$0xff]  ;;  %v3318_v30 = vld [vmem:[%s4578_s27 + $0xc8] sm:$0xff]  ;;  %v3320_v54 = vld [vmem:[%s4578_s27 + $0xd0] sm:$0xff] }
 0x4ad   : > { %3277 = vst [vmem:[%s7003_s10 + $0x40] sm:$0xff] %v3276_v51  ;;  %v3322_v6 = vld [vmem:[%s4578_s27 + $0xd8] sm:$0xff]  ;;  %v3324_v59 = vld [vmem:[%s4578_s27 + $0xe0] sm:$0xff]  ;;  %v3326_v12 = vld [vmem:[%s4578_s27 + $0xe8] sm:$0xff] }
 0x4ae   : > { %3279 = vst [vmem:[%s7003_s10 + $0x48] sm:$0xff] %v3278_v11  ;;  %v3328_v60 = vld [vmem:[%s4578_s27 + $0xf0] sm:$0xff]  ;;  %v3330_v28 = vld [vmem:[%s4578_s27 + $0xf8] sm:$0xff] }
 0x4af   : > { %3281 = vst [vmem:[%s7003_s10 + $0x60] sm:$0xff] %v3280_v15 }
 0x4b0   : > { %3283 = vst [vmem:[%s7003_s10 + $0x68] sm:$0xff] %v3282_v43 }
 0x4b1   : > { %3285 = vst [vmem:[%s7003_s10 + $0x80] sm:$0xff] %v3284_v44 }
 0x4b2   : > { %3287 = vst [vmem:[%s7003_s10 + $0x88] sm:$0xff] %v3286_v49 }
 0x4b3   : > { %3289 = vst [vmem:[%s7003_s10 + $0xa0] sm:$0xff] %v3288_v32 }
 0x4b4   : > { %3291 = vst [vmem:[%s7003_s10 + $0xa8] sm:$0xff] %v3290_v5 }
 0x4b5   : > { %3293 = vst [vmem:[%s7003_s10 + $0xc0] sm:$0xff] %v3292_v34 }
 0x4b6   : > { %3295 = vst [vmem:[%s7003_s10 + $0xc8] sm:$0xff] %v3294_v23 }
 0x4b7   : > { %3297 = vst [vmem:[%s7003_s10 + $0xe0] sm:$0xff] %v3296_v0 }
 0x4b8   : > { %3299 = vst [vmem:[%s7003_s10 + $0xe8] sm:$0xff] %v3298_v40 }
 0x4b9   : > { %3301 = vst [vmem:[%s7003_s10 + $0x100] sm:$0xff] %v3300_v17 }
 0x4ba   : > { %3303 = vst [vmem:[%s7003_s10 + $0x108] sm:$0xff] %v3302_v2 }
 0x4bb   : > { %3305 = vst [vmem:[%s7003_s10 + $0x120] sm:$0xff] %v3304_v58 }
 0x4bc   : > { %3307 = vst [vmem:[%s7003_s10 + $0x128] sm:$0xff] %v3306_v22 }
 0x4bd   : > { %3309 = vst [vmem:[%s7003_s10 + $0x140] sm:$0xff] %v3308_v10 }
 0x4be   : > { %3311 = vst [vmem:[%s7003_s10 + $0x148] sm:$0xff] %v3310_v45 }
 0x4bf   : > { %3313 = vst [vmem:[%s7003_s10 + $0x160] sm:$0xff] %v3312_v56 }
 0x4c0   : > { %3315 = vst [vmem:[%s7003_s10 + $0x168] sm:$0xff] %v3314_v53 }
 0x4c1   : > { %3317 = vst [vmem:[%s7003_s10 + $0x180] sm:$0xff] %v3316_v14 }
 0x4c2   : > { %3319 = vst [vmem:[%s7003_s10 + $0x188] sm:$0xff] %v3318_v30 }
 0x4c3   : > { %3321 = vst [vmem:[%s7003_s10 + $0x1a0] sm:$0xff] %v3320_v54 }
 0x4c4   : > { %3323 = vst [vmem:[%s7003_s10 + $0x1a8] sm:$0xff] %v3322_v6 }
 0x4c5   : > { %3325 = vst [vmem:[%s7003_s10 + $0x1c0] sm:$0xff] %v3324_v59 }
 0x4c6   : > { %3327 = vst [vmem:[%s7003_s10 + $0x1c8] sm:$0xff] %v3326_v12 }
 0x4c7   : > { %3329 = vst [vmem:[%s7003_s10 + $0x1e0] sm:$0xff] %v3328_v60 }
 0x4c8   : > { %3331 = vst [vmem:[%s7003_s10 + $0x1e8] sm:$0xff] %v3330_v28 }
 0x4c9 PF: > { %s15_s23 = sadd.s32 1, %s4345_s23   ;;  %s7620_s11 = sld [smem:[#allocation7_spill]] }
 0x4ca   : > { %p12_p3 = scmp.ge.s32.totalorder %s15_s23, 6   ;;  %s7621_s15 = smov %s4317_s16 }
 0x4cb   : > { %s7622_s16 = smov %s4448_s8  ;;  %s7623_s17 = smov %s4325_s18 }
 0x4cc   : > { %s7624_s18 = smov %s4437_s30  ;;  %s7625_s19 = smov %s4337_s21 }
 0x4cd   : > { %s7626_s20 = smov %s4341_s22  ;;  %s7627_s21 = smov %s7630_s25 }
 0x4ce   :  { %14 = sbr.rel (!%p12_p3) target bundleno = 7 (0x7), region = 139 }
 0x4cf   : > { %s7628_s22 = smov %s7620_s11 }

</bundles_post_ra>
